<compile_context>
chip_gen: v5e
topology: v5e:2x2
jax: 0.10.0
libtpu: 0.0.40
codegen_flags: <defaults>
</compile_context>

<pallas_src>
import numpy as np
import jax
import jax.numpy as jnp
from jax.experimental import pallas as pl
from jax.experimental.pallas import tpu as pltpu  # noqa: F401  (kept for TPU-specific tuning hooks)

# ----------------------------- small synthetic config -----------------------------
BATCH = 2
IMG_C, IMG_HW, PATCH = 3, 32, 16
N_PATCHES = (IMG_HW // PATCH) ** 2            # 4
N_TOKENS = N_PATCHES + 1                      # 5 (class token + patches)
VIT_DIM = 32                                  # image_code_dim
VIT_HEADS = 4
VIT_LAYERS = 2
VIT_MLP = 64
VOCAB_SIZE = 20
WORD_DIM = 16
ATTN_DIM = 16
HIDDEN = 32
RNN_LAYERS = 1
MAX_CAP = 8
LN_EPS = 1e-6
V_PAD = 128                                   # lane-dense padded logits width


def _ln(v, g, b):
    mu = jnp.mean(v, axis=-1, keepdims=True)
    var = jnp.mean(jnp.square(v - mu), axis=-1, keepdims=True)
    return (v - mu) * jax.lax.rsqrt(var + LN_EPS) * g + b


# ----------------------------- fused ViT encoder kernel -----------------------------
def _vit_encoder_kernel(patches_ref, conv_w_ref, base_ref, mask_ref,
                        ln1_g_ref, ln1_b_ref,
                        wq_ref, bq_ref, wk_ref, bk_ref, wv_ref, bv_ref,
                        wo_ref, bo_ref, ln2_g_ref, ln2_b_ref,
                        mlp_w1_ref, mlp_b1_ref, mlp_w2_ref, mlp_b2_ref,
                        lnf_g_ref, lnf_b_ref, o_ref):
    # Whole batch in one invocation: every matmul runs with M = B*S rows; per-image
    # attention isolation comes from the precomputed block-diagonal -inf mask.
    neg_mask = mask_ref[...]                                              # (M, M)
    x = jnp.dot(patches_ref[...], conv_w_ref[...],
                preferred_element_type=jnp.float32) + base_ref[...]       # (M, D)

    for l in range(VIT_LAYERS):
        # --- self attention block (per-head weights pre-split host-side: no lane slices;
        #     1/sqrt(Dh) already folded into wq/bq) ---
        y = _ln(x, ln1_g_ref[l], ln1_b_ref[l])
        wq_l, bq_l = wq_ref[l], bq_ref[l]                                 # (H, D, Dh), (H, 1, Dh)
        wk_l, bk_l = wk_ref[l], bk_ref[l]
        wv_l, bv_l = wv_ref[l], bv_ref[l]
        wo_l = wo_ref[l]                                                  # (H, Dh, D)
        acc = None
        for h in range(VIT_HEADS):
            qh = jnp.dot(y, wq_l[h], preferred_element_type=jnp.float32) + bq_l[h]
            kh = jnp.dot(y, wk_l[h], preferred_element_type=jnp.float32) + bk_l[h]
            vh = jnp.dot(y, wv_l[h], preferred_element_type=jnp.float32) + bv_l[h]
            s = jax.lax.dot_general(qh, kh, (((1,), (1,)), ((), ())),
                                    preferred_element_type=jnp.float32) + neg_mask   # (M, M)
            s = s - jnp.max(s, axis=-1, keepdims=True)
            e = jnp.exp(s)                                                # off-block entries -> 0
            p = e / jnp.sum(e, axis=-1, keepdims=True)
            oh = jnp.dot(p, vh, preferred_element_type=jnp.float32)      # (M, Dh)
            # fuse the head-concat with the output projection: sum_h oh @ Wout_h
            term = jnp.dot(oh, wo_l[h], preferred_element_type=jnp.float32)
            acc = term if acc is None else acc + term
        x = x + acc + bo_ref[l]                                           # residual

        # --- MLP block ---
        y = _ln(x, ln2_g_ref[l], ln2_b_ref[l])
        # TODO(synk): torchvision MLP uses exact (erf) GELU; tanh approximation used here.
        h1 = jax.nn.gelu(jnp.dot(y, mlp_w1_ref[l], preferred_element_type=jnp.float32)
                         + mlp_b1_ref[l], approximate=True)
        x = x + jnp.dot(h1, mlp_w2_ref[l], preferred_element_type=jnp.float32) + mlp_b2_ref[l]

    o_ref[...] = _ln(x, lnf_g_ref[...], lnf_b_ref[...])


def vit_encode(kenc, images):
    B, C, Hh, Ww = images.shape
    p = PATCH
    nh, nw = Hh // p, Ww // p
    cp2 = C * p * p
    S, D = N_TOKENS, VIT_DIM
    M = B * S

    # _process_input: conv (stride == kernel == patch) == per-patch linear projection.
    patches = images.reshape(B, C, nh, p, nw, p).transpose(0, 2, 4, 1, 3, 5)
    patches = patches.reshape(B, nh * nw, cp2)
    # prepend an all-zero row per batch element -> class-token slot (bias comes from `base`)
    patches_ext = jnp.concatenate(
        [jnp.zeros((B, 1, cp2), jnp.float32), patches], axis=1).reshape(M, cp2)
    base_t = jnp.tile(kenc['base'], (B, 1))                               # (M, D)

    # block-diagonal attention mask (batch isolation), built host-side as a constant
    rb = np.repeat(np.arange(B), S)
    neg_mask = jnp.asarray(
        np.where(rb[:, None] == rb[None, :], 0.0, -1e30).astype(np.float32))   # (M, M)

    args = [patches_ext, kenc['conv_w'], base_t, neg_mask,
            kenc['ln1_g'], kenc['ln1_b'],
            kenc['wq'], kenc['bq'], kenc['wk'], kenc['bk'], kenc['wv'], kenc['bv'],
            kenc['wo'], kenc['bo'],
            kenc['ln2_g'], kenc['ln2_b'],
            kenc['mlp_w1'], kenc['mlp_b1'], kenc['mlp_w2'], kenc['mlp_b2'],
            kenc['lnf_g'], kenc['lnf_b']]

    Dh = D // VIT_HEADS
    flops = 2 * M * cp2 * D + VIT_LAYERS * (
        VIT_HEADS * (3 * 2 * M * D * Dh + 2 * (2 * M * M * Dh) + 2 * M * Dh * D)
        + 2 * (2 * M * D * VIT_MLP))
    transcendentals = VIT_LAYERS * (VIT_HEADS * M * M + M * VIT_MLP)
    bytes_accessed = 4 * (sum(int(np.prod(a.shape)) for a in args) + M * D)

    out = pl.pallas_call(
        _vit_encoder_kernel,
        out_shape=jax.ShapeDtypeStruct((M, D), jnp.float32),
        cost_estimate=pl.CostEstimate(flops=int(flops),
                                      transcendentals=int(transcendentals),
                                      bytes_accessed=int(bytes_accessed)),
    )(*args)
    return out.reshape(B, S, D)


# ----------------------------- fused attention-GRU decoder kernel -----------------------------
def _make_decoder_kernel(num_layers, T):
    def kernel(*refs):
        (mask_ref, emb_ref, ic_ref,
         init_w_ref, init_b_ref,
         att_wq_ref, att_bq_ref, att_wk_ref, att_bk_ref) = refs[:9]
        idx = 9
        gru_refs = []
        for l in range(num_layers):
            n = 5 if l == 0 else 4
            gru_refs.append(refs[idx:idx + n])
            idx += n
        fc_w_ref, fc_b_ref, pred_ref, alpha_ref = refs[idx:idx + 4]

        B, P, D = ic_ref.shape
        A = att_wk_ref.shape[-1]

        ic = ic_ref[...]                                                  # (B, P, D)
        emb_all = emb_ref[...]                                            # (T, B, W)
        mask_all = mask_ref[...]                                          # (T, B, 1) in {0,1}

        # ---- run-once prologue: init_state (mean + Linear) and hoisted key projection ----
        mean_ic = jnp.mean(ic, axis=1)                                    # (B, D)
        hs = [jnp.dot(mean_ic, init_w_ref[l], preferred_element_type=jnp.float32)
              + init_b_ref[l] for l in range(num_layers)]                 # per-layer (B, H) in vregs
        keys = jnp.dot(ic.reshape(B * P, D), att_wk_ref[...],
                       preferred_element_type=jnp.float32) + att_bk_ref[...]
        keys = keys.reshape(B, P, A)

        # ---- fully unrolled time loop (T is static & tiny): hidden state stays in vregs ----
        for t in range(T):
            mask_t = mask_all[t]                                          # (B, 1)
            emb_t = emb_all[t]                                            # (B, W)

            # ProductAttention on the MXU (1/sqrt(key_dim) folded into att_wq/att_bq host-side);
            # value_proj exists in the PyTorch module but is unused in forward().
            q = jnp.dot(hs[-1], att_wq_ref[...],
                        preferred_element_type=jnp.float32) + att_bq_ref[...]        # (B, A)
            s = jnp.einsum('bxa,bpa->bxp', q[:, None, :], keys,
                           preferred_element_type=jnp.float32)                        # (B, 1, P)
            s = s - jnp.max(s, axis=-1, keepdims=True)
            e = jnp.exp(s)
            alpha3 = e / jnp.sum(e, axis=-1, keepdims=True)                           # (B, 1, P)
            ctx = jnp.einsum('bxp,bpd->bxd', alpha3, ic,
                             preferred_element_type=jnp.float32)[:, 0, :]             # (B, D)
            alpha = alpha3[:, 0, :]                                                   # (B, P)

            # ---- single-timestep multi-layer GRU, gate order [r, z, n];
            #      per-gate weights pre-split host-side (no lane-offset slices) ----
            out = None
            new_hs = []
            for l in range(num_layers):
                h_prev = hs[l]
                if l == 0:
                    wi_c_ref, wi_e_ref, wh_ref, bi_ref, bh_ref = gru_refs[l]
                    gi = [jnp.dot(ctx, wi_c_ref[g], preferred_element_type=jnp.float32)
                          + jnp.dot(emb_t, wi_e_ref[g], preferred_element_type=jnp.float32)
                          + bi_ref[g] for g in range(3)]
                else:
                    wi_ref, wh_ref, bi_ref, bh_ref = gru_refs[l]
                    gi = [jnp.dot(out, wi_ref[g], preferred_element_type=jnp.float32)
                          + bi_ref[g] for g in range(3)]
                gh = [jnp.dot(h_prev, wh_ref[g], preferred_element_type=jnp.float32)
                      + bh_ref[g] for g in range(3)]
                r = jax.nn.sigmoid(gi[0] + gh[0])
                z = jax.nn.sigmoid(gi[1] + gh[1])
                n = jnp.tanh(gi[2] + r * gh[2])
                h_new = (1.0 - z) * n + z * h_prev
                # only rows with step < length advance (== PyTorch :real_batch_size slicing)
                new_hs.append(jnp.where(mask_t > 0.0, h_new, h_prev))
                # TODO(synk): for num_layers > 1 the unmasked h_new feeds the next layer;
                # final outputs still match PyTorch because they are zero-masked below.
                out = h_new
            hs = new_hs

            # TODO(synk): nn.Dropout(p=0.5) treated as eval-mode identity (deterministic).
            preds = jnp.dot(out, fc_w_ref[...],
                            preferred_element_type=jnp.float32) + fc_b_ref[...]       # (B, V_PAD)
            pred_ref[t] = jnp.where(mask_t > 0.0, preds, 0.0)      # lane-dense 128-wide store
            alpha_ref[t] = jnp.where(mask_t > 0.0, alpha, 0.0)

    return kernel


def decoder_forward(kdec, image_code, captions, cap_lens_np):
    B, P, D = image_code.shape
    # init_hidden_state: sort by caption length, descending (host-side, like .cpu().numpy())
    order = np.argsort(-cap_lens_np, kind='stable')
    sorted_cap_lens = cap_lens_np[order]
    lengths = sorted_cap_lens - 1
    T = int(lengths[0])
    order_j = jnp.asarray(order)
    captions_s = captions[order_j]
    image_code_s = image_code[order_j]

    cap_embeds = jnp.take(kdec['embed_w'], captions_s, axis=0)            # glue gather (nn.Embedding)
    emb_steps = jnp.transpose(cap_embeds[:, :T, :], (1, 0, 2))            # (T, B, W)
    step_mask = jnp.asarray(
        (np.arange(T)[:, None] < lengths[None, :]).astype(np.float32))[:, :, None]  # (T, B, 1)

    args = [step_mask, emb_steps, image_code_s,
            kdec['init_w'], kdec['init_b'],
            kdec['att_wq'], kdec['att_bq'], kdec['att_wk'], kdec['att_bk']]
    for l in range(RNN_LAYERS):
        args += list(kdec['gru'][l])
    args += [kdec['fc_w'], kdec['fc_b']]

    Hd, W, A = HIDDEN, WORD_DIM, ATTN_DIM
    flops = (2 * B * P * D * A + 2 * B * D * RNN_LAYERS * Hd + T * (
        2 * B * Hd * A + 2 * B * P * A + 2 * B * P * D
        + 3 * (2 * B * D * Hd + 2 * B * W * Hd) + 3 * (2 * B * Hd * Hd)
        + (RNN_LAYERS - 1) * 6 * (2 * B * Hd * Hd)
        + 2 * B * Hd * V_PAD))
    transcendentals = T * (B * P + 3 * B * Hd * RNN_LAYERS)
    bytes_accessed = 4 * (sum(int(np.prod(a.shape)) for a in args) + T * B * (V_PAD + P))

    preds_pad, alphas_t = pl.pallas_call(
        _make_decoder_kernel(RNN_LAYERS, T),
        out_shape=(jax.ShapeDtypeStruct((T, B, V_PAD), jnp.float32),
                   jax.ShapeDtypeStruct((T, B, P), jnp.float32)),
        cost_estimate=pl.CostEstimate(flops=int(flops),
                                      transcendentals=int(transcendentals),
                                      bytes_accessed=int(bytes_accessed)),
    )(*args)

    predictions = jnp.transpose(preds_pad, (1, 0, 2))[:, :, :VOCAB_SIZE]
    alphas = jnp.transpose(alphas_t, (1, 0, 2))
    return predictions, alphas, captions_s, lengths, order_j


# ----------------------------- parameters -----------------------------
def _u(key, shape, scale=0.1):
    return jax.random.uniform(key, shape, jnp.float32, -scale, scale)


def init_params(key):
    """PyTorch-layout parameters (nn.Linear weights are (out, in))."""
    ks = iter(jax.random.split(key, 256))
    nxt = lambda: next(ks)
    enc = {
        'conv_w': _u(nxt(), (VIT_DIM, IMG_C, PATCH, PATCH)),
        'conv_b': _u(nxt(), (VIT_DIM,)),
        'class_token': _u(nxt(), (1, 1, VIT_DIM)),
        'pos_embedding': _u(nxt(), (1, N_TOKENS, VIT_DIM)),
        'ln_g': jnp.ones((VIT_DIM,), jnp.float32),
        'ln_b': jnp.zeros((VIT_DIM,), jnp.float32),
        'layers': [],
    }
    for _ in range(VIT_LAYERS):
        enc['layers'].append({
            'ln1_g': jnp.ones((VIT_DIM,), jnp.float32),
            'ln1_b': jnp.zeros((VIT_DIM,), jnp.float32),
            'in_w': _u(nxt(), (3 * VIT_DIM, VIT_DIM)), 'in_b': _u(nxt(), (3 * VIT_DIM,)),
            'out_w': _u(nxt(), (VIT_DIM, VIT_DIM)), 'out_b': _u(nxt(), (VIT_DIM,)),
            'ln2_g': jnp.ones((VIT_DIM,), jnp.float32),
            'ln2_b': jnp.zeros((VIT_DIM,), jnp.float32),
            'mlp_w1': _u(nxt(), (VIT_MLP, VIT_DIM)), 'mlp_b1': _u(nxt(), (VIT_MLP,)),
            'mlp_w2': _u(nxt(), (VIT_DIM, VIT_MLP)), 'mlp_b2': _u(nxt(), (VIT_DIM,)),
        })
    dec = {
        'embed_w': _u(nxt(), (VOCAB_SIZE, WORD_DIM)),   # init_weights: uniform(-0.1, 0.1)
        'att_wq': _u(nxt(), (ATTN_DIM, HIDDEN)), 'att_bq': _u(nxt(), (ATTN_DIM,)),
        'att_wk': _u(nxt(), (ATTN_DIM, VIT_DIM)), 'att_bk': _u(nxt(), (ATTN_DIM,)),
        # value_proj exists in the PyTorch module but is never used in forward().
        'init_w': _u(nxt(), (RNN_LAYERS * HIDDEN, VIT_DIM)),
        'init_b': _u(nxt(), (RNN_LAYERS * HIDDEN,)),
        'fc_w': _u(nxt(), (VOCAB_SIZE, HIDDEN)),        # init_weights: uniform(-0.1, 0.1)
        'fc_b': jnp.zeros((VOCAB_SIZE,), jnp.float32),  # init_weights: fill_(0)
        'gru': [],
    }
    for l in range(RNN_LAYERS):
        in_dim = (WORD_DIM + VIT_DIM) if l == 0 else HIDDEN
        dec['gru'].append({
            'w_ih': _u(nxt(), (3 * HIDDEN, in_dim)),
            'w_hh': _u(nxt(), (3 * HIDDEN, HIDDEN)),
            'b_ih': _u(nxt(), (3 * HIDDEN,)),
            'b_hh': _u(nxt(), (3 * HIDDEN,)),
        })
    return {'encoder': enc, 'decoder': dec}


def prepare_kernel_params(params):
    """One-time host-side layout prep: (K, N) weights, per-head & per-gate splits (so the
    kernels never slice at lane offsets), scalar scales folded into weights, stacked ViT
    layers, folded token bias, and a lane-dense (128-wide) zero-padded fc projection."""
    enc = params['encoder']
    D, H, Dh = VIT_DIM, VIT_HEADS, VIT_DIM // VIT_HEADS
    cp2 = IMG_C * PATCH * PATCH
    conv_w = enc['conv_w'].reshape(D, cp2).T                              # (CP2, D)
    pos = enc['pos_embedding'][0]                                         # (S, D)
    cls_row = enc['class_token'][0, 0][None, :]                           # (1, D)
    conv_b_rows = jnp.broadcast_to(enc['conv_b'][None, :], (N_PATCHES, D))
    base = pos + jnp.concatenate([cls_row, conv_b_rows], axis=0)          # (S, D)

    def per_head(w_rows, b_rows, scale=1.0):
        # w_rows: (D, D) PyTorch (out, in) rows for one of q/k/v; b_rows: (D,)
        w_t = w_rows.T * scale                                            # (D_in, D_out)
        return w_t.reshape(D, H, Dh).transpose(1, 0, 2), (b_rows * scale).reshape(H, 1, Dh)

    q_scale = 1.0 / np.sqrt(Dh)
    wq_l, bq_l, wk_l, bk_l, wv_l, bv_l, wo_l = [], [], [], [], [], [], []
    for lyr in enc['layers']:
        in_w, in_b = lyr['in_w'], lyr['in_b']
        wq, bq = per_head(in_w[:D], in_b[:D], q_scale)    # 1/sqrt(Dh) folded into Q
        wk, bk = per_head(in_w[D:2 * D], in_b[D:2 * D])
        wv, bv = per_head(in_w[2 * D:], in_b[2 * D:])
        wq_l.append(wq); bq_l.append(bq)
        wk_l.append(wk); bk_l.append(bk)
        wv_l.append(wv); bv_l.append(bv)
        wo_l.append(lyr['out_w'].T.reshape(H, Dh, D))     # per-head rows of W_out^T

    def stk(name):
        return jnp.stack([lyr[name] for lyr in enc['layers']], axis=0)

    kenc = {
        'conv_w': conv_w, 'base': base,
        'ln1_g': stk('ln1_g')[:, None, :], 'ln1_b': stk('ln1_b')[:, None, :],
        'wq': jnp.stack(wq_l), 'bq': jnp.stack(bq_l),                     # (L, H, D, Dh)/(L, H, 1, Dh)
        'wk': jnp.stack(wk_l), 'bk': jnp.stack(bk_l),
        'wv': jnp.stack(wv_l), 'bv': jnp.stack(bv_l),
        'wo': jnp.stack(wo_l), 'bo': stk('out_b')[:, None, :],            # (L, H, Dh, D)/(L, 1, D)
        'ln2_g': stk('ln2_g')[:, None, :], 'ln2_b': stk('ln2_b')[:, None, :],
        'mlp_w1': jnp.stack([lyr['mlp_w1'].T for lyr in enc['layers']]),  # (L, D, MLP)
        'mlp_b1': stk('mlp_b1')[:, None, :],
        'mlp_w2': jnp.stack([lyr['mlp_w2'].T for lyr in enc['layers']]),  # (L, MLP, D)
        'mlp_b2': stk('mlp_b2')[:, None, :],
        'lnf_g': enc['ln_g'][None, :], 'lnf_b': enc['ln_b'][None, :],
    }

    dec = params['decoder']
    Hd = HIDDEN
    att_scale = 1.0 / np.sqrt(VIT_DIM)        # ProductAttention divides scores by sqrt(key_dim)
    init_w = jnp.stack([dec['init_w'].T[:, l * Hd:(l + 1) * Hd]
                        for l in range(RNN_LAYERS)])                      # (L, D, Hd)
    init_b = jnp.stack([dec['init_b'][l * Hd:(l + 1) * Hd][None, :]
                        for l in range(RNN_LAYERS)])                      # (L, 1, Hd)
    fc_w = jnp.pad(dec['fc_w'].T, ((0, 0), (0, V_PAD - VOCAB_SIZE)))      # (Hd, 128) lane-dense
    fc_b = jnp.pad(dec['fc_b'], (0, V_PAD - VOCAB_SIZE))[None, :]         # (1, 128)

    gru_layers = []
    for l in range(RNN_LAYERS):
        g = dec['gru'][l]
        wi_t, wh_t = g['w_ih'].T, g['w_hh'].T                             # (in, 3Hd), (Hd, 3Hd)
        wi_g = jnp.stack([wi_t[:, k * Hd:(k + 1) * Hd] for k in range(3)])    # (3, in, Hd)
        wh_g = jnp.stack([wh_t[:, k * Hd:(k + 1) * Hd] for k in range(3)])    # (3, Hd, Hd)
        bi_g = jnp.stack([g['b_ih'][k * Hd:(k + 1) * Hd][None, :] for k in range(3)])
        bh_g = jnp.stack([g['b_hh'][k * Hd:(k + 1) * Hd][None, :] for k in range(3)])
        if l == 0:
            # GRU layer-0 input is cat(context, embed): split its rows into two operands
            gru_layers.append([wi_g[:, :VIT_DIM, :], wi_g[:, VIT_DIM:, :], wh_g, bi_g, bh_g])
        else:
            gru_layers.append([wi_g, wh_g, bi_g, bh_g])

    kdec = {
        'embed_w': dec['embed_w'],
        'att_wq': dec['att_wq'].T * att_scale, 'att_bq': dec['att_bq'][None, :] * att_scale,
        'att_wk': dec['att_wk'].T, 'att_bk': dec['att_bk'][None, :],
        'init_w': init_w, 'init_b': init_b,
        'fc_w': fc_w, 'fc_b': fc_b,
        'gru': gru_layers,
    }
    return {'encoder': kenc, 'decoder': kdec}


# ----------------------------- ARCTIC forward -----------------------------
def arctic_forward(kparams, images, captions, cap_lens_np):
    image_code = vit_encode(kparams['encoder'], images)                   # (B, S, image_code_dim)
    return decoder_forward(kparams['decoder'], image_code, captions, cap_lens_np)


if __name__ == "__main__":
    key = jax.random.PRNGKey(0)
    kp, kimg = jax.random.split(key)
    params = init_params(kp)
    kparams = prepare_kernel_params(params)

    images = jax.random.normal(kimg, (BATCH, IMG_C, IMG_HW, IMG_HW), jnp.float32)
    captions = jnp.array([[3, 5, 7, 9, 4, 1, 0, 0],
                          [3, 4, 6, 8, 10, 12, 14, 1]], dtype=jnp.int32)
    cap_lens = np.array([6, 8], dtype=np.int32)   # unsorted on purpose -> exercises the sort path

    preds, alphas, sorted_caps, lengths, order = arctic_forward(kparams, images, captions, cap_lens)
    jax.block_until_ready((preds, alphas, sorted_caps))

    assert preds.shape == (BATCH, int(lengths[0]), VOCAB_SIZE)
    assert alphas.shape == (BATCH, int(lengths[0]), N_TOKENS)
    assert bool(jnp.all(jnp.isfinite(preds))) and bool(jnp.all(jnp.isfinite(alphas)))
    print("KERNEL_OK")
</pallas_src>

<mosaic_0001>
module attributes {stable_mosaic.version = 11 : i64} {
  func.func @_vit_encoder_kernel(%arg0: memref<10x768xf32, #tpu.memory_space<vmem>>, %arg1: memref<768x32xf32, #tpu.memory_space<vmem>>, %arg2: memref<10x32xf32, #tpu.memory_space<vmem>>, %arg3: memref<10x10xf32, #tpu.memory_space<vmem>>, %arg4: memref<2x1x32xf32, #tpu.memory_space<vmem>>, %arg5: memref<2x1x32xf32, #tpu.memory_space<vmem>>, %arg6: memref<2x4x32x8xf32, #tpu.memory_space<vmem>>, %arg7: memref<2x4x1x8xf32, #tpu.memory_space<vmem>>, %arg8: memref<2x4x32x8xf32, #tpu.memory_space<vmem>>, %arg9: memref<2x4x1x8xf32, #tpu.memory_space<vmem>>, %arg10: memref<2x4x32x8xf32, #tpu.memory_space<vmem>>, %arg11: memref<2x4x1x8xf32, #tpu.memory_space<vmem>>, %arg12: memref<2x4x8x32xf32, #tpu.memory_space<vmem>>, %arg13: memref<2x1x32xf32, #tpu.memory_space<vmem>>, %arg14: memref<2x1x32xf32, #tpu.memory_space<vmem>>, %arg15: memref<2x1x32xf32, #tpu.memory_space<vmem>>, %arg16: memref<2x32x64xf32, #tpu.memory_space<vmem>>, %arg17: memref<2x1x64xf32, #tpu.memory_space<vmem>>, %arg18: memref<2x64x32xf32, #tpu.memory_space<vmem>>, %arg19: memref<2x1x32xf32, #tpu.memory_space<vmem>>, %arg20: memref<1x32xf32, #tpu.memory_space<vmem>>, %arg21: memref<1x32xf32, #tpu.memory_space<vmem>>, %arg22: memref<10x32xf32, #tpu.memory_space<vmem>>) attributes {dimension_semantics = [], scalar_prefetch = 0 : i64, scratch_operands = 0 : i64, tpu.core_type = #tpu.core_type<tc>} {
    %c0 = arith.constant 0 : index
    %c0_0 = arith.constant 0 : index
    %0 = vector.load %arg3[%c0, %c0_0] : memref<10x10xf32, #tpu.memory_space<vmem>>, vector<10x10xf32>
    %c0_1 = arith.constant 0 : index
    %c0_2 = arith.constant 0 : index
    %1 = vector.load %arg0[%c0_1, %c0_2] : memref<10x768xf32, #tpu.memory_space<vmem>>, vector<10x768xf32>
    %c0_3 = arith.constant 0 : index
    %c0_4 = arith.constant 0 : index
    %2 = vector.load %arg1[%c0_3, %c0_4] : memref<768x32xf32, #tpu.memory_space<vmem>>, vector<768x32xf32>
    %cst = arith.constant dense<0.000000e+00> : vector<10x32xf32>
    %3 = tpu.matmul %1, %2, %cst {dimension_numbers = #tpu.dot_dimension_numbers<[1], [0], [0], [1], [0, 0, 1, 1], [], []>} : vector<10x768xf32>, vector<768x32xf32>, vector<10x32xf32> -> vector<10x32xf32>
    %c0_5 = arith.constant 0 : index
    %c0_6 = arith.constant 0 : index
    %4 = vector.load %arg2[%c0_5, %c0_6] : memref<10x32xf32, #tpu.memory_space<vmem>>, vector<10x32xf32>
    %5 = arith.addf %3, %4 : vector<10x32xf32>
    %c0_7 = arith.constant 0 : index
    %c0_8 = arith.constant 0 : index
    %c0_9 = arith.constant 0 : index
    %6 = vector.load %arg4[%c0_7, %c0_8, %c0_9] : memref<2x1x32xf32, #tpu.memory_space<vmem>>, vector<1x1x32xf32>
    %7 = vector.shape_cast %6 : vector<1x1x32xf32> to vector<1x32xf32>
    %c0_10 = arith.constant 0 : index
    %c0_11 = arith.constant 0 : index
    %c0_12 = arith.constant 0 : index
    %8 = vector.load %arg5[%c0_10, %c0_11, %c0_12] : memref<2x1x32xf32, #tpu.memory_space<vmem>>, vector<1x1x32xf32>
    %9 = vector.shape_cast %8 : vector<1x1x32xf32> to vector<1x32xf32>
    %cst_13 = arith.constant dense<0.000000e+00> : vector<10xf32>
    %10 = vector.multi_reduction <add>, %5, %cst_13 [1] : vector<10x32xf32> to vector<10xf32>
    %11 = vector.shape_cast %10 : vector<10xf32> to vector<10x1xf32>
    %cst_14 = arith.constant 3.200000e+01 : f32
    %12 = vector.broadcast %cst_14 : f32 to vector<10x1xf32>
    %13 = arith.divf %11, %12 : vector<10x1xf32>
    %14 = vector.broadcast %13 : vector<10x1xf32> to vector<10x32xf32>
    %15 = arith.subf %5, %14 : vector<10x32xf32>
    %16 = arith.mulf %15, %15 : vector<10x32xf32>
    %cst_15 = arith.constant dense<0.000000e+00> : vector<10xf32>
    %17 = vector.multi_reduction <add>, %16, %cst_15 [1] : vector<10x32xf32> to vector<10xf32>
    %18 = vector.shape_cast %17 : vector<10xf32> to vector<10x1xf32>
    %cst_16 = arith.constant 3.200000e+01 : f32
    %19 = vector.broadcast %cst_16 : f32 to vector<10x1xf32>
    %20 = arith.divf %18, %19 : vector<10x1xf32>
    %21 = vector.broadcast %13 : vector<10x1xf32> to vector<10x32xf32>
    %22 = arith.subf %5, %21 : vector<10x32xf32>
    %cst_17 = arith.constant 9.99999997E-7 : f32
    %23 = vector.broadcast %cst_17 : f32 to vector<10x1xf32>
    %24 = arith.addf %20, %23 : vector<10x1xf32>
    %25 = math.rsqrt %24 : vector<10x1xf32>
    %26 = vector.broadcast %25 : vector<10x1xf32> to vector<10x32xf32>
    %27 = arith.mulf %22, %26 : vector<10x32xf32>
    %28 = vector.broadcast %7 : vector<1x32xf32> to vector<10x32xf32>
    %29 = arith.mulf %27, %28 : vector<10x32xf32>
    %30 = vector.broadcast %9 : vector<1x32xf32> to vector<10x32xf32>
    %31 = arith.addf %29, %30 : vector<10x32xf32>
    %c0_18 = arith.constant 0 : index
    %c0_19 = arith.constant 0 : index
    %c0_20 = arith.constant 0 : index
    %c0_21 = arith.constant 0 : index
    %32 = vector.load %arg6[%c0_18, %c0_19, %c0_20, %c0_21] : memref<2x4x32x8xf32, #tpu.memory_space<vmem>>, vector<1x4x32x8xf32>
    %33 = vector.shape_cast %32 : vector<1x4x32x8xf32> to vector<4x32x8xf32>
    %c0_22 = arith.constant 0 : index
    %c0_23 = arith.constant 0 : index
    %c0_24 = arith.constant 0 : index
    %c0_25 = arith.constant 0 : index
    %34 = vector.load %arg7[%c0_22, %c0_23, %c0_24, %c0_25] : memref<2x4x1x8xf32, #tpu.memory_space<vmem>>, vector<1x4x1x8xf32>
    %35 = vector.shape_cast %34 : vector<1x4x1x8xf32> to vector<4x1x8xf32>
    %c0_26 = arith.constant 0 : index
    %c0_27 = arith.constant 0 : index
    %c0_28 = arith.constant 0 : index
    %c0_29 = arith.constant 0 : index
    %36 = vector.load %arg8[%c0_26, %c0_27, %c0_28, %c0_29] : memref<2x4x32x8xf32, #tpu.memory_space<vmem>>, vector<1x4x32x8xf32>
    %37 = vector.shape_cast %36 : vector<1x4x32x8xf32> to vector<4x32x8xf32>
    %c0_30 = arith.constant 0 : index
    %c0_31 = arith.constant 0 : index
    %c0_32 = arith.constant 0 : index
    %c0_33 = arith.constant 0 : index
    %38 = vector.load %arg9[%c0_30, %c0_31, %c0_32, %c0_33] : memref<2x4x1x8xf32, #tpu.memory_space<vmem>>, vector<1x4x1x8xf32>
    %39 = vector.shape_cast %38 : vector<1x4x1x8xf32> to vector<4x1x8xf32>
    %c0_34 = arith.constant 0 : index
    %c0_35 = arith.constant 0 : index
    %c0_36 = arith.constant 0 : index
    %c0_37 = arith.constant 0 : index
    %40 = vector.load %arg10[%c0_34, %c0_35, %c0_36, %c0_37] : memref<2x4x32x8xf32, #tpu.memory_space<vmem>>, vector<1x4x32x8xf32>
    %41 = vector.shape_cast %40 : vector<1x4x32x8xf32> to vector<4x32x8xf32>
    %c0_38 = arith.constant 0 : index
    %c0_39 = arith.constant 0 : index
    %c0_40 = arith.constant 0 : index
    %c0_41 = arith.constant 0 : index
    %42 = vector.load %arg11[%c0_38, %c0_39, %c0_40, %c0_41] : memref<2x4x1x8xf32, #tpu.memory_space<vmem>>, vector<1x4x1x8xf32>
    %43 = vector.shape_cast %42 : vector<1x4x1x8xf32> to vector<4x1x8xf32>
    %c0_42 = arith.constant 0 : index
    %c0_43 = arith.constant 0 : index
    %c0_44 = arith.constant 0 : index
    %c0_45 = arith.constant 0 : index
    %44 = vector.load %arg12[%c0_42, %c0_43, %c0_44, %c0_45] : memref<2x4x8x32xf32, #tpu.memory_space<vmem>>, vector<1x4x8x32xf32>
    %45 = vector.shape_cast %44 : vector<1x4x8x32xf32> to vector<4x8x32xf32>
    %46 = vector.extract_strided_slice %33 {offsets = [0, 0, 0], sizes = [1, 32, 8], strides = [1, 1, 1]} : vector<4x32x8xf32> to vector<1x32x8xf32>
    %47 = vector.shape_cast %46 : vector<1x32x8xf32> to vector<32x8xf32>
    %cst_46 = arith.constant dense<0.000000e+00> : vector<10x8xf32>
    %48 = tpu.matmul %31, %47, %cst_46 {dimension_numbers = #tpu.dot_dimension_numbers<[1], [0], [0], [1], [0, 0, 1, 1], [], []>} : vector<10x32xf32>, vector<32x8xf32>, vector<10x8xf32> -> vector<10x8xf32>
    %49 = vector.extract_strided_slice %35 {offsets = [0, 0, 0], sizes = [1, 1, 8], strides = [1, 1, 1]} : vector<4x1x8xf32> to vector<1x1x8xf32>
    %50 = vector.shape_cast %49 : vector<1x1x8xf32> to vector<1x8xf32>
    %51 = vector.broadcast %50 : vector<1x8xf32> to vector<10x8xf32>
    %52 = arith.addf %48, %51 : vector<10x8xf32>
    %53 = vector.extract_strided_slice %37 {offsets = [0, 0, 0], sizes = [1, 32, 8], strides = [1, 1, 1]} : vector<4x32x8xf32> to vector<1x32x8xf32>
    %54 = vector.shape_cast %53 : vector<1x32x8xf32> to vector<32x8xf32>
    %cst_47 = arith.constant dense<0.000000e+00> : vector<10x8xf32>
    %55 = tpu.matmul %31, %54, %cst_47 {dimension_numbers = #tpu.dot_dimension_numbers<[1], [0], [0], [1], [0, 0, 1, 1], [], []>} : vector<10x32xf32>, vector<32x8xf32>, vector<10x8xf32> -> vector<10x8xf32>
    %56 = vector.extract_strided_slice %39 {offsets = [0, 0, 0], sizes = [1, 1, 8], strides = [1, 1, 1]} : vector<4x1x8xf32> to vector<1x1x8xf32>
    %57 = vector.shape_cast %56 : vector<1x1x8xf32> to vector<1x8xf32>
    %58 = vector.broadcast %57 : vector<1x8xf32> to vector<10x8xf32>
    %59 = arith.addf %55, %58 : vector<10x8xf32>
    %60 = vector.extract_strided_slice %41 {offsets = [0, 0, 0], sizes = [1, 32, 8], strides = [1, 1, 1]} : vector<4x32x8xf32> to vector<1x32x8xf32>
    %61 = vector.shape_cast %60 : vector<1x32x8xf32> to vector<32x8xf32>
    %cst_48 = arith.constant dense<0.000000e+00> : vector<10x8xf32>
    %62 = tpu.matmul %31, %61, %cst_48 {dimension_numbers = #tpu.dot_dimension_numbers<[1], [0], [0], [1], [0, 0, 1, 1], [], []>} : vector<10x32xf32>, vector<32x8xf32>, vector<10x8xf32> -> vector<10x8xf32>
    %63 = vector.extract_strided_slice %43 {offsets = [0, 0, 0], sizes = [1, 1, 8], strides = [1, 1, 1]} : vector<4x1x8xf32> to vector<1x1x8xf32>
    %64 = vector.shape_cast %63 : vector<1x1x8xf32> to vector<1x8xf32>
    %65 = vector.broadcast %64 : vector<1x8xf32> to vector<10x8xf32>
    %66 = arith.addf %62, %65 : vector<10x8xf32>
    %cst_49 = arith.constant dense<0.000000e+00> : vector<10x10xf32>
    %67 = tpu.matmul %52, %59, %cst_49 {dimension_numbers = #tpu.dot_dimension_numbers<[1], [1], [0], [0], [0, 0, 1, 0], [], []>} : vector<10x8xf32>, vector<10x8xf32>, vector<10x10xf32> -> vector<10x10xf32>
    %68 = arith.addf %67, %0 : vector<10x10xf32>
    %cst_50 = arith.constant dense<0xFF800000> : vector<10xf32>
    %69 = vector.multi_reduction <maximumf>, %68, %cst_50 [1] : vector<10x10xf32> to vector<10xf32>
    %70 = vector.shape_cast %69 : vector<10xf32> to vector<10x1xf32>
    %71 = vector.broadcast %70 : vector<10x1xf32> to vector<10x10xf32>
    %72 = arith.subf %68, %71 : vector<10x10xf32>
    %73 = math.exp %72 : vector<10x10xf32>
    %cst_51 = arith.constant dense<0.000000e+00> : vector<10xf32>
    %74 = vector.multi_reduction <add>, %73, %cst_51 [1] : vector<10x10xf32> to vector<10xf32>
    %75 = vector.shape_cast %74 : vector<10xf32> to vector<10x1xf32>
    %76 = vector.broadcast %75 : vector<10x1xf32> to vector<10x10xf32>
    %77 = arith.divf %73, %76 : vector<10x10xf32>
    %cst_52 = arith.constant dense<0.000000e+00> : vector<10x8xf32>
    %78 = tpu.matmul %77, %66, %cst_52 {dimension_numbers = #tpu.dot_dimension_numbers<[1], [0], [0], [1], [0, 0, 1, 1], [], []>} : vector<10x10xf32>, vector<10x8xf32>, vector<10x8xf32> -> vector<10x8xf32>
    %79 = vector.extract_strided_slice %45 {offsets = [0, 0, 0], sizes = [1, 8, 32], strides = [1, 1, 1]} : vector<4x8x32xf32> to vector<1x8x32xf32>
    %80 = vector.shape_cast %79 : vector<1x8x32xf32> to vector<8x32xf32>
    %cst_53 = arith.constant dense<0.000000e+00> : vector<10x32xf32>
    %81 = tpu.matmul %78, %80, %cst_53 {dimension_numbers = #tpu.dot_dimension_numbers<[1], [0], [0], [1], [0, 0, 1, 1], [], []>} : vector<10x8xf32>, vector<8x32xf32>, vector<10x32xf32> -> vector<10x32xf32>
    %82 = vector.extract_strided_slice %33 {offsets = [1, 0, 0], sizes = [1, 32, 8], strides = [1, 1, 1]} : vector<4x32x8xf32> to vector<1x32x8xf32>
    %83 = vector.shape_cast %82 : vector<1x32x8xf32> to vector<32x8xf32>
    %cst_54 = arith.constant dense<0.000000e+00> : vector<10x8xf32>
    %84 = tpu.matmul %31, %83, %cst_54 {dimension_numbers = #tpu.dot_dimension_numbers<[1], [0], [0], [1], [0, 0, 1, 1], [], []>} : vector<10x32xf32>, vector<32x8xf32>, vector<10x8xf32> -> vector<10x8xf32>
    %85 = vector.extract_strided_slice %35 {offsets = [1, 0, 0], sizes = [1, 1, 8], strides = [1, 1, 1]} : vector<4x1x8xf32> to vector<1x1x8xf32>
    %86 = vector.shape_cast %85 : vector<1x1x8xf32> to vector<1x8xf32>
    %87 = vector.broadcast %86 : vector<1x8xf32> to vector<10x8xf32>
    %88 = arith.addf %84, %87 : vector<10x8xf32>
    %89 = vector.extract_strided_slice %37 {offsets = [1, 0, 0], sizes = [1, 32, 8], strides = [1, 1, 1]} : vector<4x32x8xf32> to vector<1x32x8xf32>
    %90 = vector.shape_cast %89 : vector<1x32x8xf32> to vector<32x8xf32>
    %cst_55 = arith.constant dense<0.000000e+00> : vector<10x8xf32>
    %91 = tpu.matmul %31, %90, %cst_55 {dimension_numbers = #tpu.dot_dimension_numbers<[1], [0], [0], [1], [0, 0, 1, 1], [], []>} : vector<10x32xf32>, vector<32x8xf32>, vector<10x8xf32> -> vector<10x8xf32>
    %92 = vector.extract_strided_slice %39 {offsets = [1, 0, 0], sizes = [1, 1, 8], strides = [1, 1, 1]} : vector<4x1x8xf32> to vector<1x1x8xf32>
    %93 = vector.shape_cast %92 : vector<1x1x8xf32> to vector<1x8xf32>
    %94 = vector.broadcast %93 : vector<1x8xf32> to vector<10x8xf32>
    %95 = arith.addf %91, %94 : vector<10x8xf32>
    %96 = vector.extract_strided_slice %41 {offsets = [1, 0, 0], sizes = [1, 32, 8], strides = [1, 1, 1]} : vector<4x32x8xf32> to vector<1x32x8xf32>
    %97 = vector.shape_cast %96 : vector<1x32x8xf32> to vector<32x8xf32>
    %cst_56 = arith.constant dense<0.000000e+00> : vector<10x8xf32>
    %98 = tpu.matmul %31, %97, %cst_56 {dimension_numbers = #tpu.dot_dimension_numbers<[1], [0], [0], [1], [0, 0, 1, 1], [], []>} : vector<10x32xf32>, vector<32x8xf32>, vector<10x8xf32> -> vector<10x8xf32>
    %99 = vector.extract_strided_slice %43 {offsets = [1, 0, 0], sizes = [1, 1, 8], strides = [1, 1, 1]} : vector<4x1x8xf32> to vector<1x1x8xf32>
    %100 = vector.shape_cast %99 : vector<1x1x8xf32> to vector<1x8xf32>
    %101 = vector.broadcast %100 : vector<1x8xf32> to vector<10x8xf32>
    %102 = arith.addf %98, %101 : vector<10x8xf32>
    %cst_57 = arith.constant dense<0.000000e+00> : vector<10x10xf32>
    %103 = tpu.matmul %88, %95, %cst_57 {dimension_numbers = #tpu.dot_dimension_numbers<[1], [1], [0], [0], [0, 0, 1, 0], [], []>} : vector<10x8xf32>, vector<10x8xf32>, vector<10x10xf32> -> vector<10x10xf32>
    %104 = arith.addf %103, %0 : vector<10x10xf32>
    %cst_58 = arith.constant dense<0xFF800000> : vector<10xf32>
    %105 = vector.multi_reduction <maximumf>, %104, %cst_58 [1] : vector<10x10xf32> to vector<10xf32>
    %106 = vector.shape_cast %105 : vector<10xf32> to vector<10x1xf32>
    %107 = vector.broadcast %106 : vector<10x1xf32> to vector<10x10xf32>
    %108 = arith.subf %104, %107 : vector<10x10xf32>
    %109 = math.exp %108 : vector<10x10xf32>
    %cst_59 = arith.constant dense<0.000000e+00> : vector<10xf32>
    %110 = vector.multi_reduction <add>, %109, %cst_59 [1] : vector<10x10xf32> to vector<10xf32>
    %111 = vector.shape_cast %110 : vector<10xf32> to vector<10x1xf32>
    %112 = vector.broadcast %111 : vector<10x1xf32> to vector<10x10xf32>
    %113 = arith.divf %109, %112 : vector<10x10xf32>
    %cst_60 = arith.constant dense<0.000000e+00> : vector<10x8xf32>
    %114 = tpu.matmul %113, %102, %cst_60 {dimension_numbers = #tpu.dot_dimension_numbers<[1], [0], [0], [1], [0, 0, 1, 1], [], []>} : vector<10x10xf32>, vector<10x8xf32>, vector<10x8xf32> -> vector<10x8xf32>
    %115 = vector.extract_strided_slice %45 {offsets = [1, 0, 0], sizes = [1, 8, 32], strides = [1, 1, 1]} : vector<4x8x32xf32> to vector<1x8x32xf32>
    %116 = vector.shape_cast %115 : vector<1x8x32xf32> to vector<8x32xf32>
    %cst_61 = arith.constant dense<0.000000e+00> : vector<10x32xf32>
    %117 = tpu.matmul %114, %116, %cst_61 {dimension_numbers = #tpu.dot_dimension_numbers<[1], [0], [0], [1], [0, 0, 1, 1], [], []>} : vector<10x8xf32>, vector<8x32xf32>, vector<10x32xf32> -> vector<10x32xf32>
    %118 = arith.addf %81, %117 : vector<10x32xf32>
    %119 = vector.extract_strided_slice %33 {offsets = [2, 0, 0], sizes = [1, 32, 8], strides = [1, 1, 1]} : vector<4x32x8xf32> to vector<1x32x8xf32>
    %120 = vector.shape_cast %119 : vector<1x32x8xf32> to vector<32x8xf32>
    %cst_62 = arith.constant dense<0.000000e+00> : vector<10x8xf32>
    %121 = tpu.matmul %31, %120, %cst_62 {dimension_numbers = #tpu.dot_dimension_numbers<[1], [0], [0], [1], [0, 0, 1, 1], [], []>} : vector<10x32xf32>, vector<32x8xf32>, vector<10x8xf32> -> vector<10x8xf32>
    %122 = vector.extract_strided_slice %35 {offsets = [2, 0, 0], sizes = [1, 1, 8], strides = [1, 1, 1]} : vector<4x1x8xf32> to vector<1x1x8xf32>
    %123 = vector.shape_cast %122 : vector<1x1x8xf32> to vector<1x8xf32>
    %124 = vector.broadcast %123 : vector<1x8xf32> to vector<10x8xf32>
    %125 = arith.addf %121, %124 : vector<10x8xf32>
    %126 = vector.extract_strided_slice %37 {offsets = [2, 0, 0], sizes = [1, 32, 8], strides = [1, 1, 1]} : vector<4x32x8xf32> to vector<1x32x8xf32>
    %127 = vector.shape_cast %126 : vector<1x32x8xf32> to vector<32x8xf32>
    %cst_63 = arith.constant dense<0.000000e+00> : vector<10x8xf32>
    %128 = tpu.matmul %31, %127, %cst_63 {dimension_numbers = #tpu.dot_dimension_numbers<[1], [0], [0], [1], [0, 0, 1, 1], [], []>} : vector<10x32xf32>, vector<32x8xf32>, vector<10x8xf32> -> vector<10x8xf32>
    %129 = vector.extract_strided_slice %39 {offsets = [2, 0, 0], sizes = [1, 1, 8], strides = [1, 1, 1]} : vector<4x1x8xf32> to vector<1x1x8xf32>
    %130 = vector.shape_cast %129 : vector<1x1x8xf32> to vector<1x8xf32>
    %131 = vector.broadcast %130 : vector<1x8xf32> to vector<10x8xf32>
    %132 = arith.addf %128, %131 : vector<10x8xf32>
    %133 = vector.extract_strided_slice %41 {offsets = [2, 0, 0], sizes = [1, 32, 8], strides = [1, 1, 1]} : vector<4x32x8xf32> to vector<1x32x8xf32>
    %134 = vector.shape_cast %133 : vector<1x32x8xf32> to vector<32x8xf32>
    %cst_64 = arith.constant dense<0.000000e+00> : vector<10x8xf32>
    %135 = tpu.matmul %31, %134, %cst_64 {dimension_numbers = #tpu.dot_dimension_numbers<[1], [0], [0], [1], [0, 0, 1, 1], [], []>} : vector<10x32xf32>, vector<32x8xf32>, vector<10x8xf32> -> vector<10x8xf32>
    %136 = vector.extract_strided_slice %43 {offsets = [2, 0, 0], sizes = [1, 1, 8], strides = [1, 1, 1]} : vector<4x1x8xf32> to vector<1x1x8xf32>
    %137 = vector.shape_cast %136 : vector<1x1x8xf32> to vector<1x8xf32>
    %138 = vector.broadcast %137 : vector<1x8xf32> to vector<10x8xf32>
    %139 = arith.addf %135, %138 : vector<10x8xf32>
    %cst_65 = arith.constant dense<0.000000e+00> : vector<10x10xf32>
    %140 = tpu.matmul %125, %132, %cst_65 {dimension_numbers = #tpu.dot_dimension_numbers<[1], [1], [0], [0], [0, 0, 1, 0], [], []>} : vector<10x8xf32>, vector<10x8xf32>, vector<10x10xf32> -> vector<10x10xf32>
    %141 = arith.addf %140, %0 : vector<10x10xf32>
    %cst_66 = arith.constant dense<0xFF800000> : vector<10xf32>
    %142 = vector.multi_reduction <maximumf>, %141, %cst_66 [1] : vector<10x10xf32> to vector<10xf32>
    %143 = vector.shape_cast %142 : vector<10xf32> to vector<10x1xf32>
    %144 = vector.broadcast %143 : vector<10x1xf32> to vector<10x10xf32>
    %145 = arith.subf %141, %144 : vector<10x10xf32>
    %146 = math.exp %145 : vector<10x10xf32>
    %cst_67 = arith.constant dense<0.000000e+00> : vector<10xf32>
    %147 = vector.multi_reduction <add>, %146, %cst_67 [1] : vector<10x10xf32> to vector<10xf32>
    %148 = vector.shape_cast %147 : vector<10xf32> to vector<10x1xf32>
    %149 = vector.broadcast %148 : vector<10x1xf32> to vector<10x10xf32>
    %150 = arith.divf %146, %149 : vector<10x10xf32>
    %cst_68 = arith.constant dense<0.000000e+00> : vector<10x8xf32>
    %151 = tpu.matmul %150, %139, %cst_68 {dimension_numbers = #tpu.dot_dimension_numbers<[1], [0], [0], [1], [0, 0, 1, 1], [], []>} : vector<10x10xf32>, vector<10x8xf32>, vector<10x8xf32> -> vector<10x8xf32>
    %152 = vector.extract_strided_slice %45 {offsets = [2, 0, 0], sizes = [1, 8, 32], strides = [1, 1, 1]} : vector<4x8x32xf32> to vector<1x8x32xf32>
    %153 = vector.shape_cast %152 : vector<1x8x32xf32> to vector<8x32xf32>
    %cst_69 = arith.constant dense<0.000000e+00> : vector<10x32xf32>
    %154 = tpu.matmul %151, %153, %cst_69 {dimension_numbers = #tpu.dot_dimension_numbers<[1], [0], [0], [1], [0, 0, 1, 1], [], []>} : vector<10x8xf32>, vector<8x32xf32>, vector<10x32xf32> -> vector<10x32xf32>
    %155 = arith.addf %118, %154 : vector<10x32xf32>
    %156 = vector.extract_strided_slice %33 {offsets = [3, 0, 0], sizes = [1, 32, 8], strides = [1, 1, 1]} : vector<4x32x8xf32> to vector<1x32x8xf32>
    %157 = vector.shape_cast %156 : vector<1x32x8xf32> to vector<32x8xf32>
    %cst_70 = arith.constant dense<0.000000e+00> : vector<10x8xf32>
    %158 = tpu.matmul %31, %157, %cst_70 {dimension_numbers = #tpu.dot_dimension_numbers<[1], [0], [0], [1], [0, 0, 1, 1], [], []>} : vector<10x32xf32>, vector<32x8xf32>, vector<10x8xf32> -> vector<10x8xf32>
    %159 = vector.extract_strided_slice %35 {offsets = [3, 0, 0], sizes = [1, 1, 8], strides = [1, 1, 1]} : vector<4x1x8xf32> to vector<1x1x8xf32>
    %160 = vector.shape_cast %159 : vector<1x1x8xf32> to vector<1x8xf32>
    %161 = vector.broadcast %160 : vector<1x8xf32> to vector<10x8xf32>
    %162 = arith.addf %158, %161 : vector<10x8xf32>
    %163 = vector.extract_strided_slice %37 {offsets = [3, 0, 0], sizes = [1, 32, 8], strides = [1, 1, 1]} : vector<4x32x8xf32> to vector<1x32x8xf32>
    %164 = vector.shape_cast %163 : vector<1x32x8xf32> to vector<32x8xf32>
    %cst_71 = arith.constant dense<0.000000e+00> : vector<10x8xf32>
    %165 = tpu.matmul %31, %164, %cst_71 {dimension_numbers = #tpu.dot_dimension_numbers<[1], [0], [0], [1], [0, 0, 1, 1], [], []>} : vector<10x32xf32>, vector<32x8xf32>, vector<10x8xf32> -> vector<10x8xf32>
    %166 = vector.extract_strided_slice %39 {offsets = [3, 0, 0], sizes = [1, 1, 8], strides = [1, 1, 1]} : vector<4x1x8xf32> to vector<1x1x8xf32>
    %167 = vector.shape_cast %166 : vector<1x1x8xf32> to vector<1x8xf32>
    %168 = vector.broadcast %167 : vector<1x8xf32> to vector<10x8xf32>
    %169 = arith.addf %165, %168 : vector<10x8xf32>
    %170 = vector.extract_strided_slice %41 {offsets = [3, 0, 0], sizes = [1, 32, 8], strides = [1, 1, 1]} : vector<4x32x8xf32> to vector<1x32x8xf32>
    %171 = vector.shape_cast %170 : vector<1x32x8xf32> to vector<32x8xf32>
    %cst_72 = arith.constant dense<0.000000e+00> : vector<10x8xf32>
    %172 = tpu.matmul %31, %171, %cst_72 {dimension_numbers = #tpu.dot_dimension_numbers<[1], [0], [0], [1], [0, 0, 1, 1], [], []>} : vector<10x32xf32>, vector<32x8xf32>, vector<10x8xf32> -> vector<10x8xf32>
    %173 = vector.extract_strided_slice %43 {offsets = [3, 0, 0], sizes = [1, 1, 8], strides = [1, 1, 1]} : vector<4x1x8xf32> to vector<1x1x8xf32>
    %174 = vector.shape_cast %173 : vector<1x1x8xf32> to vector<1x8xf32>
    %175 = vector.broadcast %174 : vector<1x8xf32> to vector<10x8xf32>
    %176 = arith.addf %172, %175 : vector<10x8xf32>
    %cst_73 = arith.constant dense<0.000000e+00> : vector<10x10xf32>
    %177 = tpu.matmul %162, %169, %cst_73 {dimension_numbers = #tpu.dot_dimension_numbers<[1], [1], [0], [0], [0, 0, 1, 0], [], []>} : vector<10x8xf32>, vector<10x8xf32>, vector<10x10xf32> -> vector<10x10xf32>
    %178 = arith.addf %177, %0 : vector<10x10xf32>
    %cst_74 = arith.constant dense<0xFF800000> : vector<10xf32>
    %179 = vector.multi_reduction <maximumf>, %178, %cst_74 [1] : vector<10x10xf32> to vector<10xf32>
    %180 = vector.shape_cast %179 : vector<10xf32> to vector<10x1xf32>
    %181 = vector.broadcast %180 : vector<10x1xf32> to vector<10x10xf32>
    %182 = arith.subf %178, %181 : vector<10x10xf32>
    %183 = math.exp %182 : vector<10x10xf32>
    %cst_75 = arith.constant dense<0.000000e+00> : vector<10xf32>
    %184 = vector.multi_reduction <add>, %183, %cst_75 [1] : vector<10x10xf32> to vector<10xf32>
    %185 = vector.shape_cast %184 : vector<10xf32> to vector<10x1xf32>
    %186 = vector.broadcast %185 : vector<10x1xf32> to vector<10x10xf32>
    %187 = arith.divf %183, %186 : vector<10x10xf32>
    %cst_76 = arith.constant dense<0.000000e+00> : vector<10x8xf32>
    %188 = tpu.matmul %187, %176, %cst_76 {dimension_numbers = #tpu.dot_dimension_numbers<[1], [0], [0], [1], [0, 0, 1, 1], [], []>} : vector<10x10xf32>, vector<10x8xf32>, vector<10x8xf32> -> vector<10x8xf32>
    %189 = vector.extract_strided_slice %45 {offsets = [3, 0, 0], sizes = [1, 8, 32], strides = [1, 1, 1]} : vector<4x8x32xf32> to vector<1x8x32xf32>
    %190 = vector.shape_cast %189 : vector<1x8x32xf32> to vector<8x32xf32>
    %cst_77 = arith.constant dense<0.000000e+00> : vector<10x32xf32>
    %191 = tpu.matmul %188, %190, %cst_77 {dimension_numbers = #tpu.dot_dimension_numbers<[1], [0], [0], [1], [0, 0, 1, 1], [], []>} : vector<10x8xf32>, vector<8x32xf32>, vector<10x32xf32> -> vector<10x32xf32>
    %192 = arith.addf %155, %191 : vector<10x32xf32>
    %193 = arith.addf %5, %192 : vector<10x32xf32>
    %c0_78 = arith.constant 0 : index
    %c0_79 = arith.constant 0 : index
    %c0_80 = arith.constant 0 : index
    %194 = vector.load %arg13[%c0_78, %c0_79, %c0_80] : memref<2x1x32xf32, #tpu.memory_space<vmem>>, vector<1x1x32xf32>
    %195 = vector.shape_cast %194 : vector<1x1x32xf32> to vector<1x32xf32>
    %196 = vector.broadcast %195 : vector<1x32xf32> to vector<10x32xf32>
    %197 = arith.addf %193, %196 : vector<10x32xf32>
    %c0_81 = arith.constant 0 : index
    %c0_82 = arith.constant 0 : index
    %c0_83 = arith.constant 0 : index
    %198 = vector.load %arg14[%c0_81, %c0_82, %c0_83] : memref<2x1x32xf32, #tpu.memory_space<vmem>>, vector<1x1x32xf32>
    %199 = vector.shape_cast %198 : vector<1x1x32xf32> to vector<1x32xf32>
    %c0_84 = arith.constant 0 : index
    %c0_85 = arith.constant 0 : index
    %c0_86 = arith.constant 0 : index
    %200 = vector.load %arg15[%c0_84, %c0_85, %c0_86] : memref<2x1x32xf32, #tpu.memory_space<vmem>>, vector<1x1x32xf32>
    %201 = vector.shape_cast %200 : vector<1x1x32xf32> to vector<1x32xf32>
    %cst_87 = arith.constant dense<0.000000e+00> : vector<10xf32>
    %202 = vector.multi_reduction <add>, %197, %cst_87 [1] : vector<10x32xf32> to vector<10xf32>
    %203 = vector.shape_cast %202 : vector<10xf32> to vector<10x1xf32>
    %cst_88 = arith.constant 3.200000e+01 : f32
    %204 = vector.broadcast %cst_88 : f32 to vector<10x1xf32>
    %205 = arith.divf %203, %204 : vector<10x1xf32>
    %206 = vector.broadcast %205 : vector<10x1xf32> to vector<10x32xf32>
    %207 = arith.subf %197, %206 : vector<10x32xf32>
    %208 = arith.mulf %207, %207 : vector<10x32xf32>
    %cst_89 = arith.constant dense<0.000000e+00> : vector<10xf32>
    %209 = vector.multi_reduction <add>, %208, %cst_89 [1] : vector<10x32xf32> to vector<10xf32>
    %210 = vector.shape_cast %209 : vector<10xf32> to vector<10x1xf32>
    %cst_90 = arith.constant 3.200000e+01 : f32
    %211 = vector.broadcast %cst_90 : f32 to vector<10x1xf32>
    %212 = arith.divf %210, %211 : vector<10x1xf32>
    %213 = vector.broadcast %205 : vector<10x1xf32> to vector<10x32xf32>
    %214 = arith.subf %197, %213 : vector<10x32xf32>
    %cst_91 = arith.constant 9.99999997E-7 : f32
    %215 = vector.broadcast %cst_91 : f32 to vector<10x1xf32>
    %216 = arith.addf %212, %215 : vector<10x1xf32>
    %217 = math.rsqrt %216 : vector<10x1xf32>
    %218 = vector.broadcast %217 : vector<10x1xf32> to vector<10x32xf32>
    %219 = arith.mulf %214, %218 : vector<10x32xf32>
    %220 = vector.broadcast %199 : vector<1x32xf32> to vector<10x32xf32>
    %221 = arith.mulf %219, %220 : vector<10x32xf32>
    %222 = vector.broadcast %201 : vector<1x32xf32> to vector<10x32xf32>
    %223 = arith.addf %221, %222 : vector<10x32xf32>
    %c0_92 = arith.constant 0 : index
    %c0_93 = arith.constant 0 : index
    %c0_94 = arith.constant 0 : index
    %224 = vector.load %arg16[%c0_92, %c0_93, %c0_94] : memref<2x32x64xf32, #tpu.memory_space<vmem>>, vector<1x32x64xf32>
    %225 = vector.shape_cast %224 : vector<1x32x64xf32> to vector<32x64xf32>
    %cst_95 = arith.constant dense<0.000000e+00> : vector<10x64xf32>
    %226 = tpu.matmul %223, %225, %cst_95 {dimension_numbers = #tpu.dot_dimension_numbers<[1], [0], [0], [1], [0, 0, 1, 1], [], []>} : vector<10x32xf32>, vector<32x64xf32>, vector<10x64xf32> -> vector<10x64xf32>
    %c0_96 = arith.constant 0 : index
    %c0_97 = arith.constant 0 : index
    %c0_98 = arith.constant 0 : index
    %227 = vector.load %arg17[%c0_96, %c0_97, %c0_98] : memref<2x1x64xf32, #tpu.memory_space<vmem>>, vector<1x1x64xf32>
    %228 = vector.shape_cast %227 : vector<1x1x64xf32> to vector<1x64xf32>
    %229 = vector.broadcast %228 : vector<1x64xf32> to vector<10x64xf32>
    %230 = arith.addf %226, %229 : vector<10x64xf32>
    %231 = arith.mulf %230, %230 : vector<10x64xf32>
    %232 = arith.mulf %230, %231 : vector<10x64xf32>
    %cst_99 = arith.constant 4.471500e-02 : f32
    %233 = vector.broadcast %cst_99 : f32 to vector<10x64xf32>
    %234 = arith.mulf %233, %232 : vector<10x64xf32>
    %235 = arith.addf %230, %234 : vector<10x64xf32>
    %cst_100 = arith.constant 0.797884583 : f32
    %236 = vector.broadcast %cst_100 : f32 to vector<10x64xf32>
    %237 = arith.mulf %236, %235 : vector<10x64xf32>
    %238 = math.tanh %237 : vector<10x64xf32>
    %cst_101 = arith.constant 1.000000e+00 : f32
    %239 = vector.broadcast %cst_101 : f32 to vector<10x64xf32>
    %240 = arith.addf %239, %238 : vector<10x64xf32>
    %cst_102 = arith.constant 5.000000e-01 : f32
    %241 = vector.broadcast %cst_102 : f32 to vector<10x64xf32>
    %242 = arith.mulf %241, %240 : vector<10x64xf32>
    %243 = arith.mulf %230, %242 : vector<10x64xf32>
    %c0_103 = arith.constant 0 : index
    %c0_104 = arith.constant 0 : index
    %c0_105 = arith.constant 0 : index
    %244 = vector.load %arg18[%c0_103, %c0_104, %c0_105] : memref<2x64x32xf32, #tpu.memory_space<vmem>>, vector<1x64x32xf32>
    %245 = vector.shape_cast %244 : vector<1x64x32xf32> to vector<64x32xf32>
    %cst_106 = arith.constant dense<0.000000e+00> : vector<10x32xf32>
    %246 = tpu.matmul %243, %245, %cst_106 {dimension_numbers = #tpu.dot_dimension_numbers<[1], [0], [0], [1], [0, 0, 1, 1], [], []>} : vector<10x64xf32>, vector<64x32xf32>, vector<10x32xf32> -> vector<10x32xf32>
    %247 = arith.addf %197, %246 : vector<10x32xf32>
    %c0_107 = arith.constant 0 : index
    %c0_108 = arith.constant 0 : index
    %c0_109 = arith.constant 0 : index
    %248 = vector.load %arg19[%c0_107, %c0_108, %c0_109] : memref<2x1x32xf32, #tpu.memory_space<vmem>>, vector<1x1x32xf32>
    %249 = vector.shape_cast %248 : vector<1x1x32xf32> to vector<1x32xf32>
    %250 = vector.broadcast %249 : vector<1x32xf32> to vector<10x32xf32>
    %251 = arith.addf %247, %250 : vector<10x32xf32>
    %c1 = arith.constant 1 : index
    %c0_110 = arith.constant 0 : index
    %c0_111 = arith.constant 0 : index
    %252 = vector.load %arg4[%c1, %c0_110, %c0_111] : memref<2x1x32xf32, #tpu.memory_space<vmem>>, vector<1x1x32xf32>
    %253 = vector.shape_cast %252 : vector<1x1x32xf32> to vector<1x32xf32>
    %c1_112 = arith.constant 1 : index
    %c0_113 = arith.constant 0 : index
    %c0_114 = arith.constant 0 : index
    %254 = vector.load %arg5[%c1_112, %c0_113, %c0_114] : memref<2x1x32xf32, #tpu.memory_space<vmem>>, vector<1x1x32xf32>
    %255 = vector.shape_cast %254 : vector<1x1x32xf32> to vector<1x32xf32>
    %cst_115 = arith.constant dense<0.000000e+00> : vector<10xf32>
    %256 = vector.multi_reduction <add>, %251, %cst_115 [1] : vector<10x32xf32> to vector<10xf32>
    %257 = vector.shape_cast %256 : vector<10xf32> to vector<10x1xf32>
    %cst_116 = arith.constant 3.200000e+01 : f32
    %258 = vector.broadcast %cst_116 : f32 to vector<10x1xf32>
    %259 = arith.divf %257, %258 : vector<10x1xf32>
    %260 = vector.broadcast %259 : vector<10x1xf32> to vector<10x32xf32>
    %261 = arith.subf %251, %260 : vector<10x32xf32>
    %262 = arith.mulf %261, %261 : vector<10x32xf32>
    %cst_117 = arith.constant dense<0.000000e+00> : vector<10xf32>
    %263 = vector.multi_reduction <add>, %262, %cst_117 [1] : vector<10x32xf32> to vector<10xf32>
    %264 = vector.shape_cast %263 : vector<10xf32> to vector<10x1xf32>
    %cst_118 = arith.constant 3.200000e+01 : f32
    %265 = vector.broadcast %cst_118 : f32 to vector<10x1xf32>
    %266 = arith.divf %264, %265 : vector<10x1xf32>
    %267 = vector.broadcast %259 : vector<10x1xf32> to vector<10x32xf32>
    %268 = arith.subf %251, %267 : vector<10x32xf32>
    %cst_119 = arith.constant 9.99999997E-7 : f32
    %269 = vector.broadcast %cst_119 : f32 to vector<10x1xf32>
    %270 = arith.addf %266, %269 : vector<10x1xf32>
    %271 = math.rsqrt %270 : vector<10x1xf32>
    %272 = vector.broadcast %271 : vector<10x1xf32> to vector<10x32xf32>
    %273 = arith.mulf %268, %272 : vector<10x32xf32>
    %274 = vector.broadcast %253 : vector<1x32xf32> to vector<10x32xf32>
    %275 = arith.mulf %273, %274 : vector<10x32xf32>
    %276 = vector.broadcast %255 : vector<1x32xf32> to vector<10x32xf32>
    %277 = arith.addf %275, %276 : vector<10x32xf32>
    %c1_120 = arith.constant 1 : index
    %c0_121 = arith.constant 0 : index
    %c0_122 = arith.constant 0 : index
    %c0_123 = arith.constant 0 : index
    %278 = vector.load %arg6[%c1_120, %c0_121, %c0_122, %c0_123] : memref<2x4x32x8xf32, #tpu.memory_space<vmem>>, vector<1x4x32x8xf32>
    %279 = vector.shape_cast %278 : vector<1x4x32x8xf32> to vector<4x32x8xf32>
    %c1_124 = arith.constant 1 : index
    %c0_125 = arith.constant 0 : index
    %c0_126 = arith.constant 0 : index
    %c0_127 = arith.constant 0 : index
    %280 = vector.load %arg7[%c1_124, %c0_125, %c0_126, %c0_127] : memref<2x4x1x8xf32, #tpu.memory_space<vmem>>, vector<1x4x1x8xf32>
    %281 = vector.shape_cast %280 : vector<1x4x1x8xf32> to vector<4x1x8xf32>
    %c1_128 = arith.constant 1 : index
    %c0_129 = arith.constant 0 : index
    %c0_130 = arith.constant 0 : index
    %c0_131 = arith.constant 0 : index
    %282 = vector.load %arg8[%c1_128, %c0_129, %c0_130, %c0_131] : memref<2x4x32x8xf32, #tpu.memory_space<vmem>>, vector<1x4x32x8xf32>
    %283 = vector.shape_cast %282 : vector<1x4x32x8xf32> to vector<4x32x8xf32>
    %c1_132 = arith.constant 1 : index
    %c0_133 = arith.constant 0 : index
    %c0_134 = arith.constant 0 : index
    %c0_135 = arith.constant 0 : index
    %284 = vector.load %arg9[%c1_132, %c0_133, %c0_134, %c0_135] : memref<2x4x1x8xf32, #tpu.memory_space<vmem>>, vector<1x4x1x8xf32>
    %285 = vector.shape_cast %284 : vector<1x4x1x8xf32> to vector<4x1x8xf32>
    %c1_136 = arith.constant 1 : index
    %c0_137 = arith.constant 0 : index
    %c0_138 = arith.constant 0 : index
    %c0_139 = arith.constant 0 : index
    %286 = vector.load %arg10[%c1_136, %c0_137, %c0_138, %c0_139] : memref<2x4x32x8xf32, #tpu.memory_space<vmem>>, vector<1x4x32x8xf32>
    %287 = vector.shape_cast %286 : vector<1x4x32x8xf32> to vector<4x32x8xf32>
    %c1_140 = arith.constant 1 : index
    %c0_141 = arith.constant 0 : index
    %c0_142 = arith.constant 0 : index
    %c0_143 = arith.constant 0 : index
    %288 = vector.load %arg11[%c1_140, %c0_141, %c0_142, %c0_143] : memref<2x4x1x8xf32, #tpu.memory_space<vmem>>, vector<1x4x1x8xf32>
    %289 = vector.shape_cast %288 : vector<1x4x1x8xf32> to vector<4x1x8xf32>
    %c1_144 = arith.constant 1 : index
    %c0_145 = arith.constant 0 : index
    %c0_146 = arith.constant 0 : index
    %c0_147 = arith.constant 0 : index
    %290 = vector.load %arg12[%c1_144, %c0_145, %c0_146, %c0_147] : memref<2x4x8x32xf32, #tpu.memory_space<vmem>>, vector<1x4x8x32xf32>
    %291 = vector.shape_cast %290 : vector<1x4x8x32xf32> to vector<4x8x32xf32>
    %292 = vector.extract_strided_slice %279 {offsets = [0, 0, 0], sizes = [1, 32, 8], strides = [1, 1, 1]} : vector<4x32x8xf32> to vector<1x32x8xf32>
    %293 = vector.shape_cast %292 : vector<1x32x8xf32> to vector<32x8xf32>
    %cst_148 = arith.constant dense<0.000000e+00> : vector<10x8xf32>
    %294 = tpu.matmul %277, %293, %cst_148 {dimension_numbers = #tpu.dot_dimension_numbers<[1], [0], [0], [1], [0, 0, 1, 1], [], []>} : vector<10x32xf32>, vector<32x8xf32>, vector<10x8xf32> -> vector<10x8xf32>
    %295 = vector.extract_strided_slice %281 {offsets = [0, 0, 0], sizes = [1, 1, 8], strides = [1, 1, 1]} : vector<4x1x8xf32> to vector<1x1x8xf32>
    %296 = vector.shape_cast %295 : vector<1x1x8xf32> to vector<1x8xf32>
    %297 = vector.broadcast %296 : vector<1x8xf32> to vector<10x8xf32>
    %298 = arith.addf %294, %297 : vector<10x8xf32>
    %299 = vector.extract_strided_slice %283 {offsets = [0, 0, 0], sizes = [1, 32, 8], strides = [1, 1, 1]} : vector<4x32x8xf32> to vector<1x32x8xf32>
    %300 = vector.shape_cast %299 : vector<1x32x8xf32> to vector<32x8xf32>
    %cst_149 = arith.constant dense<0.000000e+00> : vector<10x8xf32>
    %301 = tpu.matmul %277, %300, %cst_149 {dimension_numbers = #tpu.dot_dimension_numbers<[1], [0], [0], [1], [0, 0, 1, 1], [], []>} : vector<10x32xf32>, vector<32x8xf32>, vector<10x8xf32> -> vector<10x8xf32>
    %302 = vector.extract_strided_slice %285 {offsets = [0, 0, 0], sizes = [1, 1, 8], strides = [1, 1, 1]} : vector<4x1x8xf32> to vector<1x1x8xf32>
    %303 = vector.shape_cast %302 : vector<1x1x8xf32> to vector<1x8xf32>
    %304 = vector.broadcast %303 : vector<1x8xf32> to vector<10x8xf32>
    %305 = arith.addf %301, %304 : vector<10x8xf32>
    %306 = vector.extract_strided_slice %287 {offsets = [0, 0, 0], sizes = [1, 32, 8], strides = [1, 1, 1]} : vector<4x32x8xf32> to vector<1x32x8xf32>
    %307 = vector.shape_cast %306 : vector<1x32x8xf32> to vector<32x8xf32>
    %cst_150 = arith.constant dense<0.000000e+00> : vector<10x8xf32>
    %308 = tpu.matmul %277, %307, %cst_150 {dimension_numbers = #tpu.dot_dimension_numbers<[1], [0], [0], [1], [0, 0, 1, 1], [], []>} : vector<10x32xf32>, vector<32x8xf32>, vector<10x8xf32> -> vector<10x8xf32>
    %309 = vector.extract_strided_slice %289 {offsets = [0, 0, 0], sizes = [1, 1, 8], strides = [1, 1, 1]} : vector<4x1x8xf32> to vector<1x1x8xf32>
    %310 = vector.shape_cast %309 : vector<1x1x8xf32> to vector<1x8xf32>
    %311 = vector.broadcast %310 : vector<1x8xf32> to vector<10x8xf32>
    %312 = arith.addf %308, %311 : vector<10x8xf32>
    %cst_151 = arith.constant dense<0.000000e+00> : vector<10x10xf32>
    %313 = tpu.matmul %298, %305, %cst_151 {dimension_numbers = #tpu.dot_dimension_numbers<[1], [1], [0], [0], [0, 0, 1, 0], [], []>} : vector<10x8xf32>, vector<10x8xf32>, vector<10x10xf32> -> vector<10x10xf32>
    %314 = arith.addf %313, %0 : vector<10x10xf32>
    %cst_152 = arith.constant dense<0xFF800000> : vector<10xf32>
    %315 = vector.multi_reduction <maximumf>, %314, %cst_152 [1] : vector<10x10xf32> to vector<10xf32>
    %316 = vector.shape_cast %315 : vector<10xf32> to vector<10x1xf32>
    %317 = vector.broadcast %316 : vector<10x1xf32> to vector<10x10xf32>
    %318 = arith.subf %314, %317 : vector<10x10xf32>
    %319 = math.exp %318 : vector<10x10xf32>
    %cst_153 = arith.constant dense<0.000000e+00> : vector<10xf32>
    %320 = vector.multi_reduction <add>, %319, %cst_153 [1] : vector<10x10xf32> to vector<10xf32>
    %321 = vector.shape_cast %320 : vector<10xf32> to vector<10x1xf32>
    %322 = vector.broadcast %321 : vector<10x1xf32> to vector<10x10xf32>
    %323 = arith.divf %319, %322 : vector<10x10xf32>
    %cst_154 = arith.constant dense<0.000000e+00> : vector<10x8xf32>
    %324 = tpu.matmul %323, %312, %cst_154 {dimension_numbers = #tpu.dot_dimension_numbers<[1], [0], [0], [1], [0, 0, 1, 1], [], []>} : vector<10x10xf32>, vector<10x8xf32>, vector<10x8xf32> -> vector<10x8xf32>
    %325 = vector.extract_strided_slice %291 {offsets = [0, 0, 0], sizes = [1, 8, 32], strides = [1, 1, 1]} : vector<4x8x32xf32> to vector<1x8x32xf32>
    %326 = vector.shape_cast %325 : vector<1x8x32xf32> to vector<8x32xf32>
    %cst_155 = arith.constant dense<0.000000e+00> : vector<10x32xf32>
    %327 = tpu.matmul %324, %326, %cst_155 {dimension_numbers = #tpu.dot_dimension_numbers<[1], [0], [0], [1], [0, 0, 1, 1], [], []>} : vector<10x8xf32>, vector<8x32xf32>, vector<10x32xf32> -> vector<10x32xf32>
    %328 = vector.extract_strided_slice %279 {offsets = [1, 0, 0], sizes = [1, 32, 8], strides = [1, 1, 1]} : vector<4x32x8xf32> to vector<1x32x8xf32>
    %329 = vector.shape_cast %328 : vector<1x32x8xf32> to vector<32x8xf32>
    %cst_156 = arith.constant dense<0.000000e+00> : vector<10x8xf32>
    %330 = tpu.matmul %277, %329, %cst_156 {dimension_numbers = #tpu.dot_dimension_numbers<[1], [0], [0], [1], [0, 0, 1, 1], [], []>} : vector<10x32xf32>, vector<32x8xf32>, vector<10x8xf32> -> vector<10x8xf32>
    %331 = vector.extract_strided_slice %281 {offsets = [1, 0, 0], sizes = [1, 1, 8], strides = [1, 1, 1]} : vector<4x1x8xf32> to vector<1x1x8xf32>
    %332 = vector.shape_cast %331 : vector<1x1x8xf32> to vector<1x8xf32>
    %333 = vector.broadcast %332 : vector<1x8xf32> to vector<10x8xf32>
    %334 = arith.addf %330, %333 : vector<10x8xf32>
    %335 = vector.extract_strided_slice %283 {offsets = [1, 0, 0], sizes = [1, 32, 8], strides = [1, 1, 1]} : vector<4x32x8xf32> to vector<1x32x8xf32>
    %336 = vector.shape_cast %335 : vector<1x32x8xf32> to vector<32x8xf32>
    %cst_157 = arith.constant dense<0.000000e+00> : vector<10x8xf32>
    %337 = tpu.matmul %277, %336, %cst_157 {dimension_numbers = #tpu.dot_dimension_numbers<[1], [0], [0], [1], [0, 0, 1, 1], [], []>} : vector<10x32xf32>, vector<32x8xf32>, vector<10x8xf32> -> vector<10x8xf32>
    %338 = vector.extract_strided_slice %285 {offsets = [1, 0, 0], sizes = [1, 1, 8], strides = [1, 1, 1]} : vector<4x1x8xf32> to vector<1x1x8xf32>
    %339 = vector.shape_cast %338 : vector<1x1x8xf32> to vector<1x8xf32>
    %340 = vector.broadcast %339 : vector<1x8xf32> to vector<10x8xf32>
    %341 = arith.addf %337, %340 : vector<10x8xf32>
    %342 = vector.extract_strided_slice %287 {offsets = [1, 0, 0], sizes = [1, 32, 8], strides = [1, 1, 1]} : vector<4x32x8xf32> to vector<1x32x8xf32>
    %343 = vector.shape_cast %342 : vector<1x32x8xf32> to vector<32x8xf32>
    %cst_158 = arith.constant dense<0.000000e+00> : vector<10x8xf32>
    %344 = tpu.matmul %277, %343, %cst_158 {dimension_numbers = #tpu.dot_dimension_numbers<[1], [0], [0], [1], [0, 0, 1, 1], [], []>} : vector<10x32xf32>, vector<32x8xf32>, vector<10x8xf32> -> vector<10x8xf32>
    %345 = vector.extract_strided_slice %289 {offsets = [1, 0, 0], sizes = [1, 1, 8], strides = [1, 1, 1]} : vector<4x1x8xf32> to vector<1x1x8xf32>
    %346 = vector.shape_cast %345 : vector<1x1x8xf32> to vector<1x8xf32>
    %347 = vector.broadcast %346 : vector<1x8xf32> to vector<10x8xf32>
    %348 = arith.addf %344, %347 : vector<10x8xf32>
    %cst_159 = arith.constant dense<0.000000e+00> : vector<10x10xf32>
    %349 = tpu.matmul %334, %341, %cst_159 {dimension_numbers = #tpu.dot_dimension_numbers<[1], [1], [0], [0], [0, 0, 1, 0], [], []>} : vector<10x8xf32>, vector<10x8xf32>, vector<10x10xf32> -> vector<10x10xf32>
    %350 = arith.addf %349, %0 : vector<10x10xf32>
    %cst_160 = arith.constant dense<0xFF800000> : vector<10xf32>
    %351 = vector.multi_reduction <maximumf>, %350, %cst_160 [1] : vector<10x10xf32> to vector<10xf32>
    %352 = vector.shape_cast %351 : vector<10xf32> to vector<10x1xf32>
    %353 = vector.broadcast %352 : vector<10x1xf32> to vector<10x10xf32>
    %354 = arith.subf %350, %353 : vector<10x10xf32>
    %355 = math.exp %354 : vector<10x10xf32>
    %cst_161 = arith.constant dense<0.000000e+00> : vector<10xf32>
    %356 = vector.multi_reduction <add>, %355, %cst_161 [1] : vector<10x10xf32> to vector<10xf32>
    %357 = vector.shape_cast %356 : vector<10xf32> to vector<10x1xf32>
    %358 = vector.broadcast %357 : vector<10x1xf32> to vector<10x10xf32>
    %359 = arith.divf %355, %358 : vector<10x10xf32>
    %cst_162 = arith.constant dense<0.000000e+00> : vector<10x8xf32>
    %360 = tpu.matmul %359, %348, %cst_162 {dimension_numbers = #tpu.dot_dimension_numbers<[1], [0], [0], [1], [0, 0, 1, 1], [], []>} : vector<10x10xf32>, vector<10x8xf32>, vector<10x8xf32> -> vector<10x8xf32>
    %361 = vector.extract_strided_slice %291 {offsets = [1, 0, 0], sizes = [1, 8, 32], strides = [1, 1, 1]} : vector<4x8x32xf32> to vector<1x8x32xf32>
    %362 = vector.shape_cast %361 : vector<1x8x32xf32> to vector<8x32xf32>
    %cst_163 = arith.constant dense<0.000000e+00> : vector<10x32xf32>
    %363 = tpu.matmul %360, %362, %cst_163 {dimension_numbers = #tpu.dot_dimension_numbers<[1], [0], [0], [1], [0, 0, 1, 1], [], []>} : vector<10x8xf32>, vector<8x32xf32>, vector<10x32xf32> -> vector<10x32xf32>
    %364 = arith.addf %327, %363 : vector<10x32xf32>
    %365 = vector.extract_strided_slice %279 {offsets = [2, 0, 0], sizes = [1, 32, 8], strides = [1, 1, 1]} : vector<4x32x8xf32> to vector<1x32x8xf32>
    %366 = vector.shape_cast %365 : vector<1x32x8xf32> to vector<32x8xf32>
    %cst_164 = arith.constant dense<0.000000e+00> : vector<10x8xf32>
    %367 = tpu.matmul %277, %366, %cst_164 {dimension_numbers = #tpu.dot_dimension_numbers<[1], [0], [0], [1], [0, 0, 1, 1], [], []>} : vector<10x32xf32>, vector<32x8xf32>, vector<10x8xf32> -> vector<10x8xf32>
    %368 = vector.extract_strided_slice %281 {offsets = [2, 0, 0], sizes = [1, 1, 8], strides = [1, 1, 1]} : vector<4x1x8xf32> to vector<1x1x8xf32>
    %369 = vector.shape_cast %368 : vector<1x1x8xf32> to vector<1x8xf32>
    %370 = vector.broadcast %369 : vector<1x8xf32> to vector<10x8xf32>
    %371 = arith.addf %367, %370 : vector<10x8xf32>
    %372 = vector.extract_strided_slice %283 {offsets = [2, 0, 0], sizes = [1, 32, 8], strides = [1, 1, 1]} : vector<4x32x8xf32> to vector<1x32x8xf32>
    %373 = vector.shape_cast %372 : vector<1x32x8xf32> to vector<32x8xf32>
    %cst_165 = arith.constant dense<0.000000e+00> : vector<10x8xf32>
    %374 = tpu.matmul %277, %373, %cst_165 {dimension_numbers = #tpu.dot_dimension_numbers<[1], [0], [0], [1], [0, 0, 1, 1], [], []>} : vector<10x32xf32>, vector<32x8xf32>, vector<10x8xf32> -> vector<10x8xf32>
    %375 = vector.extract_strided_slice %285 {offsets = [2, 0, 0], sizes = [1, 1, 8], strides = [1, 1, 1]} : vector<4x1x8xf32> to vector<1x1x8xf32>
    %376 = vector.shape_cast %375 : vector<1x1x8xf32> to vector<1x8xf32>
    %377 = vector.broadcast %376 : vector<1x8xf32> to vector<10x8xf32>
    %378 = arith.addf %374, %377 : vector<10x8xf32>
    %379 = vector.extract_strided_slice %287 {offsets = [2, 0, 0], sizes = [1, 32, 8], strides = [1, 1, 1]} : vector<4x32x8xf32> to vector<1x32x8xf32>
    %380 = vector.shape_cast %379 : vector<1x32x8xf32> to vector<32x8xf32>
    %cst_166 = arith.constant dense<0.000000e+00> : vector<10x8xf32>
    %381 = tpu.matmul %277, %380, %cst_166 {dimension_numbers = #tpu.dot_dimension_numbers<[1], [0], [0], [1], [0, 0, 1, 1], [], []>} : vector<10x32xf32>, vector<32x8xf32>, vector<10x8xf32> -> vector<10x8xf32>
    %382 = vector.extract_strided_slice %289 {offsets = [2, 0, 0], sizes = [1, 1, 8], strides = [1, 1, 1]} : vector<4x1x8xf32> to vector<1x1x8xf32>
    %383 = vector.shape_cast %382 : vector<1x1x8xf32> to vector<1x8xf32>
    %384 = vector.broadcast %383 : vector<1x8xf32> to vector<10x8xf32>
    %385 = arith.addf %381, %384 : vector<10x8xf32>
    %cst_167 = arith.constant dense<0.000000e+00> : vector<10x10xf32>
    %386 = tpu.matmul %371, %378, %cst_167 {dimension_numbers = #tpu.dot_dimension_numbers<[1], [1], [0], [0], [0, 0, 1, 0], [], []>} : vector<10x8xf32>, vector<10x8xf32>, vector<10x10xf32> -> vector<10x10xf32>
    %387 = arith.addf %386, %0 : vector<10x10xf32>
    %cst_168 = arith.constant dense<0xFF800000> : vector<10xf32>
    %388 = vector.multi_reduction <maximumf>, %387, %cst_168 [1] : vector<10x10xf32> to vector<10xf32>
    %389 = vector.shape_cast %388 : vector<10xf32> to vector<10x1xf32>
    %390 = vector.broadcast %389 : vector<10x1xf32> to vector<10x10xf32>
    %391 = arith.subf %387, %390 : vector<10x10xf32>
    %392 = math.exp %391 : vector<10x10xf32>
    %cst_169 = arith.constant dense<0.000000e+00> : vector<10xf32>
    %393 = vector.multi_reduction <add>, %392, %cst_169 [1] : vector<10x10xf32> to vector<10xf32>
    %394 = vector.shape_cast %393 : vector<10xf32> to vector<10x1xf32>
    %395 = vector.broadcast %394 : vector<10x1xf32> to vector<10x10xf32>
    %396 = arith.divf %392, %395 : vector<10x10xf32>
    %cst_170 = arith.constant dense<0.000000e+00> : vector<10x8xf32>
    %397 = tpu.matmul %396, %385, %cst_170 {dimension_numbers = #tpu.dot_dimension_numbers<[1], [0], [0], [1], [0, 0, 1, 1], [], []>} : vector<10x10xf32>, vector<10x8xf32>, vector<10x8xf32> -> vector<10x8xf32>
    %398 = vector.extract_strided_slice %291 {offsets = [2, 0, 0], sizes = [1, 8, 32], strides = [1, 1, 1]} : vector<4x8x32xf32> to vector<1x8x32xf32>
    %399 = vector.shape_cast %398 : vector<1x8x32xf32> to vector<8x32xf32>
    %cst_171 = arith.constant dense<0.000000e+00> : vector<10x32xf32>
    %400 = tpu.matmul %397, %399, %cst_171 {dimension_numbers = #tpu.dot_dimension_numbers<[1], [0], [0], [1], [0, 0, 1, 1], [], []>} : vector<10x8xf32>, vector<8x32xf32>, vector<10x32xf32> -> vector<10x32xf32>
    %401 = arith.addf %364, %400 : vector<10x32xf32>
    %402 = vector.extract_strided_slice %279 {offsets = [3, 0, 0], sizes = [1, 32, 8], strides = [1, 1, 1]} : vector<4x32x8xf32> to vector<1x32x8xf32>
    %403 = vector.shape_cast %402 : vector<1x32x8xf32> to vector<32x8xf32>
    %cst_172 = arith.constant dense<0.000000e+00> : vector<10x8xf32>
    %404 = tpu.matmul %277, %403, %cst_172 {dimension_numbers = #tpu.dot_dimension_numbers<[1], [0], [0], [1], [0, 0, 1, 1], [], []>} : vector<10x32xf32>, vector<32x8xf32>, vector<10x8xf32> -> vector<10x8xf32>
    %405 = vector.extract_strided_slice %281 {offsets = [3, 0, 0], sizes = [1, 1, 8], strides = [1, 1, 1]} : vector<4x1x8xf32> to vector<1x1x8xf32>
    %406 = vector.shape_cast %405 : vector<1x1x8xf32> to vector<1x8xf32>
    %407 = vector.broadcast %406 : vector<1x8xf32> to vector<10x8xf32>
    %408 = arith.addf %404, %407 : vector<10x8xf32>
    %409 = vector.extract_strided_slice %283 {offsets = [3, 0, 0], sizes = [1, 32, 8], strides = [1, 1, 1]} : vector<4x32x8xf32> to vector<1x32x8xf32>
    %410 = vector.shape_cast %409 : vector<1x32x8xf32> to vector<32x8xf32>
    %cst_173 = arith.constant dense<0.000000e+00> : vector<10x8xf32>
    %411 = tpu.matmul %277, %410, %cst_173 {dimension_numbers = #tpu.dot_dimension_numbers<[1], [0], [0], [1], [0, 0, 1, 1], [], []>} : vector<10x32xf32>, vector<32x8xf32>, vector<10x8xf32> -> vector<10x8xf32>
    %412 = vector.extract_strided_slice %285 {offsets = [3, 0, 0], sizes = [1, 1, 8], strides = [1, 1, 1]} : vector<4x1x8xf32> to vector<1x1x8xf32>
    %413 = vector.shape_cast %412 : vector<1x1x8xf32> to vector<1x8xf32>
    %414 = vector.broadcast %413 : vector<1x8xf32> to vector<10x8xf32>
    %415 = arith.addf %411, %414 : vector<10x8xf32>
    %416 = vector.extract_strided_slice %287 {offsets = [3, 0, 0], sizes = [1, 32, 8], strides = [1, 1, 1]} : vector<4x32x8xf32> to vector<1x32x8xf32>
    %417 = vector.shape_cast %416 : vector<1x32x8xf32> to vector<32x8xf32>
    %cst_174 = arith.constant dense<0.000000e+00> : vector<10x8xf32>
    %418 = tpu.matmul %277, %417, %cst_174 {dimension_numbers = #tpu.dot_dimension_numbers<[1], [0], [0], [1], [0, 0, 1, 1], [], []>} : vector<10x32xf32>, vector<32x8xf32>, vector<10x8xf32> -> vector<10x8xf32>
    %419 = vector.extract_strided_slice %289 {offsets = [3, 0, 0], sizes = [1, 1, 8], strides = [1, 1, 1]} : vector<4x1x8xf32> to vector<1x1x8xf32>
    %420 = vector.shape_cast %419 : vector<1x1x8xf32> to vector<1x8xf32>
    %421 = vector.broadcast %420 : vector<1x8xf32> to vector<10x8xf32>
    %422 = arith.addf %418, %421 : vector<10x8xf32>
    %cst_175 = arith.constant dense<0.000000e+00> : vector<10x10xf32>
    %423 = tpu.matmul %408, %415, %cst_175 {dimension_numbers = #tpu.dot_dimension_numbers<[1], [1], [0], [0], [0, 0, 1, 0], [], []>} : vector<10x8xf32>, vector<10x8xf32>, vector<10x10xf32> -> vector<10x10xf32>
    %424 = arith.addf %423, %0 : vector<10x10xf32>
    %cst_176 = arith.constant dense<0xFF800000> : vector<10xf32>
    %425 = vector.multi_reduction <maximumf>, %424, %cst_176 [1] : vector<10x10xf32> to vector<10xf32>
    %426 = vector.shape_cast %425 : vector<10xf32> to vector<10x1xf32>
    %427 = vector.broadcast %426 : vector<10x1xf32> to vector<10x10xf32>
    %428 = arith.subf %424, %427 : vector<10x10xf32>
    %429 = math.exp %428 : vector<10x10xf32>
    %cst_177 = arith.constant dense<0.000000e+00> : vector<10xf32>
    %430 = vector.multi_reduction <add>, %429, %cst_177 [1] : vector<10x10xf32> to vector<10xf32>
    %431 = vector.shape_cast %430 : vector<10xf32> to vector<10x1xf32>
    %432 = vector.broadcast %431 : vector<10x1xf32> to vector<10x10xf32>
    %433 = arith.divf %429, %432 : vector<10x10xf32>
    %cst_178 = arith.constant dense<0.000000e+00> : vector<10x8xf32>
    %434 = tpu.matmul %433, %422, %cst_178 {dimension_numbers = #tpu.dot_dimension_numbers<[1], [0], [0], [1], [0, 0, 1, 1], [], []>} : vector<10x10xf32>, vector<10x8xf32>, vector<10x8xf32> -> vector<10x8xf32>
    %435 = vector.extract_strided_slice %291 {offsets = [3, 0, 0], sizes = [1, 8, 32], strides = [1, 1, 1]} : vector<4x8x32xf32> to vector<1x8x32xf32>
    %436 = vector.shape_cast %435 : vector<1x8x32xf32> to vector<8x32xf32>
    %cst_179 = arith.constant dense<0.000000e+00> : vector<10x32xf32>
    %437 = tpu.matmul %434, %436, %cst_179 {dimension_numbers = #tpu.dot_dimension_numbers<[1], [0], [0], [1], [0, 0, 1, 1], [], []>} : vector<10x8xf32>, vector<8x32xf32>, vector<10x32xf32> -> vector<10x32xf32>
    %438 = arith.addf %401, %437 : vector<10x32xf32>
    %439 = arith.addf %251, %438 : vector<10x32xf32>
    %c1_180 = arith.constant 1 : index
    %c0_181 = arith.constant 0 : index
    %c0_182 = arith.constant 0 : index
    %440 = vector.load %arg13[%c1_180, %c0_181, %c0_182] : memref<2x1x32xf32, #tpu.memory_space<vmem>>, vector<1x1x32xf32>
    %441 = vector.shape_cast %440 : vector<1x1x32xf32> to vector<1x32xf32>
    %442 = vector.broadcast %441 : vector<1x32xf32> to vector<10x32xf32>
    %443 = arith.addf %439, %442 : vector<10x32xf32>
    %c1_183 = arith.constant 1 : index
    %c0_184 = arith.constant 0 : index
    %c0_185 = arith.constant 0 : index
    %444 = vector.load %arg14[%c1_183, %c0_184, %c0_185] : memref<2x1x32xf32, #tpu.memory_space<vmem>>, vector<1x1x32xf32>
    %445 = vector.shape_cast %444 : vector<1x1x32xf32> to vector<1x32xf32>
    %c1_186 = arith.constant 1 : index
    %c0_187 = arith.constant 0 : index
    %c0_188 = arith.constant 0 : index
    %446 = vector.load %arg15[%c1_186, %c0_187, %c0_188] : memref<2x1x32xf32, #tpu.memory_space<vmem>>, vector<1x1x32xf32>
    %447 = vector.shape_cast %446 : vector<1x1x32xf32> to vector<1x32xf32>
    %cst_189 = arith.constant dense<0.000000e+00> : vector<10xf32>
    %448 = vector.multi_reduction <add>, %443, %cst_189 [1] : vector<10x32xf32> to vector<10xf32>
    %449 = vector.shape_cast %448 : vector<10xf32> to vector<10x1xf32>
    %cst_190 = arith.constant 3.200000e+01 : f32
    %450 = vector.broadcast %cst_190 : f32 to vector<10x1xf32>
    %451 = arith.divf %449, %450 : vector<10x1xf32>
    %452 = vector.broadcast %451 : vector<10x1xf32> to vector<10x32xf32>
    %453 = arith.subf %443, %452 : vector<10x32xf32>
    %454 = arith.mulf %453, %453 : vector<10x32xf32>
    %cst_191 = arith.constant dense<0.000000e+00> : vector<10xf32>
    %455 = vector.multi_reduction <add>, %454, %cst_191 [1] : vector<10x32xf32> to vector<10xf32>
    %456 = vector.shape_cast %455 : vector<10xf32> to vector<10x1xf32>
    %cst_192 = arith.constant 3.200000e+01 : f32
    %457 = vector.broadcast %cst_192 : f32 to vector<10x1xf32>
    %458 = arith.divf %456, %457 : vector<10x1xf32>
    %459 = vector.broadcast %451 : vector<10x1xf32> to vector<10x32xf32>
    %460 = arith.subf %443, %459 : vector<10x32xf32>
    %cst_193 = arith.constant 9.99999997E-7 : f32
    %461 = vector.broadcast %cst_193 : f32 to vector<10x1xf32>
    %462 = arith.addf %458, %461 : vector<10x1xf32>
    %463 = math.rsqrt %462 : vector<10x1xf32>
    %464 = vector.broadcast %463 : vector<10x1xf32> to vector<10x32xf32>
    %465 = arith.mulf %460, %464 : vector<10x32xf32>
    %466 = vector.broadcast %445 : vector<1x32xf32> to vector<10x32xf32>
    %467 = arith.mulf %465, %466 : vector<10x32xf32>
    %468 = vector.broadcast %447 : vector<1x32xf32> to vector<10x32xf32>
    %469 = arith.addf %467, %468 : vector<10x32xf32>
    %c1_194 = arith.constant 1 : index
    %c0_195 = arith.constant 0 : index
    %c0_196 = arith.constant 0 : index
    %470 = vector.load %arg16[%c1_194, %c0_195, %c0_196] : memref<2x32x64xf32, #tpu.memory_space<vmem>>, vector<1x32x64xf32>
    %471 = vector.shape_cast %470 : vector<1x32x64xf32> to vector<32x64xf32>
    %cst_197 = arith.constant dense<0.000000e+00> : vector<10x64xf32>
    %472 = tpu.matmul %469, %471, %cst_197 {dimension_numbers = #tpu.dot_dimension_numbers<[1], [0], [0], [1], [0, 0, 1, 1], [], []>} : vector<10x32xf32>, vector<32x64xf32>, vector<10x64xf32> -> vector<10x64xf32>
    %c1_198 = arith.constant 1 : index
    %c0_199 = arith.constant 0 : index
    %c0_200 = arith.constant 0 : index
    %473 = vector.load %arg17[%c1_198, %c0_199, %c0_200] : memref<2x1x64xf32, #tpu.memory_space<vmem>>, vector<1x1x64xf32>
    %474 = vector.shape_cast %473 : vector<1x1x64xf32> to vector<1x64xf32>
    %475 = vector.broadcast %474 : vector<1x64xf32> to vector<10x64xf32>
    %476 = arith.addf %472, %475 : vector<10x64xf32>
    %477 = arith.mulf %476, %476 : vector<10x64xf32>
    %478 = arith.mulf %476, %477 : vector<10x64xf32>
    %cst_201 = arith.constant 4.471500e-02 : f32
    %479 = vector.broadcast %cst_201 : f32 to vector<10x64xf32>
    %480 = arith.mulf %479, %478 : vector<10x64xf32>
    %481 = arith.addf %476, %480 : vector<10x64xf32>
    %cst_202 = arith.constant 0.797884583 : f32
    %482 = vector.broadcast %cst_202 : f32 to vector<10x64xf32>
    %483 = arith.mulf %482, %481 : vector<10x64xf32>
    %484 = math.tanh %483 : vector<10x64xf32>
    %cst_203 = arith.constant 1.000000e+00 : f32
    %485 = vector.broadcast %cst_203 : f32 to vector<10x64xf32>
    %486 = arith.addf %485, %484 : vector<10x64xf32>
    %cst_204 = arith.constant 5.000000e-01 : f32
    %487 = vector.broadcast %cst_204 : f32 to vector<10x64xf32>
    %488 = arith.mulf %487, %486 : vector<10x64xf32>
    %489 = arith.mulf %476, %488 : vector<10x64xf32>
    %c1_205 = arith.constant 1 : index
    %c0_206 = arith.constant 0 : index
    %c0_207 = arith.constant 0 : index
    %490 = vector.load %arg18[%c1_205, %c0_206, %c0_207] : memref<2x64x32xf32, #tpu.memory_space<vmem>>, vector<1x64x32xf32>
    %491 = vector.shape_cast %490 : vector<1x64x32xf32> to vector<64x32xf32>
    %cst_208 = arith.constant dense<0.000000e+00> : vector<10x32xf32>
    %492 = tpu.matmul %489, %491, %cst_208 {dimension_numbers = #tpu.dot_dimension_numbers<[1], [0], [0], [1], [0, 0, 1, 1], [], []>} : vector<10x64xf32>, vector<64x32xf32>, vector<10x32xf32> -> vector<10x32xf32>
    %493 = arith.addf %443, %492 : vector<10x32xf32>
    %c1_209 = arith.constant 1 : index
    %c0_210 = arith.constant 0 : index
    %c0_211 = arith.constant 0 : index
    %494 = vector.load %arg19[%c1_209, %c0_210, %c0_211] : memref<2x1x32xf32, #tpu.memory_space<vmem>>, vector<1x1x32xf32>
    %495 = vector.shape_cast %494 : vector<1x1x32xf32> to vector<1x32xf32>
    %496 = vector.broadcast %495 : vector<1x32xf32> to vector<10x32xf32>
    %497 = arith.addf %493, %496 : vector<10x32xf32>
    %c0_212 = arith.constant 0 : index
    %c0_213 = arith.constant 0 : index
    %498 = vector.load %arg20[%c0_212, %c0_213] : memref<1x32xf32, #tpu.memory_space<vmem>>, vector<1x32xf32>
    %c0_214 = arith.constant 0 : index
    %c0_215 = arith.constant 0 : index
    %499 = vector.load %arg21[%c0_214, %c0_215] : memref<1x32xf32, #tpu.memory_space<vmem>>, vector<1x32xf32>
    %cst_216 = arith.constant dense<0.000000e+00> : vector<10xf32>
    %500 = vector.multi_reduction <add>, %497, %cst_216 [1] : vector<10x32xf32> to vector<10xf32>
    %501 = vector.shape_cast %500 : vector<10xf32> to vector<10x1xf32>
    %cst_217 = arith.constant 3.200000e+01 : f32
    %502 = vector.broadcast %cst_217 : f32 to vector<10x1xf32>
    %503 = arith.divf %501, %502 : vector<10x1xf32>
    %504 = vector.broadcast %503 : vector<10x1xf32> to vector<10x32xf32>
    %505 = arith.subf %497, %504 : vector<10x32xf32>
    %506 = arith.mulf %505, %505 : vector<10x32xf32>
    %cst_218 = arith.constant dense<0.000000e+00> : vector<10xf32>
    %507 = vector.multi_reduction <add>, %506, %cst_218 [1] : vector<10x32xf32> to vector<10xf32>
    %508 = vector.shape_cast %507 : vector<10xf32> to vector<10x1xf32>
    %cst_219 = arith.constant 3.200000e+01 : f32
    %509 = vector.broadcast %cst_219 : f32 to vector<10x1xf32>
    %510 = arith.divf %508, %509 : vector<10x1xf32>
    %511 = vector.broadcast %503 : vector<10x1xf32> to vector<10x32xf32>
    %512 = arith.subf %497, %511 : vector<10x32xf32>
    %cst_220 = arith.constant 9.99999997E-7 : f32
    %513 = vector.broadcast %cst_220 : f32 to vector<10x1xf32>
    %514 = arith.addf %510, %513 : vector<10x1xf32>
    %515 = math.rsqrt %514 : vector<10x1xf32>
    %516 = vector.broadcast %515 : vector<10x1xf32> to vector<10x32xf32>
    %517 = arith.mulf %512, %516 : vector<10x32xf32>
    %518 = vector.broadcast %498 : vector<1x32xf32> to vector<10x32xf32>
    %519 = arith.mulf %517, %518 : vector<10x32xf32>
    %520 = vector.broadcast %499 : vector<1x32xf32> to vector<10x32xf32>
    %521 = arith.addf %519, %520 : vector<10x32xf32>
    %c0_221 = arith.constant 0 : index
    %c0_222 = arith.constant 0 : index
    %522 = vector.load %arg22[%c0_221, %c0_222] : memref<10x32xf32, #tpu.memory_space<vmem>>, vector<10x32xf32>
    tpu.vector_store %arg22[%c0_221, %c0_222], %521 {strides = array<i32>} : memref<10x32xf32, #tpu.memory_space<vmem>>, vector<10x32xf32>,
    return
  }
}

</mosaic_0001>

<bundles_post_ra>
// kernel: tpu_custom_call.1
= control target key start
LH: loop header
LB: loop body
LE: loop exit
PB: predicated region body
PF: predicated region fallthrough
CT: control target
= control target key end

     0   :  { %s4511_s0 = inlined_call_operand.vmem [shape: f32[10,768], index: 0, kind: input, shape index: {}]   ;;  %s4512_s1 = inlined_call_operand.vmem [shape: f32[768,32], index: 1, kind: input, shape index: {}]   ;;  %s4513_s2 = inlined_call_operand.vmem [shape: f32[10,32], index: 2, kind: input, shape index: {}]   ;;  %s4514_s3 = inlined_call_operand.vmem [shape: f32[10,10], index: 3, kind: input, shape index: {}]   ;;  %s4515_s4 = inlined_call_operand.vmem [shape: f32[2,1,32], index: 4, kind: input, shape index: {}]   ;;  %s4516_s5 = inlined_call_operand.vmem [shape: f32[2,1,32], index: 5, kind: input, shape index: {}]   ;;  %s4517_s6 = inlined_call_operand.vmem [shape: f32[2,4,32,8], index: 6, kind: input, shape index: {}]   ;;  %s4518_s7 = inlined_call_operand.vmem [shape: f32[2,4,1,8], index: 7, kind: input, shape index: {}]   ;;  %s4519_s8 = inlined_call_operand.vmem [shape: f32[2,4,32,8], index: 8, kind: input, shape index: {}]   ;;  %s4520_s9 = inlined_call_operand.vmem [shape: f32[2,4,1,8], index: 9, kind: input, shape index: {}]   ;;  %s4521_s10 = inlined_call_operand.vmem [shape: f32[2,4,32,8], index: 10, kind: input, shape index: {}]   ;;  %s4522_s11 = inlined_call_operand.vmem [shape: f32[2,4,1,8], index: 11, kind: input, shape index: {}]   ;;  %s4523_s12 = inlined_call_operand.vmem [shape: f32[2,4,8,32], index: 12, kind: input, shape index: {}]   ;;  %s4524_s13 = inlined_call_operand.vmem [shape: f32[2,1,32], index: 13, kind: input, shape index: {}]   ;;  %s4525_s14 = inlined_call_operand.vmem [shape: f32[2,1,32], index: 14, kind: input, shape index: {}]   ;;  %s4526_s15 = inlined_call_operand.vmem [shape: f32[2,1,32], index: 15, kind: input, shape index: {}]   ;;  %s4527_s16 = inlined_call_operand.vmem [shape: f32[2,32,64], index: 16, kind: input, shape index: {}]   ;;  %s4528_s17 = inlined_call_operand.vmem [shape: f32[2,1,64], index: 17, kind: input, shape index: {}]   ;;  %s4529_s18 = inlined_call_operand.vmem [shape: f32[2,64,32], index: 18, kind: input, shape index: {}]   ;;  %s4530_s19 = inlined_call_operand.vmem [shape: f32[2,1,32], index: 19, kind: input, shape index: {}]   ;;  %s4531_s20 = inlined_call_operand.vmem [shape: f32[1,32], index: 20, kind: input, shape index: {}]   ;;  %s4532_s21 = inlined_call_operand.vmem [shape: f32[1,32], index: 21, kind: input, shape index: {}]   ;;  %s4533_s22 = inlined_call_operand.hbm [shape: f32[10,32], index: 22, kind: output, shape index: {}]  }
   0x1   :  { %4541 = sst [smem:[#allocation5_spill]] %s4511_s0 }
   0x2   :  { %4542 = sst [smem:[#allocation6_spill]] %s4512_s1 }
   0x3   :  { %4543 = sst [smem:[#allocation7_spill]] %s4513_s2 }
   0x4   :  { %4544 = sst [smem:[#allocation8_spill]] %s4514_s3 }
   0x5   :  { %4545 = sst [smem:[#allocation9_spill]] %s4515_s4 }
   0x6   :  { %4546 = sst [smem:[#allocation10_spill]] %s4516_s5 }
   0x7   :  { %4547 = sst [smem:[#allocation11_spill]] %s4517_s6 }
   0x8   :  { %s4548_s29 = sld [smem:[#allocation6_spill]] }
   0x9   :  { %s4549_s25 = sld [smem:[#allocation5_spill]] }
   0xe   :  { %v101_v0 = vld [vmem:[%s4548_s29 + $0x78] sm:$0xff]  ;;  %v100_v1 = vld [vmem:[%s4548_s29 + $0x70] sm:$0xff]  ;;  %v99_v4 = vld [vmem:[%s4548_s29 + $0x68] sm:$0xff] }
   0xf   :  { %v117_v2 = vld [vmem:[%s4548_s29 + $0xf8] sm:$0xff]  ;;  %184 = vmatpush.msra.mxu0 %v101_v0  ;;  %v116_v3 = vld [vmem:[%s4548_s29 + $0xf0] sm:$0xff]  ;;  %v115_v5 = vld [vmem:[%s4548_s29 + $0xe8] sm:$0xff] }
  0x10   :  { %207 = vmatpush.msra.mxu1 %v117_v2  ;;  %v98_v6 = vld [vmem:[%s4548_s29 + $0x60] sm:$0xff]  ;;  %v133_v8 = vld [vmem:[%s4548_s29 + $0x178] sm:$0xff]  ;;  %v132_v9 = vld [vmem:[%s4548_s29 + $0x170] sm:$0xff] }
  0x11   :  { %185 = vmatpush.msra.mxu0 %v100_v1  ;;  %v114_v7 = vld [vmem:[%s4548_s29 + $0xe0] sm:$0xff]  ;;  %v149_v10 = vld [vmem:[%s4548_s29 + $0x1f8] sm:$0xff]  ;;  %230 = vmatpush.msra.mxu2 %v133_v8  ;;  %v131_v13 = vld [vmem:[%s4548_s29 + $0x168] sm:$0xff] }
  0x12   :  { %208 = vmatpush.msra.mxu1 %v116_v3  ;;  %v97_v11 = vld [vmem:[%s4548_s29 + $0x58] sm:$0xff]  ;;  %253 = vmatpush.msra.mxu3 %v149_v10  ;;  %v148_v14 = vld [vmem:[%s4548_s29 + $0x1f0] sm:$0xff]  ;;  %v147_v17 = vld [vmem:[%s4548_s29 + $0x1e8] sm:$0xff] }
  0x13   :  { %186 = vmatpush.msra.mxu0 %v99_v4  ;;  %v113_v12 = vld [vmem:[%s4548_s29 + $0xd8] sm:$0xff]  ;;  %v96_v15 = vld [vmem:[%s4548_s29 + $0x50] sm:$0xff]  ;;  %231 = vmatpush.msra.mxu2 %v132_v9  ;;  %v130_v18 = vld [vmem:[%s4548_s29 + $0x160] sm:$0xff] }
  0x14   :  { %209 = vmatpush.msra.mxu1 %v115_v5  ;;  %v112_v16 = vld [vmem:[%s4548_s29 + $0xd0] sm:$0xff]  ;;  %254 = vmatpush.msra.mxu3 %v148_v14  ;;  %v146_v19 = vld [vmem:[%s4548_s29 + $0x1e0] sm:$0xff]  ;;  %v95_v20 = vld [vmem:[%s4548_s29 + $0x48] sm:$0xff] }
  0x15   :  { %187 = vmatpush.msra.mxu0 %v98_v6  ;;  %v111_v21 = vld [vmem:[%s4548_s29 + $0xc8] sm:$0xff]  ;;  %232 = vmatpush.msra.mxu2 %v131_v13  ;;  %v129_v22 = vld [vmem:[%s4548_s29 + $0x158] sm:$0xff]  ;;  %v94_v24 = vld [vmem:[%s4548_s29 + $0x40] sm:$0xff] }
  0x16   :  { %210 = vmatpush.msra.mxu1 %v114_v7  ;;  %255 = vmatpush.msra.mxu3 %v147_v17  ;;  %v145_v23 = vld [vmem:[%s4548_s29 + $0x1d8] sm:$0xff]  ;;  %v110_v25 = vld [vmem:[%s4548_s29 + $0xc0] sm:$0xff]  ;;  %v128_v26 = vld [vmem:[%s4548_s29 + $0x150] sm:$0xff] }
  0x17   :  { %188 = vmatpush.msra.mxu0 %v97_v11  ;;  %233 = vmatpush.msra.mxu2 %v130_v18  ;;  %v144_v27 = vld [vmem:[%s4548_s29 + $0x1d0] sm:$0xff]  ;;  %v93_v28 = vld [vmem:[%s4548_s29 + $0x38] sm:$0xff]  ;;  %v127_v30 = vld [vmem:[%s4548_s29 + $0x148] sm:$0xff] }
  0x18   :  { %211 = vmatpush.msra.mxu1 %v113_v12  ;;  %256 = vmatpush.msra.mxu3 %v146_v19  ;;  %v109_v29 = vld [vmem:[%s4548_s29 + $0xb8] sm:$0xff]  ;;  %v143_v31 = vld [vmem:[%s4548_s29 + $0x1c8] sm:$0xff]  ;;  %v92_v32 = vld [vmem:[%s4548_s29 + $0x30] sm:$0xff] }
  0x19   :  { %189 = vmatpush.msra.mxu0 %v96_v15  ;;  %234 = vmatpush.msra.mxu2 %v129_v22  ;;  %v108_v33 = vld [vmem:[%s4548_s29 + $0xb0] sm:$0xff]  ;;  %v126_v34 = vld [vmem:[%s4548_s29 + $0x140] sm:$0xff]  ;;  %v91_v36 = vld [vmem:[%s4548_s29 + $0x28] sm:$0xff] }
  0x1a   :  { %212 = vmatpush.msra.mxu1 %v112_v16  ;;  %257 = vmatpush.msra.mxu3 %v145_v23  ;;  %v142_v35 = vld [vmem:[%s4548_s29 + $0x1c0] sm:$0xff]  ;;  %v107_v37 = vld [vmem:[%s4548_s29 + $0xa8] sm:$0xff]  ;;  %v125_v38 = vld [vmem:[%s4548_s29 + $0x138] sm:$0xff] }
  0x1b   :  { %190 = vmatpush.msra.mxu0 %v95_v20  ;;  %235 = vmatpush.msra.mxu2 %v128_v26  ;;  %v141_v39 = vld [vmem:[%s4548_s29 + $0x1b8] sm:$0xff]  ;;  %v90_v40 = vld [vmem:[%s4548_s29 + $0x20] sm:$0xff]  ;;  %v124_v42 = vld [vmem:[%s4548_s29 + $0x130] sm:$0xff] }
  0x1c   :  { %213 = vmatpush.msra.mxu1 %v111_v21  ;;  %258 = vmatpush.msra.mxu3 %v144_v27  ;;  %v106_v41 = vld [vmem:[%s4548_s29 + $0xa0] sm:$0xff]  ;;  %v140_v43 = vld [vmem:[%s4548_s29 + $0x1b0] sm:$0xff]  ;;  %v89_v44 = vld [vmem:[%s4548_s29 + $0x18] sm:$0xff] }
  0x1d   :  { %191 = vmatpush.msra.mxu0 %v94_v24  ;;  %236 = vmatpush.msra.mxu2 %v127_v30  ;;  %v105_v45 = vld [vmem:[%s4548_s29 + $0x98] sm:$0xff]  ;;  %v123_v46 = vld [vmem:[%s4548_s29 + $0x128] sm:$0xff]  ;;  %v88_v48 = vld [vmem:[%s4548_s29 + $0x10] sm:$0xff] }
  0x1e   :  { %214 = vmatpush.msra.mxu1 %v110_v25  ;;  %259 = vmatpush.msra.mxu3 %v143_v31  ;;  %v139_v47 = vld [vmem:[%s4548_s29 + $0x1a8] sm:$0xff]  ;;  %v104_v49 = vld [vmem:[%s4548_s29 + $0x90] sm:$0xff]  ;;  %v122_v50 = vld [vmem:[%s4548_s29 + $0x120] sm:$0xff] }
  0x1f   :  { %192 = vmatpush.msra.mxu0 %v93_v28  ;;  %237 = vmatpush.msra.mxu2 %v126_v34  ;;  %v138_v51 = vld [vmem:[%s4548_s29 + $0x1a0] sm:$0xff]  ;;  %v87_v52 = vld [vmem:[%s4548_s29 + $0x8] sm:$0xff]  ;;  %v121_v54 = vld [vmem:[%s4548_s29 + $0x118] sm:$0xff] }
  0x20   :  { %215 = vmatpush.msra.mxu1 %v109_v29  ;;  %260 = vmatpush.msra.mxu3 %v142_v35  ;;  %v103_v53 = vld [vmem:[%s4548_s29 + $0x88] sm:$0xff]  ;;  %v137_v55 = vld [vmem:[%s4548_s29 + $0x198] sm:$0xff]  ;;  %v86_v56 = vld [vmem:[%s4548_s29] sm:$0xff] }
  0x21   :  { %193 = vmatpush.msra.mxu0 %v92_v32  ;;  %238 = vmatpush.msra.mxu2 %v125_v38  ;;  %v102_v57 = vld [vmem:[%s4548_s29 + $0x80] sm:$0xff]  ;;  %v165_v58 = vld [vmem:[%s4548_s29 + $0x278] sm:$0xff]  ;;  %v120_v60 = vld [vmem:[%s4548_s29 + $0x110] sm:$0xff] }
  0x22   :  { %216 = vmatpush.msra.mxu1 %v108_v33  ;;  %261 = vmatpush.msra.mxu3 %v141_v39  ;;  %v181_v59 = vld [vmem:[%s4548_s29 + $0x2f8] sm:$0xff]  ;;  %v136_v61 = vld [vmem:[%s4548_s29 + $0x190] sm:$0xff]  ;;  %v119_v0 = vld [vmem:[%s4548_s29 + $0x108] sm:$0xff] }
  0x23   :  { %194 = vmatpush.msra.mxu0 %v91_v36  ;;  %239 = vmatpush.msra.mxu2 %v124_v42  ;;  %v164_v62 = vld [vmem:[%s4548_s29 + $0x270] sm:$0xff]  ;;  %v135_v1 = vld [vmem:[%s4548_s29 + $0x188] sm:$0xff]  ;;  %v162_v3 = vld [vmem:[%s4548_s29 + $0x260] sm:$0xff] }
  0x24   :  { %217 = vmatpush.msra.mxu1 %v107_v37  ;;  %262 = vmatpush.msra.mxu3 %v140_v43  ;;  %v180_v63 = vld [vmem:[%s4548_s29 + $0x2f0] sm:$0xff]  ;;  %v163_v2 = vld [vmem:[%s4548_s29 + $0x268] sm:$0xff]  ;;  %v178_v5 = vld [vmem:[%s4548_s29 + $0x2e0] sm:$0xff] }
  0x25   :  { %195 = vmatpush.msra.mxu0 %v90_v40  ;;  %240 = vmatpush.msra.mxu2 %v123_v46  ;;  %v179_v4 = vld [vmem:[%s4548_s29 + $0x2e8] sm:$0xff]  ;;  %v118_v6 = vld [vmem:[%s4548_s29 + $0x100] sm:$0xff]  ;;  %v161_v8 = vld [vmem:[%s4548_s29 + $0x258] sm:$0xff] }
  0x26   :  { %218 = vmatpush.msra.mxu1 %v106_v41  ;;  %263 = vmatpush.msra.mxu3 %v139_v47  ;;  %v134_v7 = vld [vmem:[%s4548_s29 + $0x180] sm:$0xff]  ;;  %v177_v9 = vld [vmem:[%s4548_s29 + $0x2d8] sm:$0xff]  ;;  %v76_v10 = vld [vmem:[%s4549_s25 + $0x10] sm:$0xff] }
  0x27   :  { %196 = vmatpush.msra.mxu0 %v89_v44  ;;  %241 = vmatpush.msra.mxu2 %v122_v50  ;;  %v74_v11 = vld [vmem:[%s4549_s25] sm:$0xff]  ;;  %v77_v12 = vld [vmem:[%s4549_s25 + $0x18] sm:$0xff]  ;;  %v75_v13 = vld [vmem:[%s4549_s25 + $0x8] sm:$0xff] }
  0x28   :  { %219 = vmatpush.msra.mxu1 %v105_v45  ;;  %264 = vmatpush.msra.mxu3 %v138_v51  ;;  %v160_v14 = vld [vmem:[%s4548_s29 + $0x250] sm:$0xff]  ;;  %v159_v15 = vld [vmem:[%s4548_s29 + $0x248] sm:$0xff]  ;;  %v158_v18 = vld [vmem:[%s4548_s29 + $0x240] sm:$0xff] }
  0x29   :  { %197 = vmatpush.msra.mxu0 %v88_v48  ;;  %242 = vmatpush.msra.mxu2 %v121_v54  ;;  %v176_v16 = vld [vmem:[%s4548_s29 + $0x2d0] sm:$0xff]  ;;  %v175_v17 = vld [vmem:[%s4548_s29 + $0x2c8] sm:$0xff]  ;;  %v174_v19 = vld [vmem:[%s4548_s29 + $0x2c0] sm:$0xff] }
  0x2a   :  { %220 = vmatpush.msra.mxu1 %v104_v49  ;;  %265 = vmatpush.msra.mxu3 %v137_v55  ;;  %v82_v20 = vld [vmem:[%s4549_s25 + $0x40] sm:$0x3]  ;;  %v80_v21 = vld [vmem:[%s4549_s25 + $0x30] sm:$0x3]  ;;  %v157_v22 = vld [vmem:[%s4548_s29 + $0x238] sm:$0xff] }
  0x2b   :  { %198 = vmatpush.msra.mxu0 %v87_v52  ;;  %243 = vmatpush.msra.mxu2 %v120_v60  ;;  %v173_v23 = vld [vmem:[%s4548_s29 + $0x2b8] sm:$0xff]  ;;  %v83_v24 = vld [vmem:[%s4549_s25 + $0x48] sm:$0x3]  ;;  %v156_v26 = vld [vmem:[%s4548_s29 + $0x230] sm:$0xff] }
  0x2c   :  { %221 = vmatpush.msra.mxu1 %v103_v53  ;;  %266 = vmatpush.msra.mxu3 %v136_v61  ;;  %v81_v25 = vld [vmem:[%s4549_s25 + $0x38] sm:$0x3]  ;;  %v172_v27 = vld [vmem:[%s4548_s29 + $0x2b0] sm:$0xff]  ;;  %v155_v28 = vld [vmem:[%s4548_s29 + $0x228] sm:$0xff] }
  0x2d   :  { %199 = vmatpush.msra.mxu0 %v86_v56  ;;  %244 = vmatpush.msra.mxu2 %v119_v0  ;;  %v171_v29 = vld [vmem:[%s4548_s29 + $0x2a8] sm:$0xff] }
  0x2e   :  { %222 = vmatpush.msra.mxu1 %v102_v57  ;;  %267 = vmatpush.msra.mxu3 %v135_v1 }
  0x2f   :  { %276 = vmatpush.msrb.mxu0 %v165_v58  ;;  %245 = vmatpush.msra.mxu2 %v118_v6 }
  0x30   :  { %299 = vmatpush.msrb.mxu1 %v181_v59  ;;  %268 = vmatpush.msra.mxu3 %v134_v7 }
  0x31   :  { %277 = vmatpush.msrb.mxu0 %v164_v62  ;;  %246 = vmatmul.f32.vlgmr.msra.gmra.mxu2 %v76_v10 }
  0x32   :  { %300 = vmatpush.msrb.mxu1 %v180_v63  ;;  %200 = vmatmul.f32.vlgmr.msra.gmra.mxu0 %v74_v11 }
  0x33   :  { %278 = vmatpush.msrb.mxu0 %v163_v2  ;;  %269 = vmatmul.f32.vlgmr.msra.gmra.mxu3 %v77_v12 }
  0x34   :  { %301 = vmatpush.msrb.mxu1 %v179_v4 }
  0x35   :  { %279 = vmatpush.msrb.mxu0 %v162_v3  ;;  %223 = vmatmul.f32.vlgmr.msra.gmra.mxu1 %v75_v13 }
  0x36   :  { %302 = vmatpush.msrb.mxu1 %v178_v5 }
  0x37   :  { %280 = vmatpush.msrb.mxu0 %v161_v8 }
  0x38   :  { %303 = vmatpush.msrb.mxu1 %v177_v9 }
  0x39   :  { %281 = vmatpush.msrb.mxu0 %v160_v14  ;;  %249 = vmatmul.f32.gmra.mxu2 %v82_v20 }
  0x3a   :  { %304 = vmatpush.msrb.mxu1 %v176_v16  ;;  %203 = vmatmul.f32.gmra.mxu0 %v80_v21 }
  0x3b   :  { %282 = vmatpush.msrb.mxu0 %v159_v15  ;;  %272 = vmatmul.f32.gmra.mxu3 %v83_v24 }
  0x3c   :  { %305 = vmatpush.msrb.mxu1 %v175_v17 }
  0x3d   :  { %283 = vmatpush.msrb.mxu0 %v158_v18  ;;  %226 = vmatmul.f32.gmra.mxu1 %v81_v25 }
  0x3e   :  { %306 = vmatpush.msrb.mxu1 %v174_v19 }
  0x3f   :  { %284 = vmatpush.msrb.mxu0 %v157_v22 }
  0x40   :  { %307 = vmatpush.msrb.mxu1 %v173_v23 }
  0x41   :  { %27 = vsyncpa [#allocation3], 0  ;;  %285 = vmatpush.msrb.mxu0 %v156_v26  ;;  %v154_v30 = vld [vmem:[%s4548_s29 + $0x220] sm:$0xff]  ;;  %v153_v32 = vld [vmem:[%s4548_s29 + $0x218] sm:$0xff]  ;;  %s4550_s27 = sld [smem:[#allocation7_spill]]  ;;  %vm324_vm0 = vcmask 261120  }
  0x42   :  { %308 = vmatpush.msrb.mxu1 %v172_v27  ;;  %v170_v31 = vld [vmem:[%s4548_s29 + $0x2a0] sm:$0xff]  ;;  %v169_v33 = vld [vmem:[%s4548_s29 + $0x298] sm:$0xff]  ;;  %v152_v34 = vld [vmem:[%s4548_s29 + $0x210] sm:$0xff]  ;;  %vm328_vm1 = vcmask 254976   ;;  %v3169_v8 = vmov 32.0   ;;  %s4551_s4 = sld [smem:[#allocation11_spill]] }
  0x43   :  { %286 = vmatpush.msrb.mxu0 %v155_v28  ;;  %v168_v35 = vld [vmem:[%s4548_s29 + $0x290] sm:$0xff]  ;;  %v151_v36 = vld [vmem:[%s4548_s29 + $0x208] sm:$0xff]  ;;  %v150_v38 = vld [vmem:[%s4548_s29 + $0x200] sm:$0xff]  ;;  %3047 = vrcp.f32 %v3169_v8  ;;  %s4552_s24 = sld [smem:[#allocation9_spill]]  ;;  %vm535_vm9 = vcmask 64512   ;;  %vm627_vm10 = vcmask 1041408  }
  0x44   :  { %309 = vmatpush.msrb.mxu1 %v171_v29  ;;  %v167_v37 = vld [vmem:[%s4548_s29 + $0x288] sm:$0xff]  ;;  %v166_v39 = vld [vmem:[%s4548_s29 + $0x280] sm:$0xff]  ;;  %v84_v42 = vld [vmem:[%s4549_s25 + $0x50] sm:$0x3]  ;;  %s4553_s26 = sld [smem:[#allocation10_spill]]  ;;  %vm571_vm11 = vcmask 80896  }
  0x45   :  { %287 = vmatpush.msrb.mxu0 %v154_v30  ;;  %v78_v40 = vld [vmem:[%s4549_s25 + $0x20] sm:$0xff]  ;;  %v79_v41 = vld [vmem:[%s4549_s25 + $0x28] sm:$0xff]  ;;  %v85_v43 = vld [vmem:[%s4549_s25 + $0x58] sm:$0x3]  ;;  %s4554_s3 = sld [smem:[#allocation8_spill]]  ;;  %vm575_vm12 = vcmask 74752  }
  0x46   :  { %310 = vmatpush.msrb.mxu1 %v170_v31  ;;  %v410_v26 = vld [vmem:[%s4519_s8 + $0x18] sm:$0xff]  ;;  %v409_v29 = vld [vmem:[%s4519_s8 + $0x10] sm:$0xff] }
  0x47   :  { %288 = vmatpush.msrb.mxu0 %v153_v32  ;;  %v182_v46 = vld [vmem:[%s4550_s27] sm:$0xff]  ;;  %v183_v52 = vld [vmem:[%s4550_s27 + $0x8] sm:$0x3]  ;;  %498 = vmatpush.msrb.mxu3 %v410_v26 }
  0x48   :  { %311 = vmatpush.msrb.mxu1 %v169_v33  ;;  %v390_v25 = vld [vmem:[%s4551_s4 + $0x18] sm:$0xff]  ;;  %v389_v28 = vld [vmem:[%s4551_s4 + $0x10] sm:$0xff]  ;;  %v388_v31 = vld [vmem:[%s4551_s4 + $0x8] sm:$0xff] }
  0x49   :  { %289 = vmatpush.msrb.mxu0 %v152_v34  ;;  %v3048_v9 = vpop.eup %3047  ;;  %v394_v27 = vld [vmem:[%s4551_s4 + $0x38] sm:$0xff]  ;;  %472 = vmatpush.msrb.mxu2 %v390_v25  ;;  %v393_v30 = vld [vmem:[%s4551_s4 + $0x30] sm:$0xff]  ;;  %v408_v32 = vld [vmem:[%s4519_s8 + $0x8] sm:$0xff] }
  0x4a   :  { %312 = vmatpush.msrb.mxu1 %v168_v35  ;;  %v333_v10 = vmul.f32 32.0, %v3048_v9  ;;  %vm337_vm2 = vweird.f32 %v3048_v9  ;;  %499 = vmatpush.msrb.mxu3 %v409_v29  ;;  %v392_v33 = vld [vmem:[%s4551_s4 + $0x28] sm:$0xff]  ;;  %v387_v34 = vld [vmem:[%s4551_s4] sm:$0xff] }
  0x4b   :  { %290 = vmatpush.msrb.mxu0 %v151_v36  ;;  %473 = vmatpush.msrb.mxu2 %v389_v28  ;;  %v407_v35 = vld [vmem:[%s4519_s8] sm:$0xff] }
  0x4c   :  { %313 = vmatpush.msrb.mxu1 %v167_v37  ;;  %v334_v11 = vsub.f32 1.0, %v333_v10  ;;  %500 = vmatpush.msrb.mxu3 %v408_v32  ;;  %v391_v36 = vld [vmem:[%s4551_s4 + $0x20] sm:$0xff] }
  0x4d   :  { %291 = vmatpush.msrb.mxu0 %v150_v38  ;;  %474 = vmatpush.msrb.mxu2 %v388_v31  ;;  %v431_v25 = vld [vmem:[%s4521_s10 + $0x20] sm:$0xff] }
  0x4e   :  { %314 = vmatpush.msrb.mxu1 %v166_v39  ;;  %292 = vmatmul.f32.vlgmr.msrb.gmra.mxu0 %v78_v40  ;;  %v335_v12 = vmul.f32 %v3048_v9, %v334_v11  ;;  %v430_v40 = vld [vmem:[%s4521_s10 + $0x18] sm:$0xff]  ;;  %v3012_v26 = vld [vmem:[%s4522_s11] ss:$0 sm:$0xff]  ;;  %v3013_v32 = vld [vmem:[%s4520_s9 + $0x1] ss:$0 sm:$0xff] }
  0x4f   :  { %315 = vmatmul.f32.vlgmr.msrb.gmra.mxu1 %v79_v41  ;;  %475 = vmatpush.msrb.mxu2 %v387_v34  ;;  %v429_v41 = vld [vmem:[%s4521_s10 + $0x10] sm:$0xff] }
  0x50   :  { %v336_v13 = vadd.f32 %v3048_v9, %v335_v12  ;;  %669 = vmatpush.msra.mxu1 %v394_v27  ;;  %501 = vmatpush.msrb.mxu3 %v407_v35 }
  0x51   :  { %524 = vmatpush.msra.mxu2 %v430_v40  ;;  %v3781_v40 = vld [vmem:[%s4554_s3 + $0x8] sm:$0x3] }
  0x52   :  { %v3626_v14 = vsel %vm337_vm2, %v3048_v9, %v336_v13  ;;  %670 = vmatpush.msra.mxu1 %v393_v30  ;;  %v411_v9 = vld [vmem:[%s4519_s8 + $0x20] sm:$0xff] }
  0x53   :  { %525 = vmatpush.msra.mxu2 %v429_v41  ;;  %v3011_v13 = vld [vmem:[%s4520_s9] ss:$0 sm:$0xff] }
  0x54   :  { %671 = vmatpush.msra.mxu1 %v392_v33 }
  0x56   :  { %295 = vmatmul.f32.gmra.mxu0 %v84_v42  ;;  %672 = vmatpush.msra.mxu1 %v391_v36  ;;  %v3774_v36 = vld [vmem:[%s4554_s3] sm:$0xff] }
  0x57   :  { %318 = vmatmul.f32.gmra.mxu1 %v85_v43  ;;  %v428_v43 = vld [vmem:[%s4521_s10 + $0x8] sm:$0xff] }
  0x58   :  { %526 = vmatpush.msra.mxu2 %v428_v43 }
  0xaf   :  { %v201_v44 = vpop.f32.mrf.mxu0 }
  0xb0   :  { %v202_v47 = vadd.f32 %v201_v44, %v182_v46 }
  0xb2   :  { %v224_v45 = vpop.f32.mrf.mxu1 }
  0xb3   :  { %v225_v51 = vadd.f32 %v224_v45, %v202_v47  ;;  %v427_v45 = vld [vmem:[%s4521_s10] sm:$0xff] }
  0xb4   :  { %v247_v48 = vpop.f32.mrf.mxu2  ;;  %527 = vmatpush.msra.mxu2 %v427_v45  ;;  %v3014_v45 = vld [vmem:[%s4522_s11 + $0x1] ss:$0 sm:$0xff] }
  0xb5   :  { %v248_v54 = vadd.f32 %v247_v48, %v225_v51 }
  0xb6   :  { %v270_v53 = vpop.f32.mrf.mxu3 }
  0xb7   :  { %v204_v49 = vpop.f32.mrf.mxu0  ;;  %v271_v56 = vadd.f32 %v270_v53, %v248_v54 }
  0xb8   :  { %v205_v55 = vadd.f32 %v204_v49, %v183_v52 }
  0xba   :  { %v227_v50 = vpop.f32.mrf.mxu1 }
  0xbb   :  { %v228_v57 = vadd.f32 %v227_v50, %v205_v55  ;;  %v3007_v55 = vld [vmem:[%s4552_s24] ss:$0 sm:$0xff] }
  0xbc   :  { %v250_v58 = vpop.f32.mrf.mxu2 }
  0xbd   :  { %v251_v62 = vadd.f32 %v250_v58, %v228_v57  ;;  %v3008_v58 = vld [vmem:[%s4553_s26] ss:$0 sm:$0xff] }
  0xbe   :  { %v273_v0 = vpop.f32.mrf.mxu3 }
  0xbf   :  { %v274_v2 = vadd.f32 %v273_v0, %v251_v62 }
  0xcb   :  { %v293_v59 = vpop.f32.mrf.mxu0 }
  0xcc   :  { %v316_v60 = vpop.f32.mrf.mxu1  ;;  %v294_v61 = vadd.f32 %v293_v59, %v271_v56 }
  0xce   :  { %v3618_v63 = vadd.f32 %v316_v60, %v294_v61 }
  0xd0   :  { %v325_v1 = vsel %vm324_vm0, %v3618_v63, 0.0 }
  0xd1   :  { %326 = vadd.xlane.f32.xlu0 %v325_v1  ;;  %v414_v1 = vld [vmem:[%s4519_s8 + $0x38] sm:$0xff] }
  0xd3   :  { %v296_v3 = vpop.f32.mrf.mxu0 }
  0xd4   :  { %v319_v4 = vpop.f32.mrf.mxu1  ;;  %v297_v5 = vadd.f32 %v296_v3, %v274_v2  ;;  %v413_v3 = vld [vmem:[%s4519_s8 + $0x30] sm:$0xff] }
  0xd6   :  { %v3622_v6 = vadd.f32 %v319_v4, %v297_v5 }
  0xd8   :  { %v329_v7 = vsel %vm328_vm1, %v3622_v6, 0.0 }
  0xd9   :  { %330 = vadd.xlane.f32.xlu0 %v329_v7  ;;  %v412_v7 = vld [vmem:[%s4519_s8 + $0x28] sm:$0xff] }
 0x144   :  { %v327_v15 = vpop.xlane.xlu0 %326 }
 0x145   :  { %v339_v16 = vmul.f32 %v3626_v14, %v327_v15 }
 0x147   :  { %v3630_v17 = vsub.f32 %v3618_v63, %v339_v16 }
 0x149   :  { %v343_v18 = vmul.f32 %v3630_v17, %v3630_v17 }
 0x14b   :  { %v345_v19 = vsel %vm324_vm0, %v343_v18, 0.0  ;;  %v3010_v18 = vld [vmem:[%s4518_s7] ss:$0 sm:$0xff] }
 0x14c   :  { %346 = vadd.xlane.f32.xlu1 %v345_v19  ;;  %v331_v20 = vpop.xlane.xlu0 %330 }
 0x14d   :  { %v340_v21 = vmul.f32 %v3626_v14, %v331_v20  ;;  %v434_v20 = vld [vmem:[%s4521_s10 + $0x38] sm:$0xff] }
 0x14f   :  { %v3637_v22 = vsub.f32 %v3622_v6, %v340_v21 }
 0x151   :  { %v344_v23 = vmul.f32 %v3637_v22, %v3637_v22 }
 0x153   :  { %v348_v24 = vsel %vm328_vm1, %v344_v23, 0.0  ;;  %v433_v23 = vld [vmem:[%s4521_s10 + $0x30] sm:$0xff] }
 0x154   :  { %349 = vadd.xlane.f32.xlu1 %v348_v24  ;;  %v432_v24 = vld [vmem:[%s4521_s10 + $0x28] sm:$0xff] }
 0x1bf   :  { %v347_v37 = vpop.xlane.xlu1 %346 }
 0x1c0   :  { %v351_v38 = vmul.f32 %v347_v37, %v3626_v14 }
 0x1c2   :  { %v353_v39 = vadd.f32 1e-06, %v351_v38 }
 0x1c4   :  { %3049 = vrsqrt.f32 %v353_v39  ;;  %vm361_vm4 = vweird.f32 %v353_v39 }
 0x1c7   :  { %v350_v42 = vpop.xlane.xlu1 %349 }
 0x1c8   :  { %v352_v44 = vmul.f32 %v350_v42, %v3626_v14 }
 0x1ca   :  { %v3050_v46 = vpop.eup %3049  ;;  %v354_v47 = vadd.f32 1e-06, %v352_v44 }
 0x1cb   :  { %v356_v48 = vmul.f32 %v3050_v46, %v353_v39  ;;  %vm362_vm3 = vweird.f32 %v3050_v46 }
 0x1cc   :  { %3051 = vrsqrt.f32 %v354_v47  ;;  %vm363_vm5 = vmor %vm361_vm4, %vm362_vm3  ;;  %vm371_vm7 = vweird.f32 %v354_v47 }
 0x1cd   :  { %v357_v49 = vmul.f32 %v3050_v46, %v356_v48 }
 0x1cf   :  { %v358_v50 = vmul.f32 0.5, %v357_v49 }
 0x1d1   :  { %v359_v51 = vsub.f32 1.5, %v358_v50 }
 0x1d2   :  { %v3052_v52 = vpop.eup %3051 }
 0x1d3   :  { %v360_v53 = vmul.f32 %v3050_v46, %v359_v51  ;;  %v366_v54 = vmul.f32 %v3052_v52, %v354_v47  ;;  %vm372_vm6 = vweird.f32 %v3052_v52 }
 0x1d4   :  { %vm373_vm8 = vmor %vm371_vm7, %vm372_vm6 }
 0x1d5   :  { %v364_v56 = vsel %vm363_vm5, %v3050_v46, %v360_v53  ;;  %v367_v57 = vmul.f32 %v3052_v52, %v366_v54 }
 0x1d6   :  { %v375_v59 = vmul.f32 %v364_v56, %v3630_v17 }
 0x1d7   :  { %v368_v60 = vmul.f32 0.5, %v367_v57 }
 0x1d8   :  { %v380_v61 = vmul.f32 %v3007_v55, %v375_v59 }
 0x1d9   :  { %v369_v62 = vsub.f32 1.5, %v368_v60 }
 0x1da   :  { %v3699_v0 = vadd.f32 %v3008_v58, %v380_v61 }
 0x1db   :  { %v370_v2 = vmul.f32 %v3052_v52, %v369_v62 }
 0x1dc   :  { %2792 = vmatmul.msk.f32.vlgmr.msrb.gmra.mxu2 %vm324_vm0, %v3699_v0  ;;  %2794 = vmatmul.msk.f32.vlgmr.msrb.gmra.mxu3 %vm324_vm0, %v3699_v0 }
 0x1dd   :  { %v374_v4 = vsel %vm373_vm8, %v3052_v52, %v370_v2  ;;  %2805 = vmatmul.msk.f32.vlgmr.msra.gmra.mxu1 %vm324_vm0, %v3699_v0  ;;  %695 = vmatpush.msrb.mxu2 %v414_v1 }
 0x1de   :  { %v376_v5 = vmul.f32 %v374_v4, %v3637_v22 }
 0x1df   :  { %696 = vmatpush.msrb.mxu2 %v413_v3 }
 0x1e0   :  { %v381_v8 = vmul.f32 %v3007_v55, %v376_v5 }
 0x1e1   :  { %697 = vmatpush.msrb.mxu2 %v412_v7 }
 0x1e2   :  { %v3720_v10 = vadd.f32 %v3008_v58, %v381_v8 }
 0x1e3   :  { %698 = vmatpush.msrb.mxu2 %v411_v9 }
 0x1e4   :  { %2793 = vmatmul.msk.f32.gmra.mxu2 %vm324_vm0, %v3720_v10  ;;  %2795 = vmatmul.msk.f32.gmra.mxu3 %vm324_vm0, %v3720_v10 }
 0x1e5   :  { %2806 = vmatmul.msk.f32.gmra.mxu1 %vm324_vm0, %v3720_v10 }
 0x1ec   :  { %2796 = vmatmul.msk.f32.vlgmr.msra.gmra.mxu2 %vm324_vm0, %v3699_v0 }
 0x1f4   :  { %2797 = vmatmul.msk.f32.gmra.mxu2 %vm324_vm0, %v3720_v10 }
 0x1fc   :  { %2807 = vmatmul.msk.f32.vlgmr.msrb.gmra.mxu2 %vm324_vm0, %v3699_v0 }
 0x204   :  { %2808 = vmatmul.msk.f32.gmra.mxu2 %vm324_vm0, %v3720_v10 }
 0x25f   :  { %v477_v11 = vpop.f32.mrf.mxu2  ;;  %v503_v12 = vpop.f32.mrf.mxu3 }
 0x260   :  { %v504_v19 = vadd.f32 %v3011_v13, %v503_v12  ;;  %v478_v21 = vadd.f32 %v3010_v18, %v477_v11 }
 0x267   :  { %v480_v15 = vpop.f32.mrf.mxu2  ;;  %v506_v16 = vpop.f32.mrf.mxu3 }
 0x268   :  { %v507_v17 = vadd.f32 %v3011_v13, %v506_v16  ;;  %v481_v27 = vadd.f32 %v3010_v18, %v480_v15  ;;  %v398_v16 = vld [vmem:[%s4551_s4 + $0x58] sm:$0xff] }
 0x26a   :  { %2798 = vmatpush.xpose.msk.msra.mxu3 %vm535_vm9, %v507_v17 }
 0x26e   :  { %2799 = vmatpush.xpose.msk.msra.mxu3 %vm535_vm9, %v504_v19 }
 0x26f   :  { %v529_v22 = vpop.f32.mrf.mxu2 }
 0x270   :  { %v530_v30 = vadd.f32 %v3012_v26, %v529_v22  ;;  %v396_v22 = vld [vmem:[%s4551_s4 + $0x48] sm:$0xff] }
 0x271   :  { %2800 = vmatmul.msk.f32.vlgmr.msra.gmra.mxu3 %vm535_vm9, %v478_v21 }
 0x272   :  { %721 = vmatpush.msrb.mxu3 %v434_v20  ;;  %v397_v20 = vld [vmem:[%s4551_s4 + $0x50] sm:$0xff] }
 0x274   :  { %722 = vmatpush.msrb.mxu3 %v433_v23 }
 0x276   :  { %723 = vmatpush.msrb.mxu3 %v432_v24 }
 0x277   :  { %v532_v28 = vpop.f32.mrf.mxu2 }
 0x278   :  { %724 = vmatpush.msrb.mxu3 %v431_v25  ;;  %v533_v29 = vadd.f32 %v3012_v26, %v532_v28  ;;  %v395_v25 = vld [vmem:[%s4551_s4 + $0x40] sm:$0xff]  ;;  %v674_v28 = vpop.f32.mrf.mxu1 }
 0x279   :  { %2801 = vmatmul.msk.f32.gmra.mxu3 %vm535_vm9, %v481_v27 }
 0x27a   :  { %2802 = vmatpush.msk.msra.mxu0 %vm627_vm10, %v533_v29  ;;  %v3009_v29 = vld [vmem:[%s4518_s7 + $0x1] ss:$0 sm:$0xff] }
 0x27c   :  { %646 = vmatpush.msra.mxu0 %v530_v30  ;;  %v675_v30 = vadd.f32 %v3009_v29, %v674_v28  ;;  %v402_v28 = vld [vmem:[%s4551_s4 + $0x78] sm:$0xff] }
 0x27f   :  { %v700_v31 = vpop.f32.mrf.mxu2 }
 0x280   :  { %v701_v35 = vadd.f32 %v3013_v32, %v700_v31  ;;  %v677_v31 = vpop.f32.mrf.mxu1 }
 0x281   :  { %2809 = vmatmul.msk.f32.vlgmr.msrb.gmra.mxu3 %vm324_vm0, %v3699_v0 }
 0x287   :  { %v703_v33 = vpop.f32.mrf.mxu2 }
 0x288   :  { %v704_v34 = vadd.f32 %v3013_v32, %v703_v33  ;;  %v678_v32 = vadd.f32 %v3009_v29, %v677_v31  ;;  %v447_v33 = vld [vmem:[%s4523_s12] sm:$0xff]  ;;  %v400_v31 = vld [vmem:[%s4551_s4 + $0x68] sm:$0xff] }
 0x289   :  { %2810 = vmatmul.msk.f32.gmra.mxu3 %vm324_vm0, %v3720_v10 }
 0x28a   :  { %2811 = vmatpush.xpose.msk.msrb.mxu0 %vm535_vm9, %v704_v34  ;;  %897 = vmatpush.msra.mxu3 %v447_v33 }
 0x28e   :  { %2812 = vmatpush.xpose.msk.msrb.mxu0 %vm535_vm9, %v701_v35 }
 0x2f4   :  { %v565_v37 = vpop.f32.mrf.mxu3 }
 0x2f5   :  { %v566_v38 = vadd.f32 %v565_v37, %v3774_v36 }
 0x2f7   :  { %v572_v39 = vsel %vm571_vm11, %v566_v38, -inf }
 0x2f8   :  { %573 = vmax.xlane.f32.xlu2 %v572_v39 }
 0x2fc   :  { %v568_v41 = vpop.f32.mrf.mxu3 }
 0x2fd   :  { %v569_v42 = vadd.f32 %v568_v41, %v3781_v40 }
 0x2ff   :  { %v576_v43 = vsel %vm575_vm12, %v569_v42, -inf }
 0x300   :  { %577 = vmax.xlane.f32.xlu2 %v576_v43 }
 0x304   :  { %v726_v44 = vpop.f32.mrf.mxu3 }
 0x305   :  { %v727_v48 = vadd.f32 %v3014_v45, %v726_v44 }
 0x30c   :  { %v729_v46 = vpop.f32.mrf.mxu3 }
 0x30d   :  { %v730_v47 = vadd.f32 %v3014_v45, %v729_v46 }
 0x30f   :  { %2815 = vmatpush.msk.msrb.mxu1 %vm627_vm10, %v730_v47 }
 0x311   :  { %839 = vmatpush.msrb.mxu1 %v727_v48 }
 0x36b   :  { %v574_v49 = vpop.xlane.xlu2 %573 }
 0x36c   :  { %v579_v50 = vsub.f32 %v566_v38, %v574_v49 }
 0x36e   :  { %v581_v51 = vmul.f32 1.442695, %v579_v50 }
 0x370   :  { %3053 = vpow2.f32 %v581_v51 }
 0x373   :  { %v578_v52 = vpop.xlane.xlu2 %577 }
 0x374   :  { %v580_v53 = vsub.f32 %v569_v42, %v578_v52 }
 0x376   :  { %v3054_v54 = vpop.eup %3053  ;;  %v583_v55 = vmul.f32 1.442695, %v580_v53 }
 0x377   :  { %v585_v56 = vsel %vm571_vm11, %v3054_v54, 0.0 }
 0x378   :  { %3055 = vpow2.f32 %v583_v55  ;;  %586 = vadd.xlane.f32.xlu0 %v585_v56  ;;  %v417_v55 = vld [vmem:[%s4519_s8 + $0x50] sm:$0xff]  ;;  %v416_v56 = vld [vmem:[%s4519_s8 + $0x48] sm:$0xff] }
 0x37e   :  { %v3056_v57 = vpop.eup %3055 }
 0x37f   :  { %v588_v58 = vsel %vm575_vm12, %v3056_v57, 0.0 }
 0x380   :  { %589 = vadd.xlane.f32.xlu1 %v588_v58  ;;  %v415_v58 = vld [vmem:[%s4519_s8 + $0x40] sm:$0xff] }
 0x3eb   :  { %v587_v59 = vpop.xlane.xlu0 %586 }
 0x3ec   :  { %3057 = vrcp.f32 %v587_v59  ;;  %v602_v2 = vand.u32 2147483648, %v587_v59  ;;  %v600_v4 = vand.u32 2147483647, %v587_v59  ;;  %vm596_vm14 = vweird.f32 %v587_v59 }
 0x3ee   :  { %v603_v8 = vor.u32 1.1754944e-38, %v602_v2  ;;  %vm601_vm2 = vcmp.eq.f32.partialorder %v600_v4, 8.507059e+37 }
 0x3f2   :  { %v3058_v60 = vpop.eup %3057 }
 0x3f3   :  { %v592_v61 = vmul.f32 %v3058_v60, %v587_v59  ;;  %v590_v62 = vpop.xlane.xlu1 %589  ;;  %vm597_vm13 = vweird.f32 %v3058_v60 }
 0x3f4   :  { %3059 = vrcp.f32 %v590_v62  ;;  %vm598_vm15 = vmor %vm596_vm14, %vm597_vm13  ;;  %v617_v17 = vand.u32 2147483648, %v590_v62  ;;  %v615_v19 = vand.u32 2147483647, %v590_v62  ;;  %vm611_vm4 = vweird.f32 %v590_v62 }
 0x3f5   :  { %v593_v1 = vsub.f32 1.0, %v592_v61 }
 0x3f6   :  { %v618_v23 = vor.u32 1.1754944e-38, %v617_v17  ;;  %vm616_vm6 = vcmp.eq.f32.partialorder %v615_v19, 8.507059e+37 }
 0x3f7   :  { %v594_v3 = vmul.f32 %v3058_v60, %v593_v1 }
 0x3f9   :  { %v595_v5 = vadd.f32 %v3058_v60, %v594_v3 }
 0x3fa   :  { %v3060_v7 = vpop.eup %3059 }
 0x3fb   :  { %v599_v9 = vsel %vm598_vm15, %v3058_v60, %v595_v5  ;;  %v607_v11 = vmul.f32 %v3060_v7, %v590_v62  ;;  %vm612_vm3 = vweird.f32 %v3060_v7 }
 0x3fc   :  { %v604_v12 = vsel %vm601_vm2, %v603_v8, %v599_v9  ;;  %vm613_vm5 = vmor %vm611_vm4, %vm612_vm3 }
 0x3fd   :  { %v608_v13 = vsub.f32 1.0, %v607_v11  ;;  %v605_v15 = vmul.f32 %v3054_v54, %v604_v12  ;;  %v418_v54 = vld [vmem:[%s4519_s8 + $0x58] sm:$0xff] }
 0x3fe   :  { %946 = vmatpush.msra.mxu1 %v418_v54 }
 0x3ff   :  { %v609_v18 = vmul.f32 %v3060_v7, %v608_v13  ;;  %2803 = vmatmul.msk.f32.vlgmr.msra.gmra.mxu0 %vm571_vm11, %v605_v15 }
 0x400   :  { %920 = vmatpush.msra.mxu0 %v398_v16  ;;  %947 = vmatpush.msra.mxu1 %v417_v55 }
 0x401   :  { %v610_v21 = vadd.f32 %v3060_v7, %v609_v18 }
 0x402   :  { %921 = vmatpush.msra.mxu0 %v397_v20  ;;  %948 = vmatpush.msra.mxu1 %v416_v56  ;;  %v3017_v56 = vld [vmem:[%s4522_s11 + $0x2] ss:$0 sm:$0xff] }
 0x403   :  { %v614_v24 = vsel %vm613_vm5, %v3060_v7, %v610_v21 }
 0x404   :  { %v619_v26 = vsel %vm616_vm6, %v618_v23, %v614_v24  ;;  %922 = vmatpush.msra.mxu0 %v396_v22  ;;  %949 = vmatpush.msra.mxu1 %v415_v58  ;;  %v448_v23 = vld [vmem:[%s4523_s12 + $0x8] sm:$0xff]  ;;  %v438_v24 = vld [vmem:[%s4521_s10 + $0x58] sm:$0xff] }
 0x405   :  { %v620_v27 = vmul.f32 %v3056_v57, %v619_v26  ;;  %868 = vmatpush.msra.mxu2 %v448_v23  ;;  %v436_v26 = vld [vmem:[%s4521_s10 + $0x48] sm:$0xff]  ;;  %v442_v23 = vld [vmem:[%s4521_s10 + $0x78] sm:$0xff] }
 0x406   :  { %923 = vmatpush.msra.mxu0 %v395_v25  ;;  %v437_v25 = vld [vmem:[%s4521_s10 + $0x50] sm:$0xff] }
 0x407   :  { %2804 = vmatmul.msk.f32.gmra.mxu0 %vm571_vm11, %v620_v27  ;;  %972 = vmatpush.msrb.mxu2 %v438_v24  ;;  %v435_v27 = vld [vmem:[%s4521_s10 + $0x40] sm:$0xff]  ;;  %v441_v24 = vld [vmem:[%s4521_s10 + $0x70] sm:$0xff] }
 0x409   :  { %973 = vmatpush.msrb.mxu2 %v437_v25  ;;  %v440_v25 = vld [vmem:[%s4521_s10 + $0x68] sm:$0xff] }
 0x40b   :  { %974 = vmatpush.msrb.mxu2 %v436_v26 }
 0x40d   :  { %975 = vmatpush.msrb.mxu2 %v435_v27  ;;  %v439_v27 = vld [vmem:[%s4521_s10 + $0x60] sm:$0xff] }
 0x40f   :  { %2813 = vmatmul.msk.f32.vlgmr.msrb.gmra.mxu0 %vm535_vm9, %v675_v30  ;;  %v401_v30 = vld [vmem:[%s4551_s4 + $0x70] sm:$0xff] }
 0x417   :  { %2814 = vmatmul.msk.f32.gmra.mxu0 %vm535_vm9, %v678_v32  ;;  %v399_v32 = vld [vmem:[%s4551_s4 + $0x60] sm:$0xff] }
 0x41f   :  { %2822 = vmatmul.msk.f32.vlgmr.msra.gmra.mxu0 %vm324_vm0, %v3699_v0 }
 0x427   :  { %2823 = vmatmul.msk.f32.gmra.mxu0 %vm324_vm0, %v3720_v10 }
 0x47c   :  { %v648_v34 = vpop.f32.mrf.mxu0 }
 0x47d   :  { %2820 = vmatmul.msk.f32.vlgmr.msra.gmra.mxu3 %vm535_vm9, %v648_v34 }
 0x484   :  { %v651_v35 = vpop.f32.mrf.mxu0 }
 0x485   :  { %2821 = vmatmul.msk.f32.gmra.mxu3 %vm535_vm9, %v651_v35  ;;  %v3016_v35 = vld [vmem:[%s4520_s9 + $0x2] ss:$0 sm:$0xff] }
 0x48c   :  { %v761_v37 = vpop.f32.mrf.mxu0 }
 0x48d   :  { %v762_v38 = vadd.f32 %v761_v37, %v3774_v36 }
 0x48f   :  { %v767_v39 = vsel %vm571_vm11, %v762_v38, -inf }
 0x490   :  { %768 = vmax.xlane.f32.xlu2 %v767_v39 }
 0x494   :  { %v764_v41 = vpop.f32.mrf.mxu0 }
 0x495   :  { %v765_v42 = vadd.f32 %v764_v41, %v3781_v40  ;;  %v3015_v41 = vld [vmem:[%s4518_s7 + $0x2] ss:$0 sm:$0xff] }
 0x497   :  { %v770_v43 = vsel %vm575_vm12, %v765_v42, -inf }
 0x498   :  { %771 = vmax.xlane.f32.xlu0 %v770_v43  ;;  %v422_v43 = vld [vmem:[%s4519_s8 + $0x78] sm:$0xff] }
 0x49c   :  { %v925_v39 = vpop.f32.mrf.mxu0 }
 0x503   :  { %v769_v44 = vpop.xlane.xlu2 %768 }
 0x504   :  { %v773_v45 = vsub.f32 %v762_v38, %v769_v44  ;;  %v926_v44 = vadd.f32 %v3015_v41, %v925_v39 }
 0x506   :  { %v775_v46 = vmul.f32 1.442695, %v773_v45  ;;  %v421_v45 = vld [vmem:[%s4519_s8 + $0x70] sm:$0xff] }
 0x508   :  { %3061 = vpow2.f32 %v775_v46  ;;  %v420_v46 = vld [vmem:[%s4519_s8 + $0x68] sm:$0xff] }
 0x50b   :  { %v772_v47 = vpop.xlane.xlu0 %771 }
 0x50c   :  { %v774_v48 = vsub.f32 %v765_v42, %v772_v47  ;;  %v419_v47 = vld [vmem:[%s4519_s8 + $0x60] sm:$0xff] }
 0x50e   :  { %v3062_v49 = vpop.eup %3061  ;;  %v777_v50 = vmul.f32 1.442695, %v774_v48  ;;  %v928_v48 = vpop.f32.mrf.mxu0 }
 0x50f   :  { %v779_v51 = vsel %vm571_vm11, %v3062_v49, 0.0 }
 0x510   :  { %3063 = vpow2.f32 %v777_v50  ;;  %780 = vadd.xlane.f32.xlu1 %v779_v51  ;;  %v3906_v50 = vpop.f32.mrf.mxu3 }
 0x516   :  { %v3064_v52 = vpop.eup %3063 }
 0x517   :  { %v782_v53 = vsel %vm575_vm12, %v3064_v52, 0.0 }
 0x518   :  { %783 = vadd.xlane.f32.xlu2 %v782_v53 }
 0x583   :  { %v781_v57 = vpop.xlane.xlu1 %780 }
 0x584   :  { %3065 = vrcp.f32 %v781_v57  ;;  %v796_v1 = vand.u32 2147483648, %v781_v57  ;;  %v794_v3 = vand.u32 2147483647, %v781_v57  ;;  %vm790_vm8 = vweird.f32 %v781_v57 }
 0x586   :  { %v797_v7 = vor.u32 1.1754944e-38, %v796_v1  ;;  %vm795_vm14 = vcmp.eq.f32.partialorder %v794_v3, 8.507059e+37 }
 0x58a   :  { %v3066_v59 = vpop.eup %3065 }
 0x58b   :  { %v786_v60 = vmul.f32 %v3066_v59, %v781_v57  ;;  %v784_v61 = vpop.xlane.xlu2 %783  ;;  %vm791_vm7 = vweird.f32 %v3066_v59 }
 0x58c   :  { %3067 = vrcp.f32 %v784_v61  ;;  %vm792_vm13 = vmor %vm790_vm8, %vm791_vm7  ;;  %v811_v15 = vand.u32 2147483648, %v784_v61  ;;  %v809_v17 = vand.u32 2147483647, %v784_v61  ;;  %vm805_vm2 = vweird.f32 %v784_v61 }
 0x58d   :  { %v787_v62 = vsub.f32 1.0, %v786_v60 }
 0x58e   :  { %v812_v19 = vor.u32 1.1754944e-38, %v811_v15  ;;  %vm810_vm4 = vcmp.eq.f32.partialorder %v809_v17, 8.507059e+37 }
 0x58f   :  { %v788_v2 = vmul.f32 %v3066_v59, %v787_v62 }
 0x591   :  { %v789_v4 = vadd.f32 %v3066_v59, %v788_v2 }
 0x592   :  { %v3068_v5 = vpop.eup %3067 }
 0x593   :  { %v793_v8 = vsel %vm792_vm13, %v3066_v59, %v789_v4  ;;  %v801_v9 = vmul.f32 %v3068_v5, %v784_v61  ;;  %vm806_vm15 = vweird.f32 %v3068_v5  ;;  %v449_v59 = vld [vmem:[%s4523_s12 + $0x10] sm:$0xff] }
 0x594   :  { %v798_v11 = vsel %vm795_vm14, %v797_v7, %v793_v8  ;;  %vm807_vm3 = vmor %vm805_vm2, %vm806_vm15  ;;  %v3019_v7 = vld [vmem:[%s4520_s9 + $0x3] ss:$0 sm:$0xff] }
 0x595   :  { %v802_v12 = vsub.f32 1.0, %v801_v9  ;;  %v799_v13 = vmul.f32 %v3062_v49, %v798_v11  ;;  %v929_v49 = vadd.f32 %v3015_v41, %v928_v48 }
 0x597   :  { %v803_v16 = vmul.f32 %v3068_v5, %v802_v12  ;;  %2816 = vmatmul.msk.f32.vlgmr.msrb.gmra.mxu1 %vm571_vm11, %v799_v13 }
 0x598   :  { %1119 = vmatpush.msrb.mxu1 %v449_v59  ;;  %v3018_v59 = vld [vmem:[%s4518_s7 + $0x3] ss:$0 sm:$0xff] }
 0x599   :  { %v804_v18 = vadd.f32 %v3068_v5, %v803_v16 }
 0x59b   :  { %v808_v20 = vsel %vm807_vm3, %v3068_v5, %v804_v18 }
 0x59c   :  { %v813_v21 = vsel %vm810_vm4, %v812_v19, %v808_v20 }
 0x59d   :  { %v814_v22 = vmul.f32 %v3064_v52, %v813_v21  ;;  %v902_v52 = vpop.f32.mrf.mxu3 }
 0x59f   :  { %2817 = vmatmul.msk.f32.gmra.mxu1 %vm571_vm11, %v814_v22 }
 0x5a7   :  { %2824 = vmatmul.msk.f32.vlgmr.msra.gmra.mxu1 %vm324_vm0, %v3699_v0 }
 0x5af   :  { %2825 = vmatmul.msk.f32.gmra.mxu1 %vm324_vm0, %v3720_v10 }
 0x614   :  { %v841_v29 = vpop.f32.mrf.mxu1 }
 0x615   :  { %2818 = vmatmul.msk.f32.vlgmr.msra.gmra.mxu2 %vm535_vm9, %v841_v29 }
 0x616   :  { %1144 = vmatpush.msra.mxu2 %v402_v28 }
 0x618   :  { %1145 = vmatpush.msra.mxu2 %v401_v30 }
 0x61a   :  { %1146 = vmatpush.msra.mxu2 %v400_v31 }
 0x61c   :  { %v844_v33 = vpop.f32.mrf.mxu1  ;;  %1147 = vmatpush.msra.mxu2 %v399_v32 }
 0x61d   :  { %2819 = vmatmul.msk.f32.gmra.mxu2 %vm535_vm9, %v844_v33 }
 0x624   :  { %v951_v34 = vpop.f32.mrf.mxu1 }
 0x625   :  { %2826 = vmatmul.msk.f32.vlgmr.msrb.gmra.mxu2 %vm324_vm0, %v3699_v0  ;;  %v952_v42 = vadd.f32 %v3016_v35, %v951_v34 }
 0x62c   :  { %v954_v37 = vpop.f32.mrf.mxu1 }
 0x62d   :  { %v955_v38 = vadd.f32 %v3016_v35, %v954_v37  ;;  %2827 = vmatmul.msk.f32.gmra.mxu2 %vm324_vm0, %v3720_v10 }
 0x62f   :  { %2828 = vmatpush.xpose.msk.msrb.mxu3 %vm535_vm9, %v955_v38 }
 0x633   :  { %2829 = vmatpush.xpose.msk.msrb.mxu3 %vm535_vm9, %v952_v42 }
 0x635   :  { %2837 = vmatmul.msk.f32.vlgmr.msra.gmra.mxu2 %vm324_vm0, %v3699_v0 }
 0x636   :  { %2830 = vmatmul.msk.f32.vlgmr.msrb.gmra.mxu3 %vm535_vm9, %v926_v44 }
 0x637   :  { %1170 = vmatpush.msra.mxu3 %v422_v43 }
 0x639   :  { %1171 = vmatpush.msra.mxu3 %v421_v45 }
 0x63b   :  { %1172 = vmatpush.msra.mxu3 %v420_v46 }
 0x63d   :  { %1173 = vmatpush.msra.mxu3 %v419_v47  ;;  %2838 = vmatmul.msk.f32.gmra.mxu2 %vm324_vm0, %v3720_v10 }
 0x63e   :  { %2831 = vmatmul.msk.f32.gmra.mxu3 %vm535_vm9, %v929_v49 }
 0x646   :  { %2839 = vmatmul.msk.f32.vlgmr.msra.gmra.mxu3 %vm324_vm0, %v3699_v0 }
 0x64e   :  { %2840 = vmatmul.msk.f32.gmra.mxu3 %vm324_vm0, %v3720_v10 }
 0x698   :  { %v3908_v51 = vpop.f32.mrf.mxu2 }
 0x6a0   :  { %v873_v53 = vpop.f32.mrf.mxu2 }
 0x6a1   :  { %v3910_v54 = vadd.f32 %v902_v52, %v873_v53 }
 0x6a8   :  { %v977_v55 = vpop.f32.mrf.mxu2 }
 0x6a9   :  { %v978_v60 = vadd.f32 %v3017_v56, %v977_v55 }
 0x6b0   :  { %v980_v57 = vpop.f32.mrf.mxu2 }
 0x6b1   :  { %v981_v58 = vadd.f32 %v3017_v56, %v980_v57 }
 0x6b3   :  { %2832 = vmatpush.msk.msrb.mxu0 %vm627_vm10, %v981_v58 }
 0x6b5   :  { %1090 = vmatpush.msrb.mxu0 %v978_v60 }
 0x6b7   :  { %1196 = vmatpush.msra.mxu0 %v442_v23 }
 0x6b8   :  { %v1149_v58 = vpop.f32.mrf.mxu2 }
 0x6b9   :  { %v1012_v61 = vpop.f32.mrf.mxu3  ;;  %1197 = vmatpush.msra.mxu0 %v441_v24  ;;  %v1150_v60 = vadd.f32 %v3018_v59, %v1149_v58 }
 0x6ba   :  { %v1013_v62 = vadd.f32 %v1012_v61, %v3774_v36 }
 0x6bb   :  { %1198 = vmatpush.msra.mxu0 %v440_v25 }
 0x6bc   :  { %v1018_v1 = vsel %vm571_vm11, %v1013_v62, -inf }
 0x6bd   :  { %1019 = vmax.xlane.f32.xlu0 %v1018_v1  ;;  %1199 = vmatpush.msra.mxu0 %v439_v27 }
 0x6c1   :  { %v1015_v2 = vpop.f32.mrf.mxu3 }
 0x6c2   :  { %v1016_v3 = vadd.f32 %v1015_v2, %v3781_v40 }
 0x6c4   :  { %v1021_v4 = vsel %vm575_vm12, %v1016_v3, -inf }
 0x6c5   :  { %1022 = vmax.xlane.f32.xlu1 %v1021_v4  ;;  %v900_v4 = vadd.f32 %v3906_v50, %v3908_v51 }
 0x6c9   :  { %v1175_v5 = vpop.f32.mrf.mxu3 }
 0x6ca   :  { %v1176_v11 = vadd.f32 %v3019_v7, %v1175_v5 }
 0x6d1   :  { %v1178_v8 = vpop.f32.mrf.mxu3 }
 0x6d2   :  { %v1179_v9 = vadd.f32 %v3019_v7, %v1178_v8 }
 0x6d4   :  { %2843 = vmatpush.xpose.msk.msra.mxu1 %vm535_vm9, %v1179_v9 }
 0x6d8   :  { %2844 = vmatpush.xpose.msk.msra.mxu1 %vm535_vm9, %v1176_v11 }
 0x730   :  { %v1020_v12 = vpop.xlane.xlu0 %1019 }
 0x731   :  { %v1024_v13 = vsub.f32 %v1013_v62, %v1020_v12  ;;  %v1152_v62 = vpop.f32.mrf.mxu2 }
 0x733   :  { %v1026_v15 = vmul.f32 1.442695, %v1024_v13 }
 0x735   :  { %3069 = vpow2.f32 %v1026_v15 }
 0x738   :  { %v1023_v16 = vpop.xlane.xlu1 %1022 }
 0x739   :  { %v1025_v17 = vsub.f32 %v1016_v3, %v1023_v16 }
 0x73b   :  { %v3070_v18 = vpop.eup %3069  ;;  %v1028_v19 = vmul.f32 1.442695, %v1025_v17 }
 0x73c   :  { %v1030_v20 = vsel %vm571_vm11, %v3070_v18, 0.0 }
 0x73d   :  { %3071 = vpow2.f32 %v1028_v19  ;;  %1031 = vadd.xlane.f32.xlu2 %v1030_v20 }
 0x743   :  { %v3072_v21 = vpop.eup %3071 }
 0x744   :  { %v1033_v22 = vsel %vm575_vm12, %v3072_v21, 0.0 }
 0x745   :  { %1034 = vadd.xlane.f32.xlu0 %v1033_v22 }
 0x7b0   :  { %v1032_v26 = vpop.xlane.xlu2 %1031 }
 0x7b1   :  { %3073 = vrcp.f32 %v1032_v26  ;;  %v1047_v32 = vand.u32 2147483648, %v1032_v26  ;;  %v1045_v34 = vand.u32 2147483647, %v1032_v26  ;;  %vm1041_vm6 = vweird.f32 %v1032_v26 }
 0x7b3   :  { %v1048_v38 = vor.u32 1.1754944e-38, %v1047_v32  ;;  %vm1046_vm8 = vcmp.eq.f32.partialorder %v1045_v34, 8.507059e+37 }
 0x7b7   :  { %v3074_v28 = vpop.eup %3073 }
 0x7b8   :  { %v1037_v29 = vmul.f32 %v3074_v28, %v1032_v26  ;;  %v1035_v30 = vpop.xlane.xlu0 %1034  ;;  %vm1042_vm5 = vweird.f32 %v3074_v28 }
 0x7b9   :  { %3075 = vrcp.f32 %v1035_v30  ;;  %vm1043_vm7 = vmor %vm1041_vm6, %vm1042_vm5  ;;  %v1062_v45 = vand.u32 2147483648, %v1035_v30  ;;  %v1060_v47 = vand.u32 2147483647, %v1035_v30  ;;  %vm1056_vm14 = vweird.f32 %v1035_v30 }
 0x7ba   :  { %v1038_v31 = vsub.f32 1.0, %v1037_v29 }
 0x7bb   :  { %v1063_v49 = vor.u32 1.1754944e-38, %v1062_v45  ;;  %vm1061_vm2 = vcmp.eq.f32.partialorder %v1060_v47, 8.507059e+37 }
 0x7bc   :  { %v1039_v33 = vmul.f32 %v3074_v28, %v1038_v31 }
 0x7be   :  { %v1040_v35 = vadd.f32 %v3074_v28, %v1039_v33 }
 0x7bf   :  { %v3076_v37 = vpop.eup %3075 }
 0x7c0   :  { %v1044_v39 = vsel %vm1043_vm7, %v3074_v28, %v1040_v35  ;;  %v1052_v41 = vmul.f32 %v3076_v37, %v1035_v30  ;;  %vm1057_vm13 = vweird.f32 %v3076_v37 }
 0x7c1   :  { %v1049_v42 = vsel %vm1046_vm8, %v1048_v38, %v1044_v39  ;;  %vm1058_vm15 = vmor %vm1056_vm14, %vm1057_vm13 }
 0x7c2   :  { %v1053_v43 = vsub.f32 1.0, %v1052_v41  ;;  %v1050_v44 = vmul.f32 %v3070_v18, %v1049_v42 }
 0x7c4   :  { %v1054_v46 = vmul.f32 %v3076_v37, %v1053_v43  ;;  %2833 = vmatmul.msk.f32.vlgmr.msrb.gmra.mxu0 %vm571_vm11, %v1050_v44 }
 0x7c6   :  { %v1055_v48 = vadd.f32 %v3076_v37, %v1054_v46 }
 0x7c8   :  { %v1059_v52 = vsel %vm1058_vm15, %v3076_v37, %v1055_v48 }
 0x7c9   :  { %v1064_v53 = vsel %vm1061_vm2, %v1063_v49, %v1059_v52 }
 0x7ca   :  { %v1065_v55 = vmul.f32 %v3072_v21, %v1064_v53 }
 0x7cc   :  { %2834 = vmatmul.msk.f32.gmra.mxu0 %vm571_vm11, %v1065_v55 }
 0x7d4   :  { %2841 = vmatmul.msk.f32.vlgmr.msra.gmra.mxu0 %vm324_vm0, %v3699_v0  ;;  %v1153_v0 = vadd.f32 %v3018_v59, %v1152_v62 }
 0x7dc   :  { %2842 = vmatmul.msk.f32.gmra.mxu0 %vm324_vm0, %v3720_v10  ;;  %v3020_v10 = vld [vmem:[%s4522_s11 + $0x3] ss:$0 sm:$0xff] }
 0x841   :  { %v1092_v56 = vpop.f32.mrf.mxu0 }
 0x842   :  { %2835 = vmatmul.msk.f32.vlgmr.msrb.gmra.mxu1 %vm535_vm9, %v1092_v56 }
 0x849   :  { %v1095_v57 = vpop.f32.mrf.mxu0 }
 0x84a   :  { %2836 = vmatmul.msk.f32.gmra.mxu1 %vm535_vm9, %v1095_v57  ;;  %v3021_v57 = vld [vmem:[%s4524_s13] ss:$0 sm:$0xff] }
 0x851   :  { %v1201_v61 = vpop.f32.mrf.mxu0 }
 0x852   :  { %2845 = vmatmul.msk.f32.vlgmr.msra.gmra.mxu1 %vm535_vm9, %v1150_v60  ;;  %v1202_v3 = vadd.f32 %v3020_v10, %v1201_v61 }
 0x859   :  { %v1204_v1 = vpop.f32.mrf.mxu0 }
 0x85a   :  { %v1205_v2 = vadd.f32 %v3020_v10, %v1204_v1  ;;  %2846 = vmatmul.msk.f32.gmra.mxu1 %vm535_vm9, %v1153_v0 }
 0x85c   :  { %2847 = vmatpush.msk.msrb.mxu2 %vm627_vm10, %v1205_v2 }
 0x85e   :  { %1314 = vmatpush.msrb.mxu2 %v1202_v3 }
 0x8bf   :  { %v1121_v5 = vpop.f32.mrf.mxu1 }
 0x8c0   :  { %v3961_v7 = vadd.f32 %v1121_v5, %v900_v4 }
 0x8c7   :  { %v1124_v8 = vpop.f32.mrf.mxu1 }
 0x8c8   :  { %v3964_v9 = vadd.f32 %v1124_v8, %v3910_v54 }
 0x8cf   :  { %v1236_v11 = vpop.f32.mrf.mxu1 }
 0x8d0   :  { %v1237_v12 = vadd.f32 %v1236_v11, %v3774_v36 }
 0x8d2   :  { %v1242_v13 = vsel %vm571_vm11, %v1237_v12, -inf }
 0x8d3   :  { %1243 = vmax.xlane.f32.xlu1 %v1242_v13  ;;  %v1419_v13 = vld [vmem:[%s4527_s16 + $0x10] sm:$0xff] }
 0x8d7   :  { %v1239_v15 = vpop.f32.mrf.mxu1 }
 0x8d8   :  { %v1240_v16 = vadd.f32 %v1239_v15, %v3781_v40  ;;  %v450_v40 = vld [vmem:[%s4523_s12 + $0x18] sm:$0xff]  ;;  %v1418_v15 = vld [vmem:[%s4527_s16 + $0x8] sm:$0xff] }
 0x8d9   :  { %1343 = vmatpush.msrb.mxu3 %v450_v40 }
 0x8da   :  { %v1245_v17 = vsel %vm575_vm12, %v1240_v16, -inf }
 0x8db   :  { %1246 = vmax.xlane.f32.xlu2 %v1245_v17 }
 0x946   :  { %v1244_v50 = vpop.xlane.xlu1 %1243 }
 0x947   :  { %v1248_v51 = vsub.f32 %v1237_v12, %v1244_v50  ;;  %v1420_v12 = vld [vmem:[%s4527_s16 + $0x18] sm:$0xff] }
 0x948   :  { %1443 = vmatpush.msrb.mxu0 %v1420_v12 }
 0x949   :  { %v1250_v18 = vmul.f32 1.442695, %v1248_v51 }
 0x94a   :  { %1444 = vmatpush.msrb.mxu0 %v1419_v13 }
 0x94b   :  { %3077 = vpow2.f32 %v1250_v18 }
 0x94c   :  { %1445 = vmatpush.msrb.mxu0 %v1418_v15  ;;  %v3025_v15 = vld [vmem:[%s4530_s19] ss:$0 sm:$0xff] }
 0x94e   :  { %v1247_v19 = vpop.xlane.xlu2 %1246 }
 0x94f   :  { %v1249_v20 = vsub.f32 %v1240_v16, %v1247_v19  ;;  %v1417_v16 = vld [vmem:[%s4527_s16] sm:$0xff] }
 0x950   :  { %1446 = vmatpush.msrb.mxu0 %v1417_v16 }
 0x951   :  { %v3078_v54 = vpop.eup %3077  ;;  %v1252_v21 = vmul.f32 1.442695, %v1249_v20 }
 0x952   :  { %v1254_v22 = vsel %vm571_vm11, %v3078_v54, 0.0 }
 0x953   :  { %3079 = vpow2.f32 %v1252_v21  ;;  %1255 = vadd.xlane.f32.xlu0 %v1254_v22 }
 0x959   :  { %v3080_v36 = vpop.eup %3079 }
 0x95a   :  { %v1257_v23 = vsel %vm575_vm12, %v3080_v36, 0.0 }
 0x95b   :  { %1258 = vadd.xlane.f32.xlu1 %v1257_v23 }
 0x9c6   :  { %v1256_v24 = vpop.xlane.xlu0 %1255 }
 0x9c7   :  { %3081 = vrcp.f32 %v1256_v24  ;;  %v1271_v29 = vand.u32 2147483648, %v1256_v24  ;;  %v1269_v31 = vand.u32 2147483647, %v1256_v24  ;;  %vm1265_vm4 = vweird.f32 %v1256_v24 }
 0x9c9   :  { %v1272_v34 = vor.u32 1.1754944e-38, %v1271_v29  ;;  %vm1270_vm6 = vcmp.eq.f32.partialorder %v1269_v31, 8.507059e+37 }
 0x9cd   :  { %v3082_v25 = vpop.eup %3081 }
 0x9ce   :  { %v1261_v26 = vmul.f32 %v3082_v25, %v1256_v24  ;;  %v1259_v27 = vpop.xlane.xlu1 %1258  ;;  %vm1266_vm3 = vweird.f32 %v3082_v25 }
 0x9cf   :  { %3083 = vrcp.f32 %v1259_v27  ;;  %vm1267_vm5 = vmor %vm1265_vm4, %vm1266_vm3  ;;  %v1286_v42 = vand.u32 2147483648, %v1259_v27  ;;  %v1284_v44 = vand.u32 2147483647, %v1259_v27  ;;  %vm1280_vm8 = vweird.f32 %v1259_v27 }
 0x9d0   :  { %v1262_v28 = vsub.f32 1.0, %v1261_v26  ;;  %v3022_v26 = vld [vmem:[%s4525_s14] ss:$0 sm:$0xff] }
 0x9d1   :  { %v1287_v46 = vor.u32 1.1754944e-38, %v1286_v42  ;;  %vm1285_vm14 = vcmp.eq.f32.partialorder %v1284_v44, 8.507059e+37  ;;  %v1479_v42 = vld [vmem:[%s4529_s18 + $0x38] sm:$0xff]  ;;  %v1477_v44 = vld [vmem:[%s4529_s18 + $0x28] sm:$0xff] }
 0x9d2   :  { %v1263_v30 = vmul.f32 %v3082_v25, %v1262_v28  ;;  %1495 = vmatpush.msrb.mxu1 %v1479_v42 }
 0x9d4   :  { %v1264_v32 = vadd.f32 %v3082_v25, %v1263_v30  ;;  %v3023_v30 = vld [vmem:[%s4526_s15] ss:$0 sm:$0xff] }
 0x9d5   :  { %v3084_v33 = vpop.eup %3083 }
 0x9d6   :  { %v1268_v35 = vsel %vm1267_vm5, %v3082_v25, %v1264_v32  ;;  %v1276_v37 = vmul.f32 %v3084_v33, %v1259_v27  ;;  %vm1281_vm7 = vweird.f32 %v3084_v33 }
 0x9d7   :  { %v1273_v38 = vsel %vm1270_vm6, %v1272_v34, %v1268_v35  ;;  %vm1282_vm13 = vmor %vm1280_vm8, %vm1281_vm7  ;;  %vm1480_vm7 = vcmask 523264  }
 0x9d8   :  { %v1277_v39 = vsub.f32 1.0, %v1276_v37  ;;  %v1274_v41 = vmul.f32 %v3078_v54, %v1273_v38 }
 0x9da   :  { %v1278_v43 = vmul.f32 %v3084_v33, %v1277_v39  ;;  %2848 = vmatmul.msk.f32.vlgmr.msrb.gmra.mxu2 %vm571_vm11, %v1274_v41 }
 0x9dc   :  { %v1279_v45 = vadd.f32 %v3084_v33, %v1278_v43  ;;  %v1478_v43 = vld [vmem:[%s4529_s18 + $0x30] sm:$0xff] }
 0x9dd   :  { %1496 = vmatpush.msrb.mxu1 %v1478_v43 }
 0x9de   :  { %v1283_v47 = vsel %vm1282_vm13, %v3084_v33, %v1279_v45  ;;  %v1476_v45 = vld [vmem:[%s4529_s18 + $0x20] sm:$0xff] }
 0x9df   :  { %v1288_v48 = vsel %vm1285_vm14, %v1287_v46, %v1283_v47  ;;  %1497 = vmatpush.msrb.mxu1 %v1477_v44  ;;  %v1475_v46 = vld [vmem:[%s4529_s18 + $0x18] sm:$0xff]  ;;  %v1474_v47 = vld [vmem:[%s4529_s18 + $0x10] sm:$0xff] }
 0x9e0   :  { %v1289_v49 = vmul.f32 %v3080_v36, %v1288_v48  ;;  %v1473_v48 = vld [vmem:[%s4529_s18 + $0x8] sm:$0xff]  ;;  %v2865_v44 = vld [vmem:[%s4551_s4 + $0xb8] sm:$0xff] }
 0x9e1   :  { %1498 = vmatpush.msrb.mxu1 %v1476_v45  ;;  %v2885_v45 = vld [vmem:[%s4519_s8 + $0xb8] sm:$0xff] }
 0x9e2   :  { %2849 = vmatmul.msk.f32.gmra.mxu2 %vm571_vm11, %v1289_v49  ;;  %v1472_v49 = vld [vmem:[%s4529_s18] sm:$0xff] }
 0x9e3   :  { %1499 = vmatpush.msrb.mxu1 %v1475_v46  ;;  %v2864_v46 = vld [vmem:[%s4551_s4 + $0xb0] sm:$0xff] }
 0x9e5   :  { %1500 = vmatpush.msrb.mxu1 %v1474_v47  ;;  %v2884_v47 = vld [vmem:[%s4519_s8 + $0xb0] sm:$0xff] }
 0x9e7   :  { %1501 = vmatpush.msrb.mxu1 %v1473_v48 }
 0x9e9   :  { %1502 = vmatpush.msrb.mxu1 %v1472_v49  ;;  %v2863_v49 = vld [vmem:[%s4551_s4 + $0xa8] sm:$0xff] }
 0xa5d   :  { %v1316_v52 = vpop.f32.mrf.mxu2 }
 0xa5e   :  { %2850 = vmatmul.msk.f32.vlgmr.msrb.gmra.mxu3 %vm535_vm9, %v1316_v52  ;;  %v3024_v52 = vld [vmem:[%s4528_s17] ss:$0 sm:$0xff] }
 0xa65   :  { %v1319_v53 = vpop.f32.mrf.mxu2 }
 0xa66   :  { %2851 = vmatmul.msk.f32.gmra.mxu3 %vm535_vm9, %v1319_v53 }
 0xae1   :  { %v1345_v55 = vpop.f32.mrf.mxu3 }
 0xae2   :  { %v1351_v56 = vadd.f32 %v1345_v55, %v3961_v7 }
 0xae4   :  { %v1353_v58 = vadd.f32 %v1351_v56, %v3618_v63 }
 0xae6   :  { %v3984_v59 = vadd.f32 %v3021_v57, %v1353_v58 }
 0xae8   :  { %v1363_v60 = vsel %vm324_vm0, %v3984_v59, 0.0 }
 0xae9   :  { %1364 = vadd.xlane.f32.xlu2 %v1363_v60  ;;  %v1348_v61 = vpop.f32.mrf.mxu3 }
 0xaea   :  { %v1352_v62 = vadd.f32 %v1348_v61, %v3964_v9 }
 0xaec   :  { %v1354_v0 = vadd.f32 %v1352_v62, %v3622_v6 }
 0xaee   :  { %v3990_v10 = vadd.f32 %v3021_v57, %v1354_v0 }
 0xaf0   :  { %v1366_v1 = vsel %vm328_vm1, %v3990_v10, 0.0 }
 0xaf1   :  { %1367 = vadd.xlane.f32.xlu0 %v1366_v1 }
 0xb5c   :  { %v1365_v2 = vpop.xlane.xlu2 %1364 }
 0xb5d   :  { %v1369_v63 = vmul.f32 %v1365_v2, %v3626_v14 }
 0xb5f   :  { %v1371_v3 = vsub.f32 %v3984_v59, %v1369_v63 }
 0xb61   :  { %v1373_v4 = vmul.f32 %v1371_v3, %v1371_v3 }
 0xb63   :  { %v1375_v5 = vsel %vm324_vm0, %v1373_v4, 0.0 }
 0xb64   :  { %1376 = vadd.xlane.f32.xlu1 %v1375_v5  ;;  %v1368_v7 = vpop.xlane.xlu0 %1367 }
 0xb65   :  { %v1370_v8 = vmul.f32 %v1368_v7, %v3626_v14 }
 0xb67   :  { %v1372_v6 = vsub.f32 %v3990_v10, %v1370_v8 }
 0xb69   :  { %v1374_v9 = vmul.f32 %v1372_v6, %v1372_v6 }
 0xb6b   :  { %v1378_v11 = vsel %vm328_vm1, %v1374_v9, 0.0 }
 0xb6c   :  { %1379 = vadd.xlane.f32.xlu2 %v1378_v11 }
 0xbd7   :  { %v1377_v17 = vpop.xlane.xlu1 %1376 }
 0xbd8   :  { %v1381_v50 = vmul.f32 %v1377_v17, %v3626_v14 }
 0xbda   :  { %v1383_v51 = vadd.f32 1e-06, %v1381_v50 }
 0xbdc   :  { %3085 = vrsqrt.f32 %v1383_v51  ;;  %vm1391_vm2 = vweird.f32 %v1383_v51 }
 0xbdf   :  { %v1380_v18 = vpop.xlane.xlu2 %1379 }
 0xbe0   :  { %v1382_v19 = vmul.f32 %v1380_v18, %v3626_v14 }
 0xbe2   :  { %v3086_v20 = vpop.eup %3085  ;;  %v1384_v54 = vadd.f32 1e-06, %v1382_v19 }
 0xbe3   :  { %v1386_v21 = vmul.f32 %v3086_v20, %v1383_v51  ;;  %vm1392_vm15 = vweird.f32 %v3086_v20 }
 0xbe4   :  { %3087 = vrsqrt.f32 %v1384_v54  ;;  %vm1393_vm3 = vmor %vm1391_vm2, %vm1392_vm15  ;;  %vm1401_vm5 = vweird.f32 %v1384_v54 }
 0xbe5   :  { %v1387_v22 = vmul.f32 %v3086_v20, %v1386_v21 }
 0xbe7   :  { %v1388_v36 = vmul.f32 0.5, %v1387_v22 }
 0xbe9   :  { %v1389_v23 = vsub.f32 1.5, %v1388_v36 }
 0xbea   :  { %v3088_v40 = vpop.eup %3087 }
 0xbeb   :  { %v1390_v24 = vmul.f32 %v3086_v20, %v1389_v23  ;;  %v1396_v25 = vmul.f32 %v3088_v40, %v1384_v54  ;;  %vm1402_vm4 = vweird.f32 %v3088_v40 }
 0xbec   :  { %vm1403_vm6 = vmor %vm1401_vm5, %vm1402_vm4 }
 0xbed   :  { %v1394_v27 = vsel %vm1393_vm3, %v3086_v20, %v1390_v24  ;;  %v1397_v28 = vmul.f32 %v3088_v40, %v1396_v25 }
 0xbee   :  { %v1405_v29 = vmul.f32 %v1394_v27, %v1371_v3  ;;  %v2861_v27 = vld [vmem:[%s4551_s4 + $0x98] sm:$0xff] }
 0xbef   :  { %v1398_v31 = vmul.f32 0.5, %v1397_v28  ;;  %v2881_v28 = vld [vmem:[%s4519_s8 + $0x98] sm:$0xff]  ;;  %1668 = vmatpush.msra.mxu2 %v2861_v27 }
 0xbf0   :  { %v1410_v32 = vmul.f32 %v3022_v26, %v1405_v29  ;;  %v2901_v29 = vld [vmem:[%s4521_s10 + $0x98] sm:$0xff]  ;;  %1694 = vmatpush.msra.mxu3 %v2881_v28 }
 0xbf1   :  { %v1399_v33 = vsub.f32 1.5, %v1398_v31  ;;  %1720 = vmatpush.msra.mxu0 %v2901_v29  ;;  %v2880_v31 = vld [vmem:[%s4519_s8 + $0x90] sm:$0xff]  ;;  %v2905_v27 = vld [vmem:[%s4521_s10 + $0xb8] sm:$0xff] }
 0xbf2   :  { %v1415_v34 = vadd.f32 %v3023_v30, %v1410_v32  ;;  %v2900_v32 = vld [vmem:[%s4521_s10 + $0x90] sm:$0xff]  ;;  %1695 = vmatpush.msra.mxu3 %v2880_v31  ;;  %v2903_v31 = vld [vmem:[%s4521_s10 + $0xa8] sm:$0xff] }
 0xbf3   :  { %v1400_v35 = vmul.f32 %v3088_v40, %v1399_v33  ;;  %1721 = vmatpush.msra.mxu0 %v2900_v32  ;;  %v2859_v33 = vld [vmem:[%s4551_s4 + $0x88] sm:$0xff]  ;;  %v2904_v29 = vld [vmem:[%s4521_s10 + $0xb0] sm:$0xff] }
 0xbf4   :  { %2852 = vmatmul.msk.f32.vlgmr.msrb.gmra.mxu0 %vm324_vm0, %v1415_v34  ;;  %v2879_v34 = vld [vmem:[%s4519_s8 + $0x88] sm:$0xff] }
 0xbf5   :  { %v1404_v37 = vsel %vm1403_vm6, %v3088_v40, %v1400_v35  ;;  %v2899_v35 = vld [vmem:[%s4521_s10 + $0x88] sm:$0xff]  ;;  %1696 = vmatpush.msra.mxu3 %v2879_v34  ;;  %v2902_v34 = vld [vmem:[%s4521_s10 + $0xa0] sm:$0xff] }
 0xbf6   :  { %v1406_v38 = vmul.f32 %v1404_v37, %v1372_v6  ;;  %1722 = vmatpush.msra.mxu0 %v2899_v35  ;;  %v2858_v37 = vld [vmem:[%s4551_s4 + $0x80] sm:$0xff] }
 0xbf8   :  { %v1411_v39 = vmul.f32 %v3022_v26, %v1406_v38  ;;  %v2878_v38 = vld [vmem:[%s4519_s8 + $0x80] sm:$0xff] }
 0xbf9   :  { %1697 = vmatpush.msra.mxu3 %v2878_v38 }
 0xbfa   :  { %v1416_v41 = vadd.f32 %v3023_v30, %v1411_v39  ;;  %v2860_v30 = vld [vmem:[%s4551_s4 + $0x90] sm:$0xff]  ;;  %v2898_v39 = vld [vmem:[%s4521_s10 + $0x80] sm:$0xff] }
 0xbfb   :  { %1669 = vmatpush.msra.mxu2 %v2860_v30  ;;  %1723 = vmatpush.msra.mxu0 %v2898_v39  ;;  %v3031_v30 = vld [vmem:[%s4520_s9 + $0x5] ss:$0 sm:$0xff] }
 0xbfc   :  { %2853 = vmatmul.msk.f32.gmra.mxu0 %vm324_vm0, %v1416_v41  ;;  %1861 = vmatpush.msrb.mxu3 %v2865_v44 }
 0xbfd   :  { %1670 = vmatpush.msra.mxu2 %v2859_v33  ;;  %1887 = vmatpush.msrb.mxu0 %v2885_v45  ;;  %v4217_v45 = vld [vmem:[%s4554_s3 + $0x8] sm:$0x3] }
 0xbfe   :  { %1862 = vmatpush.msrb.mxu3 %v2864_v46 }
 0xbff   :  { %1671 = vmatpush.msra.mxu2 %v2858_v37  ;;  %1888 = vmatpush.msrb.mxu0 %v2884_v47 }
 0xc00   :  { %1863 = vmatpush.msrb.mxu3 %v2863_v49  ;;  %v3033_v49 = vld [vmem:[%s4522_s11 + $0x5] ss:$0 sm:$0xff] }
 0xc71   :  { %v1448_v53 = vpop.f32.mrf.mxu0 }
 0xc72   :  { %v1449_v55 = vadd.f32 %v3024_v52, %v1448_v53 }
 0xc74   :  { %v1454_v56 = vmul.f32 %v1449_v55, %v1449_v55 }
 0xc76   :  { %v1456_v57 = vmul.f32 %v1454_v56, %v1449_v55  ;;  %v2882_v56 = vld [vmem:[%s4519_s8 + $0xa0] sm:$0xff] }
 0xc78   :  { %v1458_v58 = vmul.f32 0.044715, %v1456_v57 }
 0xc79   :  { %v1451_v60 = vpop.f32.mrf.mxu0 }
 0xc7a   :  { %v1460_v61 = vadd.f32 %v1458_v58, %v1449_v55  ;;  %v1452_v62 = vadd.f32 %v3024_v52, %v1451_v60  ;;  %v2883_v52 = vld [vmem:[%s4519_s8 + $0xa8] sm:$0xff] }
 0xc7b   :  { %1889 = vmatpush.msrb.mxu0 %v2883_v52 }
 0xc7c   :  { %v1462_v0 = vmul.f32 0.7978846, %v1460_v61  ;;  %v1455_v1 = vmul.f32 %v1452_v62, %v1452_v62 }
 0xc7d   :  { %1890 = vmatpush.msrb.mxu0 %v2882_v56 }
 0xc7e   :  { %3089 = vtanh.f32 %v1462_v0  ;;  %v1457_v2 = vmul.f32 %v1455_v1, %v1452_v62 }
 0xc80   :  { %v1459_v63 = vmul.f32 0.044715, %v1457_v2 }
 0xc82   :  { %v1461_v3 = vadd.f32 %v1459_v63, %v1452_v62 }
 0xc84   :  { %v3090_v4 = vpop.eup %3089  ;;  %v1463_v5 = vmul.f32 0.7978846, %v1461_v3  ;;  %v3026_v3 = vld [vmem:[%s4552_s24 + $0x1] ss:$0 sm:$0xff] }
 0xc85   :  { %v1466_v7 = vadd.f32 1.0, %v3090_v4 }
 0xc86   :  { %3091 = vtanh.f32 %v1463_v5 }
 0xc87   :  { %v1468_v8 = vmul.f32 0.5, %v1466_v7  ;;  %v3027_v7 = vld [vmem:[%s4553_s26 + $0x1] ss:$0 sm:$0xff] }
 0xc89   :  { %v1470_v6 = vmul.f32 %v1468_v8, %v1449_v55  ;;  %v2862_v55 = vld [vmem:[%s4551_s4 + $0xa0] sm:$0xff] }
 0xc8a   :  { %1864 = vmatpush.msrb.mxu3 %v2862_v55 }
 0xc8b   :  { %2854 = vmatmul.msk.f32.vlgmr.msrb.gmra.mxu1 %vm1480_vm7, %v1470_v6 }
 0xc8c   :  { %v3092_v9 = vpop.eup %3091 }
 0xc8d   :  { %v1467_v11 = vadd.f32 1.0, %v3092_v9 }
 0xc8f   :  { %v1469_v12 = vmul.f32 0.5, %v1467_v11 }
 0xc91   :  { %v1471_v13 = vmul.f32 %v1469_v12, %v1452_v62 }
 0xc93   :  { %2855 = vmatmul.msk.f32.gmra.mxu1 %vm1480_vm7, %v1471_v13 }
 0xd08   :  { %v1504_v16 = vpop.f32.mrf.mxu1 }
 0xd09   :  { %v1510_v17 = vadd.f32 %v1504_v16, %v3984_v59 }
 0xd0b   :  { %v4055_v50 = vadd.f32 %v3025_v15, %v1510_v17 }
 0xd0d   :  { %v1522_v51 = vsel %vm324_vm0, %v4055_v50, 0.0 }
 0xd0e   :  { %1523 = vadd.xlane.f32.xlu0 %v1522_v51 }
 0xd10   :  { %v1507_v18 = vpop.f32.mrf.mxu1 }
 0xd11   :  { %v1511_v19 = vadd.f32 %v1507_v18, %v3990_v10 }
 0xd13   :  { %v4060_v20 = vadd.f32 %v3025_v15, %v1511_v19 }
 0xd15   :  { %v1525_v54 = vsel %vm328_vm1, %v4060_v20, 0.0 }
 0xd16   :  { %1526 = vadd.xlane.f32.xlu1 %v1525_v54  ;;  %v3028_v54 = vld [vmem:[%s4522_s11 + $0x4] ss:$0 sm:$0xff] }
 0xd81   :  { %v1524_v21 = vpop.xlane.xlu0 %1523 }
 0xd82   :  { %v1528_v22 = vmul.f32 %v1524_v21, %v3626_v14 }
 0xd84   :  { %v4066_v59 = vsub.f32 %v4055_v50, %v1528_v22 }
 0xd86   :  { %v1532_v36 = vmul.f32 %v4066_v59, %v4066_v59 }
 0xd88   :  { %v1534_v23 = vsel %vm324_vm0, %v1532_v36, 0.0  ;;  %v3030_v36 = vld [vmem:[%s4520_s9 + $0x4] ss:$0 sm:$0xff] }
 0xd89   :  { %v1527_v40 = vpop.xlane.xlu1 %1526  ;;  %1535 = vadd.xlane.f32.xlu2 %v1534_v23 }
 0xd8a   :  { %v1529_v10 = vmul.f32 %v1527_v40, %v3626_v14 }
 0xd8c   :  { %v4073_v24 = vsub.f32 %v4060_v20, %v1529_v10 }
 0xd8e   :  { %v1533_v25 = vmul.f32 %v4073_v24, %v4073_v24 }
 0xd90   :  { %v1537_v26 = vsel %vm328_vm1, %v1533_v25, 0.0  ;;  %v3029_v25 = vld [vmem:[%s4518_s7 + $0x4] ss:$0 sm:$0xff] }
 0xd91   :  { %1538 = vadd.xlane.f32.xlu0 %v1537_v26 }
 0xdfc   :  { %v1536_v41 = vpop.xlane.xlu2 %1535 }
 0xdfd   :  { %v1540_v42 = vmul.f32 %v1536_v41, %v3626_v14  ;;  %v4210_v41 = vld [vmem:[%s4554_s3] sm:$0xff]  ;;  %s2780_s3 = sshll.u32 %s4533_s22, 4  ;;  %s2781_s3 = int_to_ptr.hbm [resolvable:$true] %s2780_s3 }
 0xdff   :  { %v1542_v43 = vadd.f32 1e-06, %v1540_v42 }
 0xe01   :  { %3093 = vrsqrt.f32 %v1542_v43  ;;  %vm1550_vm13 = vweird.f32 %v1542_v43 }
 0xe04   :  { %v1539_v48 = vpop.xlane.xlu0 %1538 }
 0xe05   :  { %v1541_v53 = vmul.f32 %v1539_v48, %v3626_v14 }
 0xe07   :  { %v3094_v57 = vpop.eup %3093  ;;  %v1543_v58 = vadd.f32 1e-06, %v1541_v53 }
 0xe08   :  { %v1545_v60 = vmul.f32 %v3094_v57, %v1542_v43  ;;  %vm1551_vm8 = vweird.f32 %v3094_v57 }
 0xe09   :  { %3095 = vrsqrt.f32 %v1543_v58  ;;  %vm1552_vm14 = vmor %vm1550_vm13, %vm1551_vm8  ;;  %vm1560_vm2 = vweird.f32 %v1543_v58 }
 0xe0a   :  { %v1546_v61 = vmul.f32 %v3094_v57, %v1545_v60 }
 0xe0c   :  { %v1547_v62 = vmul.f32 0.5, %v1546_v61 }
 0xe0e   :  { %v1548_v0 = vsub.f32 1.5, %v1547_v62 }
 0xe0f   :  { %v3096_v1 = vpop.eup %3095 }
 0xe10   :  { %v1549_v2 = vmul.f32 %v3094_v57, %v1548_v0  ;;  %v1555_v63 = vmul.f32 %v3096_v1, %v1543_v58  ;;  %vm1561_vm15 = vweird.f32 %v3096_v1 }
 0xe11   :  { %vm1562_vm3 = vmor %vm1560_vm2, %vm1561_vm15 }
 0xe12   :  { %v1553_v4 = vsel %vm1552_vm14, %v3094_v57, %v1549_v2  ;;  %v1556_v5 = vmul.f32 %v3096_v1, %v1555_v63 }
 0xe13   :  { %v1564_v8 = vmul.f32 %v1553_v4, %v4066_v59 }
 0xe14   :  { %v1557_v6 = vmul.f32 0.5, %v1556_v5 }
 0xe15   :  { %v1569_v9 = vmul.f32 %v3026_v3, %v1564_v8 }
 0xe16   :  { %v1558_v11 = vsub.f32 1.5, %v1557_v6 }
 0xe17   :  { %v4147_v12 = vadd.f32 %v3027_v7, %v1569_v9 }
 0xe18   :  { %v1559_v13 = vmul.f32 %v3096_v1, %v1558_v11 }
 0xe19   :  { %2922 = vmatmul.msk.f32.vlgmr.msra.gmra.mxu2 %vm324_vm0, %v4147_v12  ;;  %2924 = vmatmul.msk.f32.vlgmr.msra.gmra.mxu3 %vm324_vm0, %v4147_v12 }
 0xe1a   :  { %v1563_v15 = vsel %vm1562_vm3, %v3096_v1, %v1559_v13  ;;  %2926 = vmatmul.msk.f32.vlgmr.msra.gmra.mxu0 %vm324_vm0, %v4147_v12 }
 0xe1b   :  { %v1565_v16 = vmul.f32 %v1563_v15, %v4073_v24 }
 0xe1d   :  { %v1570_v17 = vmul.f32 %v3026_v3, %v1565_v16 }
 0xe1f   :  { %v4156_v51 = vadd.f32 %v3027_v7, %v1570_v17 }
 0xe21   :  { %2923 = vmatmul.msk.f32.gmra.mxu2 %vm324_vm0, %v4156_v51  ;;  %2925 = vmatmul.msk.f32.gmra.mxu3 %vm324_vm0, %v4156_v51 }
 0xe22   :  { %2927 = vmatmul.msk.f32.gmra.mxu0 %vm324_vm0, %v4156_v51 }
 0xe29   :  { %2935 = vmatmul.msk.f32.vlgmr.msrb.gmra.mxu3 %vm324_vm0, %v4147_v12 }
 0xe2a   :  { %2937 = vmatmul.msk.f32.vlgmr.msrb.gmra.mxu0 %vm324_vm0, %v4147_v12 }
 0xe31   :  { %2936 = vmatmul.msk.f32.gmra.mxu3 %vm324_vm0, %v4156_v51 }
 0xe32   :  { %2938 = vmatmul.msk.f32.gmra.mxu0 %vm324_vm0, %v4156_v51 }
 0xe97   :  { %v1725_v18 = vpop.f32.mrf.mxu0 }
 0xe98   :  { %v1726_v59 = vadd.f32 %v3028_v54, %v1725_v18 }
 0xe9c   :  { %v1699_v19 = vpop.f32.mrf.mxu3  ;;  %v1673_v10 = vpop.f32.mrf.mxu2 }
 0xe9d   :  { %v1700_v26 = vadd.f32 %v3030_v36, %v1699_v19  ;;  %v1674_v28 = vadd.f32 %v3029_v25, %v1673_v10 }
 0xe9f   :  { %v1728_v21 = vpop.f32.mrf.mxu0 }
 0xea0   :  { %v1729_v22 = vadd.f32 %v3028_v54, %v1728_v21 }
 0xea2   :  { %2932 = vmatpush.msk.msrb.mxu2 %vm627_vm10, %v1729_v22  ;;  %v2869_v22 = vld [vmem:[%s4551_s4 + $0xd8] sm:$0xff] }
 0xea4   :  { %1838 = vmatpush.msrb.mxu2 %v1726_v59  ;;  %v1702_v23 = vpop.f32.mrf.mxu3  ;;  %v1676_v35 = vpop.f32.mrf.mxu2 }
 0xea5   :  { %v1703_v40 = vadd.f32 %v3030_v36, %v1702_v23  ;;  %v1677_v37 = vadd.f32 %v3029_v25, %v1676_v35  ;;  %v2918_v35 = vld [vmem:[%s4523_s12 + $0x20] sm:$0xff] }
 0xea7   :  { %v1892_v24 = vpop.f32.mrf.mxu0  ;;  %2928 = vmatpush.xpose.msk.msra.mxu1 %vm535_vm9, %v1703_v40  ;;  %v2868_v40 = vld [vmem:[%s4551_s4 + $0xd0] sm:$0xff] }
 0xea8   :  { %v1893_v38 = vadd.f32 %v3031_v30, %v1892_v24  ;;  %v2867_v24 = vld [vmem:[%s4551_s4 + $0xc8] sm:$0xff] }
 0xeab   :  { %2929 = vmatpush.xpose.msk.msra.mxu1 %vm535_vm9, %v1700_v26 }
 0xeae   :  { %2930 = vmatmul.msk.f32.vlgmr.msra.gmra.mxu1 %vm535_vm9, %v1674_v28 }
 0xeaf   :  { %1913 = vmatpush.msrb.mxu1 %v2905_v27  ;;  %v1895_v32 = vpop.f32.mrf.mxu0  ;;  %v2866_v27 = vld [vmem:[%s4551_s4 + $0xc0] sm:$0xff] }
 0xeb0   :  { %v1896_v33 = vadd.f32 %v3031_v30, %v1895_v32  ;;  %v1866_v30 = vpop.f32.mrf.mxu3 }
 0xeb1   :  { %1914 = vmatpush.msrb.mxu1 %v2904_v29 }
 0xeb2   :  { %2941 = vmatpush.xpose.msk.msra.mxu2 %vm535_vm9, %v1896_v33 }
 0xeb3   :  { %1915 = vmatpush.msrb.mxu1 %v2903_v31  ;;  %v3032_v31 = vld [vmem:[%s4518_s7 + $0x5] ss:$0 sm:$0xff] }
 0xeb4   :  { %v1867_v32 = vadd.f32 %v3032_v31, %v1866_v30  ;;  %v2873_v30 = vld [vmem:[%s4551_s4 + $0xf8] sm:$0xff] }
 0xeb5   :  { %1916 = vmatpush.msrb.mxu1 %v2902_v34 }
 0xeb6   :  { %2942 = vmatpush.xpose.msk.msra.mxu2 %vm535_vm9, %v1893_v38  ;;  %2931 = vmatmul.msk.f32.gmra.mxu1 %vm535_vm9, %v1677_v37 }
 0xeb7   :  { %2089 = vmatpush.msra.mxu1 %v2918_v35 }
 0xeb8   :  { %v1869_v33 = vpop.f32.mrf.mxu3 }
 0xeb9   :  { %v1870_v34 = vadd.f32 %v3032_v31, %v1869_v33  ;;  %v2871_v33 = vld [vmem:[%s4551_s4 + $0xe8] sm:$0xff] }
 0xebe   :  { %2939 = vmatmul.msk.f32.vlgmr.msrb.gmra.mxu1 %vm324_vm0, %v4147_v12 }
 0xec6   :  { %2940 = vmatmul.msk.f32.gmra.mxu1 %vm324_vm0, %v4156_v51 }
 0xf2b   :  { %v1760_v39 = vpop.f32.mrf.mxu1 }
 0xf2c   :  { %v1761_v42 = vadd.f32 %v4210_v41, %v1760_v39 }
 0xf2e   :  { %v1766_v43 = vsel %vm571_vm11, %v1761_v42, -inf }
 0xf2f   :  { %1767 = vmax.xlane.f32.xlu1 %v1766_v43 }
 0xf33   :  { %v1763_v44 = vpop.f32.mrf.mxu1 }
 0xf34   :  { %v1764_v46 = vadd.f32 %v4217_v45, %v1763_v44 }
 0xf36   :  { %v1769_v47 = vsel %vm575_vm12, %v1764_v46, -inf }
 0xf37   :  { %1770 = vmax.xlane.f32.xlu2 %v1769_v47 }
 0xf3b   :  { %v1918_v48 = vpop.f32.mrf.mxu1 }
 0xf3c   :  { %v1919_v55 = vadd.f32 %v3033_v49, %v1918_v48 }
 0xf43   :  { %v1921_v52 = vpop.f32.mrf.mxu1 }
 0xf44   :  { %v1922_v53 = vadd.f32 %v3033_v49, %v1921_v52 }
 0xf46   :  { %2945 = vmatpush.msk.msra.mxu3 %vm627_vm10, %v1922_v53 }
 0xf48   :  { %2031 = vmatpush.msra.mxu3 %v1919_v55 }
 0xfa2   :  { %v1768_v56 = vpop.xlane.xlu1 %1767 }
 0xfa3   :  { %v1772_v57 = vsub.f32 %v1761_v42, %v1768_v56 }
 0xfa5   :  { %v1774_v58 = vmul.f32 1.442695, %v1772_v57 }
 0xfa7   :  { %3097 = vpow2.f32 %v1774_v58 }
 0xfaa   :  { %v1771_v60 = vpop.xlane.xlu2 %1770 }
 0xfab   :  { %v1773_v61 = vsub.f32 %v1764_v46, %v1771_v60 }
 0xfad   :  { %v3098_v62 = vpop.eup %3097  ;;  %v1776_v0 = vmul.f32 1.442695, %v1773_v61 }
 0xfae   :  { %v1778_v1 = vsel %vm571_vm11, %v3098_v62, 0.0 }
 0xfaf   :  { %3099 = vpow2.f32 %v1776_v0  ;;  %1779 = vadd.xlane.f32.xlu0 %v1778_v1  ;;  %v2888_v0 = vld [vmem:[%s4519_s8 + $0xd0] sm:$0xff]  ;;  %v2887_v1 = vld [vmem:[%s4519_s8 + $0xc8] sm:$0xff] }
 0xfb5   :  { %v3100_v2 = vpop.eup %3099 }
 0xfb6   :  { %v1781_v63 = vsel %vm575_vm12, %v3100_v2, 0.0 }
 0xfb7   :  { %1782 = vadd.xlane.f32.xlu1 %v1781_v63  ;;  %v2886_v63 = vld [vmem:[%s4519_s8 + $0xc0] sm:$0xff] }
0x1022   :  { %v1780_v3 = vpop.xlane.xlu0 %1779 }
0x1023   :  { %3101 = vrcp.f32 %v1780_v3  ;;  %v1795_v6 = vand.u32 2147483648, %v1780_v3  ;;  %v1793_v11 = vand.u32 2147483647, %v1780_v3  ;;  %vm1789_vm5 = vweird.f32 %v1780_v3 }
0x1025   :  { %v1796_v16 = vor.u32 1.1754944e-38, %v1795_v6  ;;  %vm1794_vm8 = vcmp.eq.f32.partialorder %v1793_v11, 8.507059e+37 }
0x1029   :  { %v3102_v4 = vpop.eup %3101 }
0x102a   :  { %v1785_v5 = vmul.f32 %v3102_v4, %v1780_v3  ;;  %v1783_v7 = vpop.xlane.xlu1 %1782  ;;  %vm1790_vm4 = vweird.f32 %v3102_v4 }
0x102b   :  { %3103 = vrcp.f32 %v1783_v7  ;;  %vm1791_vm6 = vmor %vm1789_vm5, %vm1790_vm4  ;;  %v1810_v59 = vand.u32 2147483648, %v1783_v7  ;;  %v1808_v23 = vand.u32 2147483647, %v1783_v7  ;;  %vm1804_vm14 = vweird.f32 %v1783_v7 }
0x102c   :  { %v1786_v8 = vsub.f32 1.0, %v1785_v5 }
0x102d   :  { %v1811_v25 = vor.u32 1.1754944e-38, %v1810_v59  ;;  %vm1809_vm2 = vcmp.eq.f32.partialorder %v1808_v23, 8.507059e+37 }
0x102e   :  { %v1787_v9 = vmul.f32 %v3102_v4, %v1786_v8 }
0x1030   :  { %v1788_v13 = vadd.f32 %v3102_v4, %v1787_v9 }
0x1031   :  { %v3104_v15 = vpop.eup %3103 }
0x1032   :  { %v1792_v17 = vsel %vm1791_vm6, %v3102_v4, %v1788_v13  ;;  %v1800_v18 = vmul.f32 %v3104_v15, %v1783_v7  ;;  %vm1805_vm13 = vweird.f32 %v3104_v15 }
0x1033   :  { %v1797_v19 = vsel %vm1794_vm8, %v1796_v16, %v1792_v17  ;;  %vm1806_vm15 = vmor %vm1804_vm14, %vm1805_vm13 }
0x1034   :  { %v1801_v54 = vsub.f32 1.0, %v1800_v18  ;;  %v1798_v21 = vmul.f32 %v3098_v62, %v1797_v19  ;;  %v2889_v62 = vld [vmem:[%s4519_s8 + $0xd8] sm:$0xff] }
0x1035   :  { %2138 = vmatpush.msrb.mxu3 %v2889_v62 }
0x1036   :  { %v1802_v36 = vmul.f32 %v3104_v15, %v1801_v54  ;;  %2933 = vmatmul.msk.f32.vlgmr.msrb.gmra.mxu2 %vm571_vm11, %v1798_v21 }
0x1037   :  { %2112 = vmatpush.msrb.mxu2 %v2869_v22  ;;  %2139 = vmatpush.msrb.mxu3 %v2888_v0 }
0x1038   :  { %v1803_v10 = vadd.f32 %v3104_v15, %v1802_v36 }
0x1039   :  { %2113 = vmatpush.msrb.mxu2 %v2868_v40  ;;  %2140 = vmatpush.msrb.mxu3 %v2887_v1  ;;  %v3036_v1 = vld [vmem:[%s4522_s11 + $0x6] ss:$0 sm:$0xff] }
0x103a   :  { %v1807_v26 = vsel %vm1806_vm15, %v3104_v15, %v1803_v10 }
0x103b   :  { %v1812_v28 = vsel %vm1809_vm2, %v1811_v25, %v1807_v26  ;;  %2114 = vmatpush.msrb.mxu2 %v2867_v24  ;;  %2141 = vmatpush.msrb.mxu3 %v2886_v63  ;;  %v2919_v25 = vld [vmem:[%s4523_s12 + $0x28] sm:$0xff]  ;;  %v2909_v26 = vld [vmem:[%s4521_s10 + $0xd8] sm:$0xff] }
0x103c   :  { %v1813_v29 = vmul.f32 %v3100_v2, %v1812_v28  ;;  %2060 = vmatpush.msra.mxu0 %v2919_v25  ;;  %v2907_v28 = vld [vmem:[%s4521_s10 + $0xc8] sm:$0xff]  ;;  %v2913_v25 = vld [vmem:[%s4521_s10 + $0xf8] sm:$0xff] }
0x103d   :  { %2115 = vmatpush.msrb.mxu2 %v2866_v27  ;;  %v2908_v27 = vld [vmem:[%s4521_s10 + $0xd0] sm:$0xff] }
0x103e   :  { %2934 = vmatmul.msk.f32.gmra.mxu2 %vm571_vm11, %v1813_v29  ;;  %2164 = vmatpush.msrb.mxu0 %v2909_v26  ;;  %v2906_v29 = vld [vmem:[%s4521_s10 + $0xc0] sm:$0xff]  ;;  %v2912_v26 = vld [vmem:[%s4521_s10 + $0xf0] sm:$0xff] }
0x1040   :  { %2165 = vmatpush.msrb.mxu0 %v2908_v27  ;;  %v2911_v27 = vld [vmem:[%s4521_s10 + $0xe8] sm:$0xff] }
0x1042   :  { %2166 = vmatpush.msrb.mxu0 %v2907_v28 }
0x1044   :  { %2167 = vmatpush.msrb.mxu0 %v2906_v29  ;;  %v2910_v29 = vld [vmem:[%s4521_s10 + $0xe0] sm:$0xff] }
0x1046   :  { %2943 = vmatmul.msk.f32.vlgmr.msra.gmra.mxu2 %vm535_vm9, %v1867_v32  ;;  %v2872_v32 = vld [vmem:[%s4551_s4 + $0xf0] sm:$0xff] }
0x104e   :  { %2944 = vmatmul.msk.f32.gmra.mxu2 %vm535_vm9, %v1870_v34  ;;  %v2870_v34 = vld [vmem:[%s4551_s4 + $0xe0] sm:$0xff] }
0x1056   :  { %2952 = vmatmul.msk.f32.vlgmr.msrb.gmra.mxu2 %vm324_vm0, %v4147_v12 }
0x105e   :  { %2953 = vmatmul.msk.f32.gmra.mxu2 %vm324_vm0, %v4156_v51 }
0x10b9   :  { %v1840_v37 = vpop.f32.mrf.mxu2 }
0x10ba   :  { %2950 = vmatmul.msk.f32.vlgmr.msra.gmra.mxu1 %vm535_vm9, %v1840_v37 }
0x10c1   :  { %v1843_v38 = vpop.f32.mrf.mxu2 }
0x10c2   :  { %2951 = vmatmul.msk.f32.gmra.mxu1 %vm535_vm9, %v1843_v38  ;;  %v3035_v38 = vld [vmem:[%s4520_s9 + $0x6] ss:$0 sm:$0xff] }
0x10c9   :  { %v1953_v39 = vpop.f32.mrf.mxu2 }
0x10ca   :  { %v1954_v42 = vadd.f32 %v4210_v41, %v1953_v39 }
0x10cc   :  { %v1959_v43 = vsel %vm571_vm11, %v1954_v42, -inf }
0x10cd   :  { %1960 = vmax.xlane.f32.xlu2 %v1959_v43 }
0x10d1   :  { %v1956_v44 = vpop.f32.mrf.mxu2 }
0x10d2   :  { %v1957_v46 = vadd.f32 %v4217_v45, %v1956_v44  ;;  %v3034_v44 = vld [vmem:[%s4518_s7 + $0x6] ss:$0 sm:$0xff] }
0x10d4   :  { %v1962_v47 = vsel %vm575_vm12, %v1957_v46, -inf }
0x10d5   :  { %1963 = vmax.xlane.f32.xlu0 %v1962_v47  ;;  %v2893_v47 = vld [vmem:[%s4519_s8 + $0xf8] sm:$0xff] }
0x10d9   :  { %v2117_v43 = vpop.f32.mrf.mxu2 }
0x1140   :  { %v1961_v48 = vpop.xlane.xlu2 %1960 }
0x1141   :  { %v1965_v49 = vsub.f32 %v1954_v42, %v1961_v48  ;;  %v2118_v48 = vadd.f32 %v3034_v44, %v2117_v43 }
0x1143   :  { %v1967_v52 = vmul.f32 1.442695, %v1965_v49  ;;  %v2892_v49 = vld [vmem:[%s4519_s8 + $0xf0] sm:$0xff] }
0x1145   :  { %3105 = vpow2.f32 %v1967_v52  ;;  %v2891_v52 = vld [vmem:[%s4519_s8 + $0xe8] sm:$0xff] }
0x1148   :  { %v1964_v53 = vpop.xlane.xlu0 %1963 }
0x1149   :  { %v1966_v55 = vsub.f32 %v1957_v46, %v1964_v53  ;;  %v2890_v53 = vld [vmem:[%s4519_s8 + $0xe0] sm:$0xff] }
0x114b   :  { %v3106_v56 = vpop.eup %3105  ;;  %v1969_v57 = vmul.f32 1.442695, %v1966_v55  ;;  %v2120_v55 = vpop.f32.mrf.mxu2 }
0x114c   :  { %v1971_v58 = vsel %vm571_vm11, %v3106_v56, 0.0 }
0x114d   :  { %3107 = vpow2.f32 %v1969_v57  ;;  %1972 = vadd.xlane.f32.xlu1 %v1971_v58  ;;  %v4342_v57 = vpop.f32.mrf.mxu1 }
0x1153   :  { %v3108_v60 = vpop.eup %3107 }
0x1154   :  { %v1974_v61 = vsel %vm575_vm12, %v3108_v60, 0.0 }
0x1155   :  { %1975 = vadd.xlane.f32.xlu2 %v1974_v61 }
0x11c0   :  { %v1973_v2 = vpop.xlane.xlu1 %1972 }
0x11c1   :  { %3109 = vrcp.f32 %v1973_v2  ;;  %v1988_v8 = vand.u32 2147483648, %v1973_v2  ;;  %v1986_v9 = vand.u32 2147483647, %v1973_v2  ;;  %vm1982_vm4 = vweird.f32 %v1973_v2 }
0x11c3   :  { %v1989_v15 = vor.u32 1.1754944e-38, %v1988_v8  ;;  %vm1987_vm6 = vcmp.eq.f32.partialorder %v1986_v9, 8.507059e+37 }
0x11c7   :  { %v3110_v3 = vpop.eup %3109 }
0x11c8   :  { %v1978_v4 = vmul.f32 %v3110_v3, %v1973_v2  ;;  %v1976_v5 = vpop.xlane.xlu2 %1975  ;;  %vm1983_vm3 = vweird.f32 %v3110_v3 }
0x11c9   :  { %3111 = vrcp.f32 %v1976_v5  ;;  %vm1984_vm5 = vmor %vm1982_vm4, %vm1983_vm3  ;;  %v2003_v21 = vand.u32 2147483648, %v1976_v5  ;;  %v2001_v59 = vand.u32 2147483647, %v1976_v5  ;;  %vm1997_vm13 = vweird.f32 %v1976_v5 }
0x11ca   :  { %v1979_v7 = vsub.f32 1.0, %v1978_v4 }
0x11cb   :  { %v2004_v23 = vor.u32 1.1754944e-38, %v2003_v21  ;;  %vm2002_vm15 = vcmp.eq.f32.partialorder %v2001_v59, 8.507059e+37 }
0x11cc   :  { %v1980_v6 = vmul.f32 %v3110_v3, %v1979_v7 }
0x11ce   :  { %v1981_v11 = vadd.f32 %v3110_v3, %v1980_v6 }
0x11cf   :  { %v3112_v13 = vpop.eup %3111 }
0x11d0   :  { %v1985_v16 = vsel %vm1984_vm5, %v3110_v3, %v1981_v11  ;;  %v1993_v17 = vmul.f32 %v3112_v13, %v1976_v5  ;;  %vm1998_vm8 = vweird.f32 %v3112_v13  ;;  %v2920_v3 = vld [vmem:[%s4523_s12 + $0x30] sm:$0xff] }
0x11d1   :  { %v1990_v18 = vsel %vm1987_vm6, %v1989_v15, %v1985_v16  ;;  %vm1999_vm14 = vmor %vm1997_vm13, %vm1998_vm8  ;;  %v3038_v15 = vld [vmem:[%s4520_s9 + $0x7] ss:$0 sm:$0xff] }
0x11d2   :  { %v1994_v19 = vsub.f32 1.0, %v1993_v17  ;;  %v1991_v54 = vmul.f32 %v3106_v56, %v1990_v18  ;;  %v2121_v56 = vadd.f32 %v3034_v44, %v2120_v55 }
0x11d4   :  { %v1995_v22 = vmul.f32 %v3112_v13, %v1994_v19  ;;  %2946 = vmatmul.msk.f32.vlgmr.msra.gmra.mxu3 %vm571_vm11, %v1991_v54 }
0x11d5   :  { %2311 = vmatpush.msra.mxu3 %v2920_v3  ;;  %v3037_v3 = vld [vmem:[%s4518_s7 + $0x7] ss:$0 sm:$0xff] }
0x11d6   :  { %v1996_v36 = vadd.f32 %v3112_v13, %v1995_v22 }
0x11d8   :  { %v2000_v40 = vsel %vm1999_vm14, %v3112_v13, %v1996_v36 }
0x11d9   :  { %v2005_v10 = vsel %vm2002_vm15, %v2004_v23, %v2000_v40 }
0x11da   :  { %v2006_v24 = vmul.f32 %v3108_v60, %v2005_v10  ;;  %v2094_v60 = vpop.f32.mrf.mxu1 }
0x11dc   :  { %2947 = vmatmul.msk.f32.gmra.mxu3 %vm571_vm11, %v2006_v24 }
0x11e4   :  { %2954 = vmatmul.msk.f32.vlgmr.msrb.gmra.mxu3 %vm324_vm0, %v4147_v12 }
0x11ec   :  { %2955 = vmatmul.msk.f32.gmra.mxu3 %vm324_vm0, %v4156_v51 }
0x1257   :  { %v2033_v31 = vpop.f32.mrf.mxu3 }
0x1258   :  { %2948 = vmatmul.msk.f32.vlgmr.msra.gmra.mxu0 %vm535_vm9, %v2033_v31 }
0x1259   :  { %2336 = vmatpush.msra.mxu0 %v2873_v30 }
0x125b   :  { %2337 = vmatpush.msra.mxu0 %v2872_v32 }
0x125d   :  { %2338 = vmatpush.msra.mxu0 %v2871_v33 }
0x125f   :  { %v2036_v35 = vpop.f32.mrf.mxu3  ;;  %2339 = vmatpush.msra.mxu0 %v2870_v34 }
0x1260   :  { %2949 = vmatmul.msk.f32.gmra.mxu0 %vm535_vm9, %v2036_v35 }
0x1267   :  { %v2143_v37 = vpop.f32.mrf.mxu3 }
0x1268   :  { %2956 = vmatmul.msk.f32.vlgmr.msrb.gmra.mxu0 %vm324_vm0, %v4147_v12  ;;  %v2144_v46 = vadd.f32 %v3035_v38, %v2143_v37 }
0x126f   :  { %v2146_v39 = vpop.f32.mrf.mxu3 }
0x1270   :  { %v2147_v42 = vadd.f32 %v3035_v38, %v2146_v39  ;;  %2957 = vmatmul.msk.f32.gmra.mxu0 %vm324_vm0, %v4156_v51 }
0x1272   :  { %2958 = vmatpush.xpose.msk.msrb.mxu1 %vm535_vm9, %v2147_v42 }
0x1276   :  { %2959 = vmatpush.xpose.msk.msrb.mxu1 %vm535_vm9, %v2144_v46 }
0x1278   :  { %2967 = vmatmul.msk.f32.vlgmr.msra.gmra.mxu0 %vm324_vm0, %v4147_v12 }
0x1279   :  { %2960 = vmatmul.msk.f32.vlgmr.msrb.gmra.mxu1 %vm535_vm9, %v2118_v48 }
0x127a   :  { %2362 = vmatpush.msra.mxu1 %v2893_v47 }
0x127c   :  { %2363 = vmatpush.msra.mxu1 %v2892_v49 }
0x127e   :  { %2364 = vmatpush.msra.mxu1 %v2891_v52 }
0x1280   :  { %2365 = vmatpush.msra.mxu1 %v2890_v53  ;;  %2968 = vmatmul.msk.f32.gmra.mxu0 %vm324_vm0, %v4156_v51 }
0x1281   :  { %2961 = vmatmul.msk.f32.gmra.mxu1 %vm535_vm9, %v2121_v56 }
0x1289   :  { %2969 = vmatmul.msk.f32.vlgmr.msra.gmra.mxu1 %vm324_vm0, %v4147_v12 }
0x1291   :  { %2970 = vmatmul.msk.f32.gmra.mxu1 %vm324_vm0, %v4156_v51 }
0x12d5   :  { %v4344_v58 = vpop.f32.mrf.mxu0 }
0x12dd   :  { %v2065_v61 = vpop.f32.mrf.mxu0 }
0x12de   :  { %v4346_v62 = vadd.f32 %v2094_v60, %v2065_v61 }
0x12e5   :  { %v2169_v0 = vpop.f32.mrf.mxu0 }
0x12e6   :  { %v2170_v4 = vadd.f32 %v3036_v1, %v2169_v0 }
0x12ed   :  { %v2172_v2 = vpop.f32.mrf.mxu0 }
0x12ee   :  { %v2173_v63 = vadd.f32 %v3036_v1, %v2172_v2 }
0x12f0   :  { %2962 = vmatpush.msk.msra.mxu2 %vm627_vm10, %v2173_v63 }
0x12f2   :  { %2282 = vmatpush.msra.mxu2 %v2170_v4 }
0x12f4   :  { %2388 = vmatpush.msrb.mxu2 %v2913_v25 }
0x12f5   :  { %v2341_v63 = vpop.f32.mrf.mxu0 }
0x12f6   :  { %v2204_v5 = vpop.f32.mrf.mxu1  ;;  %2389 = vmatpush.msrb.mxu2 %v2912_v26  ;;  %v2342_v4 = vadd.f32 %v3037_v3, %v2341_v63 }
0x12f7   :  { %v2205_v7 = vadd.f32 %v4210_v41, %v2204_v5 }
0x12f8   :  { %2390 = vmatpush.msrb.mxu2 %v2911_v27 }
0x12f9   :  { %v2210_v8 = vsel %vm571_vm11, %v2205_v7, -inf }
0x12fa   :  { %2211 = vmax.xlane.f32.xlu0 %v2210_v8  ;;  %2391 = vmatpush.msrb.mxu2 %v2910_v29 }
0x12fe   :  { %v2207_v6 = vpop.f32.mrf.mxu1 }
0x12ff   :  { %v2208_v9 = vadd.f32 %v4217_v45, %v2207_v6 }
0x1301   :  { %v2213_v11 = vsel %vm575_vm12, %v2208_v9, -inf }
0x1302   :  { %2214 = vmax.xlane.f32.xlu1 %v2213_v11  ;;  %v2092_v11 = vadd.f32 %v4342_v57, %v4344_v58 }
0x1306   :  { %v2367_v13 = vpop.f32.mrf.mxu1 }
0x1307   :  { %v2368_v18 = vadd.f32 %v3038_v15, %v2367_v13 }
0x130e   :  { %v2370_v16 = vpop.f32.mrf.mxu1 }
0x130f   :  { %v2371_v17 = vadd.f32 %v3038_v15, %v2370_v16 }
0x1311   :  { %2973 = vmatpush.xpose.msk.msrb.mxu3 %vm535_vm9, %v2371_v17 }
0x1315   :  { %2974 = vmatpush.xpose.msk.msrb.mxu3 %vm535_vm9, %v2368_v18 }
0x136d   :  { %v2212_v19 = vpop.xlane.xlu0 %2211 }
0x136e   :  { %v2216_v54 = vsub.f32 %v2205_v7, %v2212_v19  ;;  %v2344_v7 = vpop.f32.mrf.mxu0 }
0x1370   :  { %v2218_v21 = vmul.f32 1.442695, %v2216_v54 }
0x1372   :  { %3113 = vpow2.f32 %v2218_v21 }
0x1375   :  { %v2215_v22 = vpop.xlane.xlu1 %2214 }
0x1376   :  { %v2217_v59 = vsub.f32 %v2208_v9, %v2215_v22 }
0x1378   :  { %v3114_v36 = vpop.eup %3113  ;;  %v2220_v23 = vmul.f32 1.442695, %v2217_v59 }
0x1379   :  { %v2222_v40 = vsel %vm571_vm11, %v3114_v36, 0.0 }
0x137a   :  { %3115 = vpow2.f32 %v2220_v23  ;;  %2223 = vadd.xlane.f32.xlu2 %v2222_v40 }
0x1380   :  { %v3116_v10 = vpop.eup %3115 }
0x1381   :  { %v2225_v24 = vsel %vm575_vm12, %v3116_v10, 0.0 }
0x1382   :  { %2226 = vadd.xlane.f32.xlu0 %v2225_v24 }
0x13ed   :  { %v2224_v28 = vpop.xlane.xlu2 %2223 }
0x13ee   :  { %3117 = vrcp.f32 %v2224_v28  ;;  %v2239_v34 = vand.u32 2147483648, %v2224_v28  ;;  %v2237_v37 = vand.u32 2147483647, %v2224_v28  ;;  %vm2233_vm3 = vweird.f32 %v2224_v28 }
0x13f0   :  { %v2240_v42 = vor.u32 1.1754944e-38, %v2239_v34  ;;  %vm2238_vm5 = vcmp.eq.f32.partialorder %v2237_v37, 8.507059e+37 }
0x13f4   :  { %v3118_v30 = vpop.eup %3117 }
0x13f5   :  { %v2229_v31 = vmul.f32 %v3118_v30, %v2224_v28  ;;  %v2227_v32 = vpop.xlane.xlu0 %2226  ;;  %vm2234_vm2 = vweird.f32 %v3118_v30 }
0x13f6   :  { %3119 = vrcp.f32 %v2227_v32  ;;  %vm2235_vm4 = vmor %vm2233_vm3, %vm2234_vm2  ;;  %v2254_v49 = vand.u32 2147483648, %v2227_v32  ;;  %v2252_v53 = vand.u32 2147483647, %v2227_v32  ;;  %vm2248_vm8 = vweird.f32 %v2227_v32 }
0x13f7   :  { %v2230_v33 = vsub.f32 1.0, %v2229_v31 }
0x13f8   :  { %v2255_v56 = vor.u32 1.1754944e-38, %v2254_v49  ;;  %vm2253_vm14 = vcmp.eq.f32.partialorder %v2252_v53, 8.507059e+37 }
0x13f9   :  { %v2231_v35 = vmul.f32 %v3118_v30, %v2230_v33 }
0x13fb   :  { %v2232_v38 = vadd.f32 %v3118_v30, %v2231_v35 }
0x13fc   :  { %v3120_v39 = vpop.eup %3119 }
0x13fd   :  { %v2236_v43 = vsel %vm2235_vm4, %v3118_v30, %v2232_v38  ;;  %v2244_v44 = vmul.f32 %v3120_v39, %v2227_v32  ;;  %vm2249_vm6 = vweird.f32 %v3120_v39 }
0x13fe   :  { %v2241_v46 = vsel %vm2238_vm5, %v2240_v42, %v2236_v43  ;;  %vm2250_vm13 = vmor %vm2248_vm8, %vm2249_vm6 }
0x13ff   :  { %v2242_v47 = vmul.f32 %v3114_v36, %v2241_v46  ;;  %v2245_v48 = vsub.f32 1.0, %v2244_v44 }
0x1401   :  { %v2246_v52 = vmul.f32 %v3120_v39, %v2245_v48  ;;  %2963 = vmatmul.msk.f32.vlgmr.msra.gmra.mxu2 %vm571_vm11, %v2242_v47 }
0x1403   :  { %v2247_v55 = vadd.f32 %v3120_v39, %v2246_v52 }
0x1405   :  { %v2251_v60 = vsel %vm2250_vm13, %v3120_v39, %v2247_v55 }
0x1406   :  { %v2256_v61 = vsel %vm2253_vm14, %v2255_v56, %v2251_v60 }
0x1407   :  { %v2257_v0 = vmul.f32 %v3116_v10, %v2256_v61 }
0x1409   :  { %2964 = vmatmul.msk.f32.gmra.mxu2 %vm571_vm11, %v2257_v0 }
0x1411   :  { %2971 = vmatmul.msk.f32.vlgmr.msrb.gmra.mxu2 %vm324_vm0, %v4147_v12  ;;  %v2345_v12 = vadd.f32 %v3037_v3, %v2344_v7 }
0x1419   :  { %2972 = vmatmul.msk.f32.gmra.mxu2 %vm324_vm0, %v4156_v51  ;;  %v3039_v51 = vld [vmem:[%s4522_s11 + $0x7] ss:$0 sm:$0xff] }
0x1484   :  { %v2284_v1 = vpop.f32.mrf.mxu2 }
0x1485   :  { %2965 = vmatmul.msk.f32.vlgmr.msra.gmra.mxu3 %vm535_vm9, %v2284_v1 }
0x148c   :  { %v2287_v2 = vpop.f32.mrf.mxu2 }
0x148d   :  { %2966 = vmatmul.msk.f32.gmra.mxu3 %vm535_vm9, %v2287_v2  ;;  %v3040_v2 = vld [vmem:[%s4524_s13 + $0x1] ss:$0 sm:$0xff] }
0x1494   :  { %v2393_v5 = vpop.f32.mrf.mxu2 }
0x1495   :  { %2975 = vmatmul.msk.f32.vlgmr.msrb.gmra.mxu3 %vm535_vm9, %v2342_v4  ;;  %v2394_v9 = vadd.f32 %v3039_v51, %v2393_v5 }
0x149c   :  { %v2396_v8 = vpop.f32.mrf.mxu2 }
0x149d   :  { %v2397_v6 = vadd.f32 %v3039_v51, %v2396_v8  ;;  %2976 = vmatmul.msk.f32.gmra.mxu3 %vm535_vm9, %v2345_v12 }
0x149f   :  { %2977 = vmatpush.msk.msrb.mxu0 %vm627_vm10, %v2397_v6 }
0x14a1   :  { %2506 = vmatpush.msrb.mxu0 %v2394_v9 }
0x1508   :  { %v2313_v13 = vpop.f32.mrf.mxu3 }
0x1509   :  { %v4397_v15 = vadd.f32 %v2313_v13, %v2092_v11 }
0x1510   :  { %v2316_v16 = vpop.f32.mrf.mxu3 }
0x1511   :  { %v4400_v17 = vadd.f32 %v2316_v16, %v4346_v62 }
0x1518   :  { %v2428_v18 = vpop.f32.mrf.mxu3 }
0x1519   :  { %v2429_v19 = vadd.f32 %v4210_v41, %v2428_v18 }
0x151b   :  { %v2434_v54 = vsel %vm571_vm11, %v2429_v19, -inf }
0x151c   :  { %2435 = vmax.xlane.f32.xlu1 %v2434_v54  ;;  %v2987_v54 = vld [vmem:[%s4527_s16 + $0x30] sm:$0xff] }
0x1520   :  { %v2431_v21 = vpop.f32.mrf.mxu3 }
0x1521   :  { %v2432_v22 = vadd.f32 %v4217_v45, %v2431_v21  ;;  %v2921_v45 = vld [vmem:[%s4523_s12 + $0x38] sm:$0xff]  ;;  %v2986_v21 = vld [vmem:[%s4527_s16 + $0x28] sm:$0xff] }
0x1522   :  { %2535 = vmatpush.msrb.mxu1 %v2921_v45 }
0x1523   :  { %v2437_v59 = vsel %vm575_vm12, %v2432_v22, -inf }
0x1524   :  { %2438 = vmax.xlane.f32.xlu2 %v2437_v59 }
0x158f   :  { %v2436_v57 = vpop.xlane.xlu1 %2435 }
0x1590   :  { %v2440_v58 = vsub.f32 %v2429_v19, %v2436_v57  ;;  %v2988_v19 = vld [vmem:[%s4527_s16 + $0x38] sm:$0xff] }
0x1591   :  { %2640 = vmatpush.msra.mxu2 %v2988_v19 }
0x1592   :  { %v2442_v36 = vmul.f32 1.442695, %v2440_v58 }
0x1593   :  { %2641 = vmatpush.msra.mxu2 %v2987_v54 }
0x1594   :  { %3121 = vpow2.f32 %v2442_v36 }
0x1595   :  { %2642 = vmatpush.msra.mxu2 %v2986_v21  ;;  %v3044_v21 = vld [vmem:[%s4530_s19 + $0x1] ss:$0 sm:$0xff] }
0x1597   :  { %v2439_v23 = vpop.xlane.xlu2 %2438 }
0x1598   :  { %v2441_v40 = vsub.f32 %v2432_v22, %v2439_v23  ;;  %v2985_v22 = vld [vmem:[%s4527_s16 + $0x20] sm:$0xff] }
0x1599   :  { %2643 = vmatpush.msra.mxu2 %v2985_v22 }
0x159a   :  { %v3122_v62 = vpop.eup %3121  ;;  %v2444_v10 = vmul.f32 1.442695, %v2441_v40 }
0x159b   :  { %v2446_v24 = vsel %vm571_vm11, %v3122_v62, 0.0 }
0x159c   :  { %3123 = vpow2.f32 %v2444_v10  ;;  %2447 = vadd.xlane.f32.xlu0 %v2446_v24 }
0x15a2   :  { %v3124_v41 = vpop.eup %3123 }
0x15a3   :  { %v2449_v25 = vsel %vm575_vm12, %v3124_v41, 0.0 }
0x15a4   :  { %2450 = vadd.xlane.f32.xlu1 %v2449_v25 }
0x160f   :  { %v2448_v26 = vpop.xlane.xlu0 %2447 }
0x1610   :  { %3125 = vrcp.f32 %v2448_v26  ;;  %v2463_v31 = vand.u32 2147483648, %v2448_v26  ;;  %v2461_v33 = vand.u32 2147483647, %v2448_v26  ;;  %vm2457_vm15 = vweird.f32 %v2448_v26 }
0x1612   :  { %v2464_v37 = vor.u32 1.1754944e-38, %v2463_v31  ;;  %vm2462_vm2 = vcmp.eq.f32.partialorder %v2461_v33, 8.507059e+37  ;;  %v3042_v31 = vld [vmem:[%s4526_s15 + $0x1] ss:$0 sm:$0xff] }
0x1616   :  { %v3126_v27 = vpop.eup %3125 }
0x1617   :  { %v2453_v28 = vmul.f32 %v3126_v27, %v2448_v26  ;;  %v2451_v29 = vpop.xlane.xlu1 %2450  ;;  %vm2458_vm10 = vweird.f32 %v3126_v27 }
0x1618   :  { %3127 = vrcp.f32 %v2451_v29  ;;  %vm2459_vm12 = vmor %vm2457_vm15, %vm2458_vm10  ;;  %v2478_v46 = vand.u32 2147483648, %v2451_v29  ;;  %v2476_v48 = vand.u32 2147483647, %v2451_v29  ;;  %vm2472_vm4 = vweird.f32 %v2451_v29 }
0x1619   :  { %v2454_v30 = vsub.f32 1.0, %v2453_v28  ;;  %v3041_v28 = vld [vmem:[%s4525_s14 + $0x1] ss:$0 sm:$0xff]  ;;  %s3172_s14 = smov 8  }
0x161a   :  { %v2479_v52 = vor.u32 1.1754944e-38, %v2478_v46  ;;  %vm2477_vm6 = vcmp.eq.f32.partialorder %v2476_v48, 8.507059e+37  ;;  %v2999_v46 = vld [vmem:[%s4529_s18 + $0x78] sm:$0xff]  ;;  %v2997_v48 = vld [vmem:[%s4529_s18 + $0x68] sm:$0xff] }
0x161b   :  { %v2455_v32 = vmul.f32 %v3126_v27, %v2454_v30  ;;  %2692 = vmatpush.msra.mxu3 %v2999_v46 }
0x161d   :  { %v2456_v34 = vadd.f32 %v3126_v27, %v2455_v32 }
0x161e   :  { %v3128_v35 = vpop.eup %3127 }
0x161f   :  { %v2460_v38 = vsel %vm2459_vm12, %v3126_v27, %v2456_v34  ;;  %v2468_v39 = vmul.f32 %v3128_v35, %v2451_v29  ;;  %vm2473_vm3 = vweird.f32 %v3128_v35 }
0x1620   :  { %v2465_v42 = vsel %vm2462_vm2, %v2464_v37, %v2460_v38  ;;  %vm2474_vm5 = vmor %vm2472_vm4, %vm2473_vm3 }
0x1621   :  { %v2466_v43 = vmul.f32 %v3122_v62, %v2465_v42  ;;  %v2469_v44 = vsub.f32 1.0, %v2468_v39 }
0x1623   :  { %v2470_v47 = vmul.f32 %v3128_v35, %v2469_v44  ;;  %2978 = vmatmul.msk.f32.vlgmr.msrb.gmra.mxu0 %vm571_vm11, %v2466_v43 }
0x1625   :  { %v2471_v49 = vadd.f32 %v3128_v35, %v2470_v47  ;;  %v2998_v47 = vld [vmem:[%s4529_s18 + $0x70] sm:$0xff] }
0x1626   :  { %2693 = vmatpush.msra.mxu3 %v2998_v47  ;;  %v3045_v47 = vld [vmem:[%s4531_s20] ss:$0 sm:$0xff]  ;;  %s3170_s20 = smov [#allocation2]  }
0x1627   :  { %v2475_v53 = vsel %vm2474_vm5, %v3128_v35, %v2471_v49  ;;  %v2996_v49 = vld [vmem:[%s4529_s18 + $0x60] sm:$0xff]  ;;  %s2778_s16 = sshll.u32 %s3170_s20, 4  ;;  %s2779_s16 = int_to_ptr.vmem [resolvable:$true] %s2778_s16 }
0x1628   :  { %v2480_v55 = vsel %vm2477_vm6, %v2479_v52, %v2475_v53  ;;  %2694 = vmatpush.msra.mxu3 %v2997_v48  ;;  %v2995_v52 = vld [vmem:[%s4529_s18 + $0x58] sm:$0xff]  ;;  %v2994_v53 = vld [vmem:[%s4529_s18 + $0x50] sm:$0xff] }
0x1629   :  { %v2481_v56 = vmul.f32 %v3124_v41, %v2480_v55  ;;  %v2993_v55 = vld [vmem:[%s4529_s18 + $0x48] sm:$0xff] }
0x162a   :  { %2695 = vmatpush.msra.mxu3 %v2996_v49 }
0x162b   :  { %2979 = vmatmul.msk.f32.gmra.mxu0 %vm571_vm11, %v2481_v56  ;;  %v2992_v56 = vld [vmem:[%s4529_s18 + $0x40] sm:$0xff] }
0x162c   :  { %2696 = vmatpush.msra.mxu3 %v2995_v52  ;;  %v3046_v52 = vld [vmem:[%s4532_s21] ss:$0 sm:$0xff]  ;;  %s3171_s21 = smov 128  }
0x162e   :  { %2697 = vmatpush.msra.mxu3 %v2994_v53 }
0x1630   :  { %2698 = vmatpush.msra.mxu3 %v2993_v55 }
0x1632   :  { %2699 = vmatpush.msra.mxu3 %v2992_v56 }
0x16a0   :  { %v2508_v60 = vpop.f32.mrf.mxu0 }
0x16a1   :  { %2980 = vmatmul.msk.f32.vlgmr.msrb.gmra.mxu1 %vm535_vm9, %v2508_v60  ;;  %v3043_v60 = vld [vmem:[%s4528_s17 + $0x1] ss:$0 sm:$0xff] }
0x16a8   :  { %v2511_v61 = vpop.f32.mrf.mxu0 }
0x16a9   :  { %2981 = vmatmul.msk.f32.gmra.mxu1 %vm535_vm9, %v2511_v61 }
0x171e   :  { %v2537_v0 = vpop.f32.mrf.mxu1 }
0x171f   :  { %v2543_v1 = vadd.f32 %v2537_v0, %v4397_v15 }
0x1721   :  { %v2545_v63 = vadd.f32 %v2543_v1, %v4055_v50 }
0x1723   :  { %v4420_v3 = vadd.f32 %v3040_v2, %v2545_v63 }
0x1725   :  { %v2558_v4 = vsel %vm324_vm0, %v4420_v3, 0.0 }
0x1726   :  { %2559 = vadd.xlane.f32.xlu2 %v2558_v4  ;;  %v2540_v5 = vpop.f32.mrf.mxu1 }
0x1727   :  { %v2544_v7 = vadd.f32 %v2540_v5, %v4400_v17 }
0x1729   :  { %v2546_v12 = vadd.f32 %v2544_v7, %v4060_v20 }
0x172b   :  { %v4426_v51 = vadd.f32 %v3040_v2, %v2546_v12 }
0x172d   :  { %v2561_v8 = vsel %vm328_vm1, %v4426_v51, 0.0 }
0x172e   :  { %2562 = vadd.xlane.f32.xlu0 %v2561_v8 }
0x1799   :  { %v2560_v6 = vpop.xlane.xlu2 %2559 }
0x179a   :  { %v2564_v50 = vmul.f32 %v2560_v6, %v3626_v14 }
0x179c   :  { %v2566_v9 = vsub.f32 %v4420_v3, %v2564_v50 }
0x179e   :  { %v2568_v11 = vmul.f32 %v2566_v9, %v2566_v9 }
0x17a0   :  { %v2570_v13 = vsel %vm324_vm0, %v2568_v11, 0.0 }
0x17a1   :  { %2571 = vadd.xlane.f32.xlu1 %v2570_v13  ;;  %v2563_v15 = vpop.xlane.xlu0 %2562 }
0x17a2   :  { %v2565_v16 = vmul.f32 %v2563_v15, %v3626_v14 }
0x17a4   :  { %v2567_v20 = vsub.f32 %v4426_v51, %v2565_v16 }
0x17a6   :  { %v2569_v17 = vmul.f32 %v2567_v20, %v2567_v20 }
0x17a8   :  { %v2573_v18 = vsel %vm328_vm1, %v2569_v17, 0.0 }
0x17a9   :  { %2574 = vadd.xlane.f32.xlu2 %v2573_v18 }
0x1814   :  { %v2572_v59 = vpop.xlane.xlu1 %2571 }
0x1815   :  { %v2576_v57 = vmul.f32 %v2572_v59, %v3626_v14 }
0x1817   :  { %v2578_v58 = vadd.f32 1e-06, %v2576_v57 }
0x1819   :  { %3129 = vrsqrt.f32 %v2578_v58  ;;  %vm2586_vm11 = vweird.f32 %v2578_v58 }
0x181c   :  { %v2575_v36 = vpop.xlane.xlu2 %2574 }
0x181d   :  { %v2577_v23 = vmul.f32 %v2575_v36, %v3626_v14 }
0x181f   :  { %v3130_v40 = vpop.eup %3129  ;;  %v2579_v62 = vadd.f32 1e-06, %v2577_v23 }
0x1820   :  { %v2581_v10 = vmul.f32 %v3130_v40, %v2578_v58  ;;  %vm2587_vm9 = vweird.f32 %v3130_v40 }
0x1821   :  { %3131 = vrsqrt.f32 %v2579_v62  ;;  %vm2588_vm8 = vmor %vm2586_vm11, %vm2587_vm9  ;;  %vm2596_vm14 = vweird.f32 %v2579_v62 }
0x1822   :  { %v2582_v24 = vmul.f32 %v3130_v40, %v2581_v10 }
0x1824   :  { %v2583_v41 = vmul.f32 0.5, %v2582_v24 }
0x1826   :  { %v2584_v25 = vsub.f32 1.5, %v2583_v41 }
0x1827   :  { %v3132_v45 = vpop.eup %3131 }
0x1828   :  { %v2585_v26 = vmul.f32 %v3130_v40, %v2584_v25  ;;  %v2591_v27 = vmul.f32 %v3132_v45, %v2579_v62  ;;  %vm2597_vm13 = vweird.f32 %v3132_v45 }
0x1829   :  { %vm2598_vm10 = vmor %vm2596_vm14, %vm2597_vm13 }
0x182a   :  { %v2589_v29 = vsel %vm2588_vm8, %v3130_v40, %v2585_v26  ;;  %v2592_v30 = vmul.f32 %v3132_v45, %v2591_v27 }
0x182b   :  { %v2600_v32 = vmul.f32 %v2589_v29, %v2566_v9 }
0x182c   :  { %v2593_v33 = vmul.f32 0.5, %v2592_v30 }
0x182d   :  { %v2605_v34 = vmul.f32 %v3041_v28, %v2600_v32 }
0x182e   :  { %v2594_v35 = vsub.f32 1.5, %v2593_v33 }
0x182f   :  { %v2610_v37 = vadd.f32 %v3042_v31, %v2605_v34 }
0x1830   :  { %v2595_v38 = vmul.f32 %v3132_v45, %v2594_v35 }
0x1831   :  { %2990 = vmatmul.msk.f32.vlgmr.msra.gmra.mxu2 %vm324_vm0, %v2610_v37 }
0x1832   :  { %v2599_v39 = vsel %vm2598_vm10, %v3132_v45, %v2595_v38 }
0x1833   :  { %v2601_v42 = vmul.f32 %v2599_v39, %v2567_v20 }
0x1835   :  { %v2606_v43 = vmul.f32 %v3041_v28, %v2601_v42 }
0x1837   :  { %v2611_v44 = vadd.f32 %v3042_v31, %v2606_v43 }
0x1839   :  { %2991 = vmatmul.msk.f32.gmra.mxu2 %vm324_vm0, %v2611_v44 }
0x18b4   :  { %v2645_v61 = vpop.f32.mrf.mxu2 }
0x18b5   :  { %v2646_v0 = vadd.f32 %v3043_v60, %v2645_v61 }
0x18b7   :  { %v2651_v1 = vmul.f32 %v2646_v0, %v2646_v0 }
0x18b9   :  { %v2653_v2 = vmul.f32 %v2651_v1, %v2646_v0 }
0x18bb   :  { %v2655_v63 = vmul.f32 0.044715, %v2653_v2 }
0x18bc   :  { %v2648_v4 = vpop.f32.mrf.mxu2 }
0x18bd   :  { %v2657_v5 = vadd.f32 %v2655_v63, %v2646_v0  ;;  %v2649_v7 = vadd.f32 %v3043_v60, %v2648_v4 }
0x18bf   :  { %v2659_v12 = vmul.f32 0.7978846, %v2657_v5  ;;  %v2652_v8 = vmul.f32 %v2649_v7, %v2649_v7 }
0x18c1   :  { %3133 = vtanh.f32 %v2659_v12  ;;  %v2654_v6 = vmul.f32 %v2652_v8, %v2649_v7 }
0x18c3   :  { %v2656_v50 = vmul.f32 0.044715, %v2654_v6 }
0x18c5   :  { %v2658_v9 = vadd.f32 %v2656_v50, %v2649_v7 }
0x18c7   :  { %v3134_v11 = vpop.eup %3133  ;;  %v2660_v13 = vmul.f32 0.7978846, %v2658_v9 }
0x18c8   :  { %v2663_v15 = vadd.f32 1.0, %v3134_v11 }
0x18c9   :  { %3135 = vtanh.f32 %v2660_v13 }
0x18ca   :  { %v2665_v16 = vmul.f32 0.5, %v2663_v15 }
0x18cc   :  { %v2667_v20 = vmul.f32 %v2665_v16, %v2646_v0 }
0x18ce   :  { %3000 = vmatmul.msk.f32.vlgmr.msra.gmra.mxu3 %vm1480_vm7, %v2667_v20 }
0x18cf   :  { %v3136_v17 = vpop.eup %3135 }
0x18d0   :  { %v2664_v18 = vadd.f32 1.0, %v3136_v17 }
0x18d2   :  { %v2666_v19 = vmul.f32 0.5, %v2664_v18 }
0x18d4   :  { %v2668_v54 = vmul.f32 %v2666_v19, %v2649_v7 }
0x18d6   :  { %3001 = vmatmul.msk.f32.gmra.mxu3 %vm1480_vm7, %v2668_v54 }
0x1951   :  { %v2701_v22 = vpop.f32.mrf.mxu3 }
0x1952   :  { %v2707_v59 = vadd.f32 %v2701_v22, %v4420_v3 }
0x1954   :  { %v2714_v57 = vadd.f32 %v3044_v21, %v2707_v59 }
0x1956   :  { %v2718_v58 = vsel %vm324_vm0, %v2714_v57, 0.0 }
0x1957   :  { %2719 = vadd.xlane.f32.xlu0 %v2718_v58 }
0x1959   :  { %v2704_v36 = vpop.f32.mrf.mxu3 }
0x195a   :  { %v2708_v23 = vadd.f32 %v2704_v36, %v4426_v51 }
0x195c   :  { %v2715_v40 = vadd.f32 %v3044_v21, %v2708_v23 }
0x195e   :  { %v2721_v62 = vsel %vm328_vm1, %v2715_v40, 0.0 }
0x195f   :  { %2722 = vadd.xlane.f32.xlu1 %v2721_v62 }
0x19ca   :  { %v2720_v10 = vpop.xlane.xlu0 %2719 }
0x19cb   :  { %v2724_v24 = vmul.f32 %v2720_v10, %v3626_v14 }
0x19cd   :  { %v2726_v41 = vsub.f32 %v2714_v57, %v2724_v24 }
0x19cf   :  { %v2728_v25 = vmul.f32 %v2726_v41, %v2726_v41 }
0x19d1   :  { %v2730_v45 = vsel %vm324_vm0, %v2728_v25, 0.0 }
0x19d2   :  { %v2723_v26 = vpop.xlane.xlu1 %2722  ;;  %2731 = vadd.xlane.f32.xlu2 %v2730_v45 }
0x19d3   :  { %v2725_v3 = vmul.f32 %v2723_v26, %v3626_v14 }
0x19d5   :  { %v2727_v27 = vsub.f32 %v2715_v40, %v2725_v3 }
0x19d7   :  { %v2729_v28 = vmul.f32 %v2727_v27, %v2727_v27 }
0x19d9   :  { %v2733_v29 = vsel %vm328_vm1, %v2729_v28, 0.0 }
0x19da   :  { %2734 = vadd.xlane.f32.xlu0 %v2733_v29 }
0x1a45   :  { %v2732_v51 = vpop.xlane.xlu2 %2731 }
0x1a46   :  { %v2736_v30 = vmul.f32 %v2732_v51, %v3626_v14 }
0x1a48   :  { %v2738_v31 = vadd.f32 1e-06, %v2736_v30 }
0x1a4a   :  { %3137 = vrsqrt.f32 %v2738_v31  ;;  %vm2746_vm15 = vweird.f32 %v2738_v31 }
0x1a4d   :  { %v2735_v32 = vpop.xlane.xlu0 %2734 }
0x1a4e   :  { %v2737_v33 = vmul.f32 %v2735_v32, %v3626_v14 }
0x1a50   :  { %v3138_v34 = vpop.eup %3137  ;;  %v2739_v35 = vadd.f32 1e-06, %v2737_v33 }
0x1a51   :  { %v2741_v37 = vmul.f32 %v3138_v34, %v2738_v31  ;;  %vm2747_vm7 = vweird.f32 %v3138_v34 }
0x1a52   :  { %3139 = vrsqrt.f32 %v2739_v35  ;;  %vm2748_vm12 = vmor %vm2746_vm15, %vm2747_vm7  ;;  %vm2756_vm3 = vweird.f32 %v2739_v35 }
0x1a53   :  { %v2742_v38 = vmul.f32 %v3138_v34, %v2741_v37 }
0x1a55   :  { %v2743_v39 = vmul.f32 0.5, %v2742_v38 }
0x1a57   :  { %v2744_v42 = vsub.f32 1.5, %v2743_v39 }
0x1a58   :  { %v3140_v43 = vpop.eup %3139 }
0x1a59   :  { %v2745_v44 = vmul.f32 %v3138_v34, %v2744_v42  ;;  %v2751_v46 = vmul.f32 %v3140_v43, %v2739_v35  ;;  %vm2757_vm2 = vweird.f32 %v3140_v43 }
0x1a5a   :  { %vm2758_vm4 = vmor %vm2756_vm3, %vm2757_vm2 }
0x1a5b   :  { %v2749_v48 = vsel %vm2748_vm12, %v3138_v34, %v2745_v44  ;;  %v2752_v49 = vmul.f32 %v3140_v43, %v2751_v46 }
0x1a5c   :  { %v2760_v14 = vmul.f32 %v2749_v48, %v2726_v41 }
0x1a5d   :  { %v2753_v53 = vmul.f32 0.5, %v2752_v49 }
0x1a5e   :  { %v2765_v55 = vmul.f32 %v3045_v47, %v2760_v14 }
0x1a5f   :  { %v2754_v56 = vsub.f32 1.5, %v2753_v53 }
0x1a60   :  { %v2770_v60 = vadd.f32 %v3046_v52, %v2765_v55 }
0x1a61   :  { %v2755_v61 = vmul.f32 %v3140_v43, %v2754_v56 }
0x1a62   :  { %2772 = vst.msk [vmem:[#allocation2] sm:$0xff] %vm324_vm0, %v2770_v60 }
0x1a63   :  { %v2759_v0 = vsel %vm2758_vm4, %v3140_v43, %v2755_v61 }
0x1a64   :  { %v2761_v1 = vmul.f32 %v2759_v0, %v2727_v27 }
0x1a66   :  { %v2766_v2 = vmul.f32 %v3045_v47, %v2761_v1 }
0x1a68   :  { %v2771_v63 = vadd.f32 %v3046_v52, %v2766_v2 }
0x1a6a   :  { %2773 = vst.msk [vmem:[#allocation2 + $0x8] sm:$0x3] %vm328_vm1, %v2771_v63 }
0x1a6b   :  { %2786 = dma.vmem_to_hbm [thread:$0]  %s2779_s16, 256, %s2781_s3, [#allocation3], %s3171_s21, %s3171_s21, %s3172_s14  }
0x1a6c   :  { %3167 = dma.done.wait [#allocation3], 256  }
0x1a6d   :  { %3168 = vsyncadd [#allocation3], 4294967040 }
0x1a6e   :  { %2791 = vsyncpa [#allocation3], 1 }

</bundles_post_ra>
